<compile_context>
chip_gen: v5e
topology: v5e:2x2
jax: 0.10.0
libtpu: 0.0.40
codegen_flags: <defaults>
</compile_context>

<pallas_src>
import numpy as np
import jax
import jax.numpy as jnp
from jax import lax
from jax.experimental import pallas as pl
from jax.experimental.pallas import tpu as pltpu


def _basic_block_kernel(x_ref, w1_ref, b1_ref, w2_ref, b2_ref, o_ref,
                        pad1_ref, pad2_ref):
    # x_ref   : (H, W, C)        bf16, whole image (resident across row tiles)
    # w1_ref  : (9*C, P)         bf16, conv1 weights (dh,dw,cin flattened), bn1 scale folded
    # b1_ref  : (1, P)           f32,  bn1 bias
    # w2_ref  : (9*P, P)         bf16, conv2 weights, bn2 scale folded
    # b2_ref  : (1, P)           f32,  bn2 bias
    # o_ref   : (TH, W, P)       f32,  one row tile of the output
    # pad1_ref: (TH+4, W+2, C)   bf16 scratch: zero-padded x rows [r0-2, r0+TH+2)
    # pad2_ref: (TH+2, W+2, P)   bf16 scratch: zero-padded conv1 rows [r0-1, r0+TH+1)
    H, W, C = x_ref.shape
    TH, _, P = o_ref.shape
    cdtype = pad1_ref.dtype

    r = pl.program_id(1)
    n_row_tiles = pl.num_programs(1)
    r0 = pl.multiple_of(r * TH, TH)

    # ---- Stage 0: conv1's zero-padded input rows, assembled in VMEM --------
    # Column halo (zero borders for the W padding of both convs).
    pad1_ref[:, 0:1, :] = jnp.zeros((TH + 4, 1, C), cdtype)
    pad1_ref[:, W + 1:W + 2, :] = jnp.zeros((TH + 4, 1, C), cdtype)
    # Middle TH rows are always in-image.
    pad1_ref[2:TH + 2, 1:W + 1, :] = x_ref[pl.ds(r0, TH), :, :]

    # Top 2 halo rows (x rows r0-2, r0-1): zero at the first tile.
    @pl.when(r == 0)
    def _():
        pad1_ref[0:2, 1:W + 1, :] = jnp.zeros((2, W, C), cdtype)

    @pl.when(r > 0)
    def _():
        pad1_ref[0:2, 1:W + 1, :] = x_ref[pl.ds(r0 - 2, 2), :, :]

    # Bottom 2 halo rows (x rows r0+TH, r0+TH+1): zero at the last tile.
    @pl.when(r == n_row_tiles - 1)
    def _():
        pad1_ref[TH + 2:TH + 4, 1:W + 1, :] = jnp.zeros((2, W, C), cdtype)

    @pl.when(r < n_row_tiles - 1)
    def _():
        pad1_ref[TH + 2:TH + 4, 1:W + 1, :] = x_ref[pl.ds(r0 + TH, 2), :, :]

    def conv3x3(pad_ref, n_rows, cin, w_flat_ref, b_ref):
        # im2col 3x3/stride-1 conv on the MXU: build only 3 dw-shifted windows
        # (the sublane shift happens once per dw); the dh shift is a free
        # leading-dim slice of the loaded window; concatenate the 9 taps along
        # the lane axis and do ONE (n_rows*W, 9*cin) @ (9*cin, P) matmul with
        # f32 accumulation.  Weight rows are ordered (dh, dw, cin) to match.
        wins = [pad_ref[:, dw:dw + W, :] for dw in range(3)]   # (n_rows+2, W, cin)
        taps = []
        for dh in range(3):
            for dw in range(3):
                taps.append(wins[dw][dh:dh + n_rows])
        patches = jnp.concatenate(taps, axis=-1).reshape(n_rows * W, 9 * cin)
        acc = jnp.dot(patches, w_flat_ref[...],
                      preferred_element_type=jnp.float32)       # (n_rows*W, P) f32
        return acc + b_ref[...]                                 # f32 epilogue

    # ---- conv1 -> bn1 (scale folded, bias here) -> relu1 --------------------
    # Computed for TH+2 rows (tile + 1-row halo each side, needed by conv2).
    h1 = jnp.maximum(conv3x3(pad1_ref, TH + 2, C, w1_ref, b1_ref), 0.0)

    # ---- Stage 1: conv2's zero-padded input ---------------------------------
    pad2_ref[:, 0:1, :] = jnp.zeros((TH + 2, 1, P), cdtype)
    pad2_ref[:, W + 1:W + 2, :] = jnp.zeros((TH + 2, 1, P), cdtype)
    pad2_ref[:, 1:W + 1, :] = h1.reshape(TH + 2, W, P).astype(cdtype)

    # conv1 rows outside the image are conv2's zero padding, not real rows.
    @pl.when(r == 0)
    def _():
        pad2_ref[0:1, :, :] = jnp.zeros((1, W + 2, P), cdtype)

    @pl.when(r == n_row_tiles - 1)
    def _():
        pad2_ref[TH + 1:TH + 2, :, :] = jnp.zeros((1, W + 2, P), cdtype)

    # ---- conv2 -> bn2 -> residual add (identity = raw x tile) -> relu2 ------
    out = conv3x3(pad2_ref, TH, P, w2_ref, b2_ref)              # (TH*W, P) f32
    identity = x_ref[pl.ds(r0, TH), :, :].astype(jnp.float32).reshape(TH * W, C)
    out = jnp.maximum(out + identity, 0.0)
    o_ref[...] = out.reshape(TH, W, P).astype(o_ref.dtype)


def basic_block_pallas(x_nhwc, w1, sb1, w2, sb2, *, tile_h=8,
                       compute_dtype=jnp.bfloat16):
    """x_nhwc: (N,H,W,C) f32; w*: (3,3,Cin,P) HWIO; sb*: (2,P) = [bn scale; bn bias]."""
    N, H, W, C = x_nhwc.shape
    P = w1.shape[-1]
    assert C == P, "BasicBlock with downsample=None requires inplanes == planes"
    assert H % tile_h == 0 and tile_h >= 2, "H must be divisible by tile_h (>=2)"
    n_row_tiles = H // tile_h

    # Fold the inference BN scale into the conv weights once (host side), cast
    # weights + activations to bf16 for the MXU, flatten weights to (9*Cin, P)
    # in (dh, dw, cin) row order to match the kernel's im2col layout.
    w1f = (w1 * sb1[0][None, None, None, :]).reshape(9 * C, P).astype(compute_dtype)
    w2f = (w2 * sb2[0][None, None, None, :]).reshape(9 * P, P).astype(compute_dtype)
    b1 = sb1[1].reshape(1, P).astype(jnp.float32)
    b2 = sb2[1].reshape(1, P).astype(jnp.float32)
    x_c = x_nhwc.astype(compute_dtype)

    return pl.pallas_call(
        _basic_block_kernel,
        out_shape=jax.ShapeDtypeStruct((N, H, W, P), jnp.float32),
        grid_spec=pltpu.PrefetchScalarGridSpec(
            num_scalar_prefetch=0,
            grid=(N, n_row_tiles),
            in_specs=[
                # Whole image per batch element; block index is constant in r,
                # so the DMA is skipped while the row-tile axis iterates.
                pl.BlockSpec((None, H, W, C), lambda n, r: (n, 0, 0, 0)),
                pl.BlockSpec((9 * C, P), lambda n, r: (0, 0)),
                pl.BlockSpec((1, P), lambda n, r: (0, 0)),
                pl.BlockSpec((9 * P, P), lambda n, r: (0, 0)),
                pl.BlockSpec((1, P), lambda n, r: (0, 0)),
            ],
            out_specs=pl.BlockSpec((None, tile_h, W, P), lambda n, r: (n, r, 0, 0)),
            scratch_shapes=[
                pltpu.VMEM((tile_h + 4, W + 2, C), compute_dtype),  # padded x rows
                pltpu.VMEM((tile_h + 2, W + 2, P), compute_dtype),  # padded conv1 rows
            ],
        ),
        compiler_params=pltpu.CompilerParams(
            # Batch and row tiles are independent -> both parallel, so v7x's
            # two TensorCores stay busy even at N=1.  No cross-iteration
            # scratch state is relied upon (halos rebuilt every step).
            dimension_semantics=("parallel", "parallel"),
            # Fits v7x's 64 MiB VMEM with headroom; above v6e's 32 MiB default.
            vmem_limit_bytes=48 * 1024 * 1024,
        ),
    )(x_c, w1f, b1, w2f, b2)


def _reference_f32(x, w1, sb1, w2, sb2):
    """Pure-f32 JAX reference of the module forward (NHWC conv, unfused BN)."""
    dn = lax.conv_dimension_numbers(x.shape, w1.shape, ("NHWC", "HWIO", "NHWC"))
    h = lax.conv_general_dilated(x, w1, (1, 1), [(1, 1), (1, 1)],
                                 dimension_numbers=dn)
    h = jnp.maximum(h * sb1[0] + sb1[1], 0.0)
    o = lax.conv_general_dilated(h, w2, (1, 1), [(1, 1), (1, 1)],
                                 dimension_numbers=dn)
    o = o * sb2[0] + sb2[1]
    return jnp.maximum(o + x, 0.0)


def _reference_mixed(x, w1, sb1, w2, sb2, compute_dtype=jnp.bfloat16):
    """Same bf16 cast points / BN fold as the kernel, through XLA's conv."""
    dn = lax.conv_dimension_numbers(x.shape, w1.shape, ("NHWC", "HWIO", "NHWC"))
    w1f = (w1 * sb1[0][None, None, None, :]).astype(compute_dtype)
    w2f = (w2 * sb2[0][None, None, None, :]).astype(compute_dtype)
    xc = x.astype(compute_dtype)
    h = lax.conv_general_dilated(xc, w1f, (1, 1), [(1, 1), (1, 1)],
                                 dimension_numbers=dn,
                                 preferred_element_type=jnp.float32)
    h = jnp.maximum(h + sb1[1], 0.0)
    o = lax.conv_general_dilated(h.astype(compute_dtype), w2f, (1, 1),
                                 [(1, 1), (1, 1)], dimension_numbers=dn,
                                 preferred_element_type=jnp.float32)
    o = o + sb2[1]
    return jnp.maximum(o + xc.astype(jnp.float32), 0.0)


if __name__ == "__main__":
    # Small but lane-dense shapes: batch=2, inplanes=planes=128, spatial=16x16.
    # (PyTorch-equivalent NCHW input shape: (2, 128, 16, 16).)
    N, H, W, C = 2, 16, 16, 128
    P = C  # planes == inplanes (no downsample)
    eps = 1e-5

    key = jax.random.PRNGKey(0)
    kx, kw1, kw2, kg1, kb1, km1, kv1, kg2, kb2, km2, kv2 = jax.random.split(key, 11)

    x = jax.random.normal(kx, (N, H, W, C), jnp.float32)
    w1 = jax.random.normal(kw1, (3, 3, C, P), jnp.float32) * 0.1
    w2 = jax.random.normal(kw2, (3, 3, P, P), jnp.float32) * 0.1

    def fold_bn(kg, kb, km, kv):
        gamma = 1.0 + 0.1 * jax.random.normal(kg, (P,), jnp.float32)
        beta = 0.1 * jax.random.normal(kb, (P,), jnp.float32)
        mean = 0.1 * jax.random.normal(km, (P,), jnp.float32)
        var = jnp.abs(jax.random.normal(kv, (P,), jnp.float32)) + 0.5
        scale = gamma / jnp.sqrt(var + eps)
        bias = beta - mean * scale
        return jnp.stack([scale, bias], axis=0)  # (2, P)

    sb1 = fold_bn(kg1, kb1, km1, kv1)
    sb2 = fold_bn(kg2, kb2, km2, kv2)

    out = jax.block_until_ready(basic_block_pallas(x, w1, sb1, w2, sb2))

    # 1) Tight check against a reference with identical bf16 cast points
    #    (validates the kernel's indexing / im2col / fusion exactly).
    ref_mixed = jax.block_until_ready(_reference_mixed(x, w1, sb1, w2, sb2))
    np.testing.assert_allclose(np.asarray(out), np.asarray(ref_mixed),
                               rtol=2e-2, atol=2e-2)

    # 2) Statistical check against the pure-f32 module semantics: the only
    #    deviation is the intentional bf16 MXU quantization (~0.5% expected).
    ref_f32 = jax.block_until_ready(_reference_f32(x, w1, sb1, w2, sb2))
    err = jnp.sqrt(jnp.sum((out - ref_f32) ** 2))
    den = jnp.sqrt(jnp.sum(ref_f32 ** 2))
    rel_l2 = float(err / den)
    assert rel_l2 < 3e-2, f"relative L2 error vs f32 reference too high: {rel_l2}"

    print("KERNEL_OK")
</pallas_src>

<mosaic_0001>
module attributes {stable_mosaic.version = 11 : i64} {
  func.func @_basic_block_kernel(%arg0: i32, %arg1: i32, %arg2: memref<1x16x16x128xbf16, #tpu.memory_space<vmem>>, %arg3: memref<1152x128xbf16, #tpu.memory_space<vmem>>, %arg4: memref<1x128xf32, #tpu.memory_space<vmem>>, %arg5: memref<1152x128xbf16, #tpu.memory_space<vmem>>, %arg6: memref<1x128xf32, #tpu.memory_space<vmem>>, %arg7: memref<1x8x16x128xf32, #tpu.memory_space<vmem>>, %arg8: memref<12x18x128xbf16, #tpu.memory_space<vmem>>, %arg9: memref<10x18x128xbf16, #tpu.memory_space<vmem>>) attributes {dimension_semantics = [#tpu.dimension_semantics<parallel>, #tpu.dimension_semantics<parallel>], iteration_bounds = array<i64: 2, 2>, scalar_prefetch = 0 : i64, scratch_operands = 2 : i64, tpu.core_type = #tpu.core_type<tc>, window_params = [{transform_indices = @transform_0, window_bounds = array<i64: 1, 16, 16, 128>}, {pipeline_mode = #tpu.pipeline_mode<synchronous>, transform_indices = @transform_1, window_bounds = array<i64: 1152, 128>}, {pipeline_mode = #tpu.pipeline_mode<synchronous>, transform_indices = @transform_2, window_bounds = array<i64: 1, 128>}, {pipeline_mode = #tpu.pipeline_mode<synchronous>, transform_indices = @transform_3, window_bounds = array<i64: 1152, 128>}, {pipeline_mode = #tpu.pipeline_mode<synchronous>, transform_indices = @transform_4, window_bounds = array<i64: 1, 128>}, {transform_indices = @transform_5, window_bounds = array<i64: 1, 8, 16, 128>}]} {
    %c8_i32 = arith.constant 8 : i32
    %0 = arith.muli %arg1, %c8_i32 : i32
    %1 = tpu.assume_multiple %0, 8 : i32
    %cst = arith.constant 0.000000e+00 : bf16
    %2 = vector.broadcast %cst : bf16 to vector<12x1x128xbf16>
    %c0 = arith.constant 0 : index
    %c0_0 = arith.constant 0 : index
    %c0_1 = arith.constant 0 : index
    %3 = vector.load %arg8[%c0, %c0_0, %c0_1] : memref<12x18x128xbf16, #tpu.memory_space<vmem>>, vector<12x1x128xbf16>
    tpu.vector_store %arg8[%c0, %c0_0, %c0_1], %2 {strides = array<i32>} : memref<12x18x128xbf16, #tpu.memory_space<vmem>>, vector<12x1x128xbf16>,
    %cst_2 = arith.constant 0.000000e+00 : bf16
    %4 = vector.broadcast %cst_2 : bf16 to vector<12x1x128xbf16>
    %c0_3 = arith.constant 0 : index
    %c17 = arith.constant 17 : index
    %c0_4 = arith.constant 0 : index
    %5 = vector.load %arg8[%c0_3, %c17, %c0_4] : memref<12x18x128xbf16, #tpu.memory_space<vmem>>, vector<12x1x128xbf16>
    tpu.vector_store %arg8[%c0_3, %c17, %c0_4], %4 {strides = array<i32>} : memref<12x18x128xbf16, #tpu.memory_space<vmem>>, vector<12x1x128xbf16>,
    %c0_5 = arith.constant 0 : index
    %6 = arith.index_cast %1 : i32 to index
    %c0_6 = arith.constant 0 : index
    %c0_7 = arith.constant 0 : index
    %7 = vector.load %arg2[%c0_5, %6, %c0_6, %c0_7] : memref<1x16x16x128xbf16, #tpu.memory_space<vmem>>, vector<1x8x16x128xbf16>
    %8 = vector.shape_cast %7 : vector<1x8x16x128xbf16> to vector<8x16x128xbf16>
    %c2 = arith.constant 2 : index
    %c1 = arith.constant 1 : index
    %c0_8 = arith.constant 0 : index
    %9 = vector.load %arg8[%c2, %c1, %c0_8] : memref<12x18x128xbf16, #tpu.memory_space<vmem>>, vector<8x16x128xbf16>
    tpu.vector_store %arg8[%c2, %c1, %c0_8], %8 {strides = array<i32>} : memref<12x18x128xbf16, #tpu.memory_space<vmem>>, vector<8x16x128xbf16>,
    %c0_i32 = arith.constant 0 : i32
    %10 = arith.cmpi eq, %arg1, %c0_i32 : i32
    %11 = arith.extui %10 : i1 to i32
    %c0_i32_9 = arith.constant 0 : i32
    %12 = arith.cmpi ne, %11, %c0_i32_9 : i32
    scf.if %12 {
      %cst_67 = arith.constant 0.000000e+00 : bf16
      %87 = vector.broadcast %cst_67 : bf16 to vector<2x16x128xbf16>
      %c0_68 = arith.constant 0 : index
      %c1_69 = arith.constant 1 : index
      %c0_70 = arith.constant 0 : index
      %88 = vector.load %arg8[%c0_68, %c1_69, %c0_70] : memref<12x18x128xbf16, #tpu.memory_space<vmem>>, vector<2x16x128xbf16>
      tpu.vector_store %arg8[%c0_68, %c1_69, %c0_70], %87 {strides = array<i32>} : memref<12x18x128xbf16, #tpu.memory_space<vmem>>, vector<2x16x128xbf16>,
    } else {
    }
    %c0_i32_10 = arith.constant 0 : i32
    %13 = arith.cmpi sgt, %arg1, %c0_i32_10 : i32
    %14 = arith.extui %13 : i1 to i32
    %c0_i32_11 = arith.constant 0 : i32
    %15 = arith.cmpi ne, %14, %c0_i32_11 : i32
    scf.if %15 {
      %c2_i32 = arith.constant 2 : i32
      %87 = arith.subi %1, %c2_i32 : i32
      %c0_67 = arith.constant 0 : index
      %88 = arith.index_cast %87 : i32 to index
      %c0_68 = arith.constant 0 : index
      %c0_69 = arith.constant 0 : index
      %89 = vector.load %arg2[%c0_67, %88, %c0_68, %c0_69] : memref<1x16x16x128xbf16, #tpu.memory_space<vmem>>, vector<1x2x16x128xbf16>
      %90 = vector.shape_cast %89 : vector<1x2x16x128xbf16> to vector<2x16x128xbf16>
      %c0_70 = arith.constant 0 : index
      %c1_71 = arith.constant 1 : index
      %c0_72 = arith.constant 0 : index
      %91 = vector.load %arg8[%c0_70, %c1_71, %c0_72] : memref<12x18x128xbf16, #tpu.memory_space<vmem>>, vector<2x16x128xbf16>
      tpu.vector_store %arg8[%c0_70, %c1_71, %c0_72], %90 {strides = array<i32>} : memref<12x18x128xbf16, #tpu.memory_space<vmem>>, vector<2x16x128xbf16>,
    } else {
    }
    %c1_i32 = arith.constant 1 : i32
    %16 = arith.cmpi eq, %arg1, %c1_i32 : i32
    %17 = arith.extui %16 : i1 to i32
    %c0_i32_12 = arith.constant 0 : i32
    %18 = arith.cmpi ne, %17, %c0_i32_12 : i32
    scf.if %18 {
      %cst_67 = arith.constant 0.000000e+00 : bf16
      %87 = vector.broadcast %cst_67 : bf16 to vector<2x16x128xbf16>
      %c10 = arith.constant 10 : index
      %c1_68 = arith.constant 1 : index
      %c0_69 = arith.constant 0 : index
      %88 = vector.load %arg8[%c10, %c1_68, %c0_69] : memref<12x18x128xbf16, #tpu.memory_space<vmem>>, vector<2x16x128xbf16>
      tpu.vector_store %arg8[%c10, %c1_68, %c0_69], %87 {strides = array<i32>} : memref<12x18x128xbf16, #tpu.memory_space<vmem>>, vector<2x16x128xbf16>,
    } else {
    }
    %c1_i32_13 = arith.constant 1 : i32
    %19 = arith.cmpi slt, %arg1, %c1_i32_13 : i32
    %20 = arith.extui %19 : i1 to i32
    %c0_i32_14 = arith.constant 0 : i32
    %21 = arith.cmpi ne, %20, %c0_i32_14 : i32
    scf.if %21 {
      %c8_i32_67 = arith.constant 8 : i32
      %87 = arith.addi %1, %c8_i32_67 : i32
      %c0_68 = arith.constant 0 : index
      %88 = arith.index_cast %87 : i32 to index
      %c0_69 = arith.constant 0 : index
      %c0_70 = arith.constant 0 : index
      %89 = vector.load %arg2[%c0_68, %88, %c0_69, %c0_70] : memref<1x16x16x128xbf16, #tpu.memory_space<vmem>>, vector<1x2x16x128xbf16>
      %90 = vector.shape_cast %89 : vector<1x2x16x128xbf16> to vector<2x16x128xbf16>
      %c10 = arith.constant 10 : index
      %c1_71 = arith.constant 1 : index
      %c0_72 = arith.constant 0 : index
      %91 = vector.load %arg8[%c10, %c1_71, %c0_72] : memref<12x18x128xbf16, #tpu.memory_space<vmem>>, vector<2x16x128xbf16>
      tpu.vector_store %arg8[%c10, %c1_71, %c0_72], %90 {strides = array<i32>} : memref<12x18x128xbf16, #tpu.memory_space<vmem>>, vector<2x16x128xbf16>,
    } else {
    }
    %c0_15 = arith.constant 0 : index
    %c0_16 = arith.constant 0 : index
    %c0_17 = arith.constant 0 : index
    %22 = vector.load %arg8[%c0_15, %c0_16, %c0_17] : memref<12x18x128xbf16, #tpu.memory_space<vmem>>, vector<12x16x128xbf16>
    %c0_18 = arith.constant 0 : index
    %c1_19 = arith.constant 1 : index
    %c0_20 = arith.constant 0 : index
    %23 = vector.load %arg8[%c0_18, %c1_19, %c0_20] : memref<12x18x128xbf16, #tpu.memory_space<vmem>>, vector<12x16x128xbf16>
    %c0_21 = arith.constant 0 : index
    %c2_22 = arith.constant 2 : index
    %c0_23 = arith.constant 0 : index
    %24 = vector.load %arg8[%c0_21, %c2_22, %c0_23] : memref<12x18x128xbf16, #tpu.memory_space<vmem>>, vector<12x16x128xbf16>
    %25 = vector.extract_strided_slice %22 {offsets = [0, 0, 0], sizes = [10, 16, 128], strides = [1, 1, 1]} : vector<12x16x128xbf16> to vector<10x16x128xbf16>
    %26 = vector.extract_strided_slice %23 {offsets = [0, 0, 0], sizes = [10, 16, 128], strides = [1, 1, 1]} : vector<12x16x128xbf16> to vector<10x16x128xbf16>
    %27 = vector.extract_strided_slice %24 {offsets = [0, 0, 0], sizes = [10, 16, 128], strides = [1, 1, 1]} : vector<12x16x128xbf16> to vector<10x16x128xbf16>
    %28 = vector.extract_strided_slice %22 {offsets = [1, 0, 0], sizes = [10, 16, 128], strides = [1, 1, 1]} : vector<12x16x128xbf16> to vector<10x16x128xbf16>
    %29 = vector.extract_strided_slice %23 {offsets = [1, 0, 0], sizes = [10, 16, 128], strides = [1, 1, 1]} : vector<12x16x128xbf16> to vector<10x16x128xbf16>
    %30 = vector.extract_strided_slice %24 {offsets = [1, 0, 0], sizes = [10, 16, 128], strides = [1, 1, 1]} : vector<12x16x128xbf16> to vector<10x16x128xbf16>
    %31 = vector.extract_strided_slice %22 {offsets = [2, 0, 0], sizes = [10, 16, 128], strides = [1, 1, 1]} : vector<12x16x128xbf16> to vector<10x16x128xbf16>
    %32 = vector.extract_strided_slice %23 {offsets = [2, 0, 0], sizes = [10, 16, 128], strides = [1, 1, 1]} : vector<12x16x128xbf16> to vector<10x16x128xbf16>
    %33 = vector.extract_strided_slice %24 {offsets = [2, 0, 0], sizes = [10, 16, 128], strides = [1, 1, 1]} : vector<12x16x128xbf16> to vector<10x16x128xbf16>
    %34 = tpu.concatenate %25, %26, %27, %28, %29, %30, %31, %32, %33 in 2 : vector<10x16x128xbf16>, vector<10x16x128xbf16>, vector<10x16x128xbf16>, vector<10x16x128xbf16>, vector<10x16x128xbf16>, vector<10x16x128xbf16>, vector<10x16x128xbf16>, vector<10x16x128xbf16>, vector<10x16x128xbf16> -> vector<10x16x1152xbf16>
    %35 = vector.shape_cast %34 : vector<10x16x1152xbf16> to vector<160x1152xbf16>
    %c0_24 = arith.constant 0 : index
    %c0_25 = arith.constant 0 : index
    %36 = vector.load %arg3[%c0_24, %c0_25] : memref<1152x128xbf16, #tpu.memory_space<vmem>>, vector<1152x128xbf16>
    %cst_26 = arith.constant dense<0.000000e+00> : vector<160x128xf32>
    %37 = tpu.matmul %35, %36, %cst_26 {dimension_numbers = #tpu.dot_dimension_numbers<[1], [0], [0], [1], [0, 0, 1, 1], [], []>} : vector<160x1152xbf16>, vector<1152x128xbf16>, vector<160x128xf32> -> vector<160x128xf32>
    %c0_27 = arith.constant 0 : index
    %c0_28 = arith.constant 0 : index
    %38 = vector.load %arg4[%c0_27, %c0_28] : memref<1x128xf32, #tpu.memory_space<vmem>>, vector<1x128xf32>
    %39 = vector.broadcast %38 : vector<1x128xf32> to vector<160x128xf32>
    %40 = arith.addf %37, %39 : vector<160x128xf32>
    %cst_29 = arith.constant 0.000000e+00 : f32
    %41 = vector.broadcast %cst_29 : f32 to vector<160x128xf32>
    %42 = arith.maximumf %40, %41 : vector<160x128xf32>
    %cst_30 = arith.constant 0.000000e+00 : bf16
    %43 = vector.broadcast %cst_30 : bf16 to vector<10x1x128xbf16>
    %c0_31 = arith.constant 0 : index
    %c0_32 = arith.constant 0 : index
    %c0_33 = arith.constant 0 : index
    %44 = vector.load %arg9[%c0_31, %c0_32, %c0_33] : memref<10x18x128xbf16, #tpu.memory_space<vmem>>, vector<10x1x128xbf16>
    tpu.vector_store %arg9[%c0_31, %c0_32, %c0_33], %43 {strides = array<i32>} : memref<10x18x128xbf16, #tpu.memory_space<vmem>>, vector<10x1x128xbf16>,
    %cst_34 = arith.constant 0.000000e+00 : bf16
    %45 = vector.broadcast %cst_34 : bf16 to vector<10x1x128xbf16>
    %c0_35 = arith.constant 0 : index
    %c17_36 = arith.constant 17 : index
    %c0_37 = arith.constant 0 : index
    %46 = vector.load %arg9[%c0_35, %c17_36, %c0_37] : memref<10x18x128xbf16, #tpu.memory_space<vmem>>, vector<10x1x128xbf16>
    tpu.vector_store %arg9[%c0_35, %c17_36, %c0_37], %45 {strides = array<i32>} : memref<10x18x128xbf16, #tpu.memory_space<vmem>>, vector<10x1x128xbf16>,
    %47 = vector.shape_cast %42 : vector<160x128xf32> to vector<10x16x128xf32>
    %48 = arith.truncf %47 : vector<10x16x128xf32> to vector<10x16x128xbf16>
    %c0_38 = arith.constant 0 : index
    %c1_39 = arith.constant 1 : index
    %c0_40 = arith.constant 0 : index
    %49 = vector.load %arg9[%c0_38, %c1_39, %c0_40] : memref<10x18x128xbf16, #tpu.memory_space<vmem>>, vector<10x16x128xbf16>
    tpu.vector_store %arg9[%c0_38, %c1_39, %c0_40], %48 {strides = array<i32>} : memref<10x18x128xbf16, #tpu.memory_space<vmem>>, vector<10x16x128xbf16>,
    %c0_i32_41 = arith.constant 0 : i32
    %50 = arith.cmpi eq, %arg1, %c0_i32_41 : i32
    %51 = arith.extui %50 : i1 to i32
    %c0_i32_42 = arith.constant 0 : i32
    %52 = arith.cmpi ne, %51, %c0_i32_42 : i32
    scf.if %52 {
      %cst_67 = arith.constant 0.000000e+00 : bf16
      %87 = vector.broadcast %cst_67 : bf16 to vector<1x18x128xbf16>
      %c0_68 = arith.constant 0 : index
      %c0_69 = arith.constant 0 : index
      %c0_70 = arith.constant 0 : index
      %88 = vector.load %arg9[%c0_68, %c0_69, %c0_70] : memref<10x18x128xbf16, #tpu.memory_space<vmem>>, vector<1x18x128xbf16>
      tpu.vector_store %arg9[%c0_68, %c0_69, %c0_70], %87 {strides = array<i32>} : memref<10x18x128xbf16, #tpu.memory_space<vmem>>, vector<1x18x128xbf16>,
    } else {
    }
    %c1_i32_43 = arith.constant 1 : i32
    %53 = arith.cmpi eq, %arg1, %c1_i32_43 : i32
    %54 = arith.extui %53 : i1 to i32
    %c0_i32_44 = arith.constant 0 : i32
    %55 = arith.cmpi ne, %54, %c0_i32_44 : i32
    scf.if %55 {
      %cst_67 = arith.constant 0.000000e+00 : bf16
      %87 = vector.broadcast %cst_67 : bf16 to vector<1x18x128xbf16>
      %c9 = arith.constant 9 : index
      %c0_68 = arith.constant 0 : index
      %c0_69 = arith.constant 0 : index
      %88 = vector.load %arg9[%c9, %c0_68, %c0_69] : memref<10x18x128xbf16, #tpu.memory_space<vmem>>, vector<1x18x128xbf16>
      tpu.vector_store %arg9[%c9, %c0_68, %c0_69], %87 {strides = array<i32>} : memref<10x18x128xbf16, #tpu.memory_space<vmem>>, vector<1x18x128xbf16>,
    } else {
    }
    %c0_45 = arith.constant 0 : index
    %c0_46 = arith.constant 0 : index
    %c0_47 = arith.constant 0 : index
    %56 = vector.load %arg9[%c0_45, %c0_46, %c0_47] : memref<10x18x128xbf16, #tpu.memory_space<vmem>>, vector<10x16x128xbf16>
    %c0_48 = arith.constant 0 : index
    %c1_49 = arith.constant 1 : index
    %c0_50 = arith.constant 0 : index
    %57 = vector.load %arg9[%c0_48, %c1_49, %c0_50] : memref<10x18x128xbf16, #tpu.memory_space<vmem>>, vector<10x16x128xbf16>
    %c0_51 = arith.constant 0 : index
    %c2_52 = arith.constant 2 : index
    %c0_53 = arith.constant 0 : index
    %58 = vector.load %arg9[%c0_51, %c2_52, %c0_53] : memref<10x18x128xbf16, #tpu.memory_space<vmem>>, vector<10x16x128xbf16>
    %59 = vector.extract_strided_slice %56 {offsets = [0, 0, 0], sizes = [8, 16, 128], strides = [1, 1, 1]} : vector<10x16x128xbf16> to vector<8x16x128xbf16>
    %60 = vector.extract_strided_slice %57 {offsets = [0, 0, 0], sizes = [8, 16, 128], strides = [1, 1, 1]} : vector<10x16x128xbf16> to vector<8x16x128xbf16>
    %61 = vector.extract_strided_slice %58 {offsets = [0, 0, 0], sizes = [8, 16, 128], strides = [1, 1, 1]} : vector<10x16x128xbf16> to vector<8x16x128xbf16>
    %62 = vector.extract_strided_slice %56 {offsets = [1, 0, 0], sizes = [8, 16, 128], strides = [1, 1, 1]} : vector<10x16x128xbf16> to vector<8x16x128xbf16>
    %63 = vector.extract_strided_slice %57 {offsets = [1, 0, 0], sizes = [8, 16, 128], strides = [1, 1, 1]} : vector<10x16x128xbf16> to vector<8x16x128xbf16>
    %64 = vector.extract_strided_slice %58 {offsets = [1, 0, 0], sizes = [8, 16, 128], strides = [1, 1, 1]} : vector<10x16x128xbf16> to vector<8x16x128xbf16>
    %65 = vector.extract_strided_slice %56 {offsets = [2, 0, 0], sizes = [8, 16, 128], strides = [1, 1, 1]} : vector<10x16x128xbf16> to vector<8x16x128xbf16>
    %66 = vector.extract_strided_slice %57 {offsets = [2, 0, 0], sizes = [8, 16, 128], strides = [1, 1, 1]} : vector<10x16x128xbf16> to vector<8x16x128xbf16>
    %67 = vector.extract_strided_slice %58 {offsets = [2, 0, 0], sizes = [8, 16, 128], strides = [1, 1, 1]} : vector<10x16x128xbf16> to vector<8x16x128xbf16>
    %68 = tpu.concatenate %59, %60, %61, %62, %63, %64, %65, %66, %67 in 2 : vector<8x16x128xbf16>, vector<8x16x128xbf16>, vector<8x16x128xbf16>, vector<8x16x128xbf16>, vector<8x16x128xbf16>, vector<8x16x128xbf16>, vector<8x16x128xbf16>, vector<8x16x128xbf16>, vector<8x16x128xbf16> -> vector<8x16x1152xbf16>
    %69 = vector.shape_cast %68 : vector<8x16x1152xbf16> to vector<128x1152xbf16>
    %c0_54 = arith.constant 0 : index
    %c0_55 = arith.constant 0 : index
    %70 = vector.load %arg5[%c0_54, %c0_55] : memref<1152x128xbf16, #tpu.memory_space<vmem>>, vector<1152x128xbf16>
    %cst_56 = arith.constant dense<0.000000e+00> : vector<128x128xf32>
    %71 = tpu.matmul %69, %70, %cst_56 {dimension_numbers = #tpu.dot_dimension_numbers<[1], [0], [0], [1], [0, 0, 1, 1], [], []>} : vector<128x1152xbf16>, vector<1152x128xbf16>, vector<128x128xf32> -> vector<128x128xf32>
    %c0_57 = arith.constant 0 : index
    %c0_58 = arith.constant 0 : index
    %72 = vector.load %arg6[%c0_57, %c0_58] : memref<1x128xf32, #tpu.memory_space<vmem>>, vector<1x128xf32>
    %73 = vector.broadcast %72 : vector<1x128xf32> to vector<128x128xf32>
    %74 = arith.addf %71, %73 : vector<128x128xf32>
    %c0_59 = arith.constant 0 : index
    %75 = arith.index_cast %1 : i32 to index
    %c0_60 = arith.constant 0 : index
    %c0_61 = arith.constant 0 : index
    %76 = vector.load %arg2[%c0_59, %75, %c0_60, %c0_61] : memref<1x16x16x128xbf16, #tpu.memory_space<vmem>>, vector<1x8x16x128xbf16>
    %77 = vector.shape_cast %76 : vector<1x8x16x128xbf16> to vector<8x16x128xbf16>
    %78 = arith.extf %77 : vector<8x16x128xbf16> to vector<8x16x128xf32>
    %79 = vector.shape_cast %78 : vector<8x16x128xf32> to vector<128x128xf32>
    %80 = arith.addf %74, %79 : vector<128x128xf32>
    %cst_62 = arith.constant 0.000000e+00 : f32
    %81 = vector.broadcast %cst_62 : f32 to vector<128x128xf32>
    %82 = arith.maximumf %80, %81 : vector<128x128xf32>
    %83 = vector.shape_cast %82 : vector<128x128xf32> to vector<8x16x128xf32>
    %c0_63 = arith.constant 0 : index
    %c0_64 = arith.constant 0 : index
    %c0_65 = arith.constant 0 : index
    %c0_66 = arith.constant 0 : index
    %84 = vector.load %arg7[%c0_63, %c0_64, %c0_65, %c0_66] : memref<1x8x16x128xf32, #tpu.memory_space<vmem>>, vector<1x8x16x128xf32>
    %85 = vector.shape_cast %84 : vector<1x8x16x128xf32> to vector<8x16x128xf32>
    %86 = vector.shape_cast %83 : vector<8x16x128xf32> to vector<1x8x16x128xf32>
    tpu.vector_store %arg7[%c0_63, %c0_64, %c0_65, %c0_66], %86 {strides = array<i32>} : memref<1x8x16x128xf32, #tpu.memory_space<vmem>>, vector<1x8x16x128xf32>,
    return
  }
  func.func @transform_0(%arg0: i32, %arg1: i32) -> (i32, i32, i32, i32) {
    %c0_i32 = arith.constant 0 : i32
    %c0_i32_0 = arith.constant 0 : i32
    %c0_i32_1 = arith.constant 0 : i32
    %c0_i32_2 = arith.constant 0 : i32
    return %arg0, %c0_i32, %c0_i32_0, %c0_i32_1 : i32, i32, i32, i32
  }
  func.func @transform_1(%arg0: i32, %arg1: i32) -> (i32, i32) {
    %c0_i32 = arith.constant 0 : i32
    %c0_i32_0 = arith.constant 0 : i32
    %c0_i32_1 = arith.constant 0 : i32
    return %c0_i32, %c0_i32_0 : i32, i32
  }
  func.func @transform_2(%arg0: i32, %arg1: i32) -> (i32, i32) {
    %c0_i32 = arith.constant 0 : i32
    %c0_i32_0 = arith.constant 0 : i32
    %c0_i32_1 = arith.constant 0 : i32
    return %c0_i32, %c0_i32_0 : i32, i32
  }
  func.func @transform_3(%arg0: i32, %arg1: i32) -> (i32, i32) {
    %c0_i32 = arith.constant 0 : i32
    %c0_i32_0 = arith.constant 0 : i32
    %c0_i32_1 = arith.constant 0 : i32
    return %c0_i32, %c0_i32_0 : i32, i32
  }
  func.func @transform_4(%arg0: i32, %arg1: i32) -> (i32, i32) {
    %c0_i32 = arith.constant 0 : i32
    %c0_i32_0 = arith.constant 0 : i32
    %c0_i32_1 = arith.constant 0 : i32
    return %c0_i32, %c0_i32_0 : i32, i32
  }
  func.func @transform_5(%arg0: i32, %arg1: i32) -> (i32, i32, i32, i32) {
    %c0_i32 = arith.constant 0 : i32
    %c0_i32_0 = arith.constant 0 : i32
    %c0_i32_1 = arith.constant 0 : i32
    return %arg0, %arg1, %c0_i32, %c0_i32_0 : i32, i32, i32, i32
  }
}

</mosaic_0001>

<bundles_post_ra>
// kernel: tpu_custom_call.1
= control target key start
LH: loop header
LB: loop body
LE: loop exit
PB: predicated region body
PF: predicated region fallthrough
CT: control target
= control target key end

     0   :  { %s6904_s0 = inlined_call_operand.hbm [shape: bf16[2,16,16,128], index: 0, kind: input, shape index: {}]   ;;  %s6905_s1 = inlined_call_operand.hbm [shape: bf16[1152,128], index: 1, kind: input, shape index: {}]   ;;  %s6906_s2 = inlined_call_operand.vmem [shape: f32[1,128], index: 2, kind: input, shape index: {}]   ;;  %s6907_s3 = inlined_call_operand.hbm [shape: bf16[1152,128], index: 3, kind: input, shape index: {}]   ;;  %s6908_s4 = inlined_call_operand.vmem [shape: f32[1,128], index: 4, kind: input, shape index: {}]   ;;  %s6909_s5 = inlined_call_operand.hbm [shape: f32[2,16,16,128], index: 5, kind: output, shape index: {}]  }
   0x1   :  { %6930 = sst [smem:[#allocation30_spill]] %s6905_s1 }
   0x2   :  { %6931 = sst [smem:[#allocation31_spill]] %s6907_s3 }
   0x3   :  { %6932 = sst [smem:[#allocation32_spill]] %s6909_s5 }
   0x4   :  { %10 = vsyncpa [#allocation5], 0 }
   0x5   :  { %12 = vsyncpa [#allocation5 + $0x1], 0 }
   0x6   :  { %13 = vsyncpa [#allocation8], 0 }
   0x7   :  { %14 = vsyncpa [#allocation6], 0 }
   0x8   :  { %16 = vsyncpa [#allocation6 + $0x1], 0  ;;  %s5568_s18 = smov 0   ;;  %s5570_s19 = smov 0  }
   0x9   :  { %s5572_s20 = smov 0   ;;  %s5574_s21 = smov 0  }
   0xa   :  { %s5576_s22 = smov 0   ;;  %s5578_s23 = smov 0  }
   0xb   :  { %s5580_s24 = smov 0   ;;  %s5582_s25 = smov 0  }
   0xc   :  { %s5584_s26 = smov 0   ;;  %s5586_s27 = smov 0  }
   0xd   :  { %s5588_s28 = smov 0  }
   0xe LB: > { %6933 = sst [smem:[#allocation14_spill]] %s5486_s18  ;;  %s4238_s29 = sadd.s32 4294967295, %s5526_s28   ;;  %s5526_s28 = sphi %s5588_s28, %s22_s28   ;;  %s5522_s27 = sphi %s5586_s27, %s6992_s27   ;;  %s5518_s26 = sphi %s5584_s26, %s6983_s26   ;;  %s5514_s25 = sphi %s5582_s25, %s6991_s25   ;;  %s5510_s24 = sphi %s5580_s24, %s6982_s24   ;;  %s5506_s23 = sphi %s5578_s23, %s6990_s23   ;;  %s5502_s22 = sphi %s5576_s22, %s6989_s22   ;;  %s5498_s21 = sphi %s5574_s21, %s6988_s21   ;;  %s5494_s20 = sphi %s5572_s20, %s6987_s20   ;;  %s5490_s19 = sphi %s5570_s19, %s6986_s19   ;;  %s5486_s18 = sphi %s5568_s18, %s6985_s18  }
   0xf   : > { %6934 = sst [smem:[#allocation15_spill]] %s5514_s25  ;;  %s4239_s30 = sadd.s32 4294967294, %s5526_s28  }
  0x10   : > { %6935 = sst [smem:[#allocation16_spill]] %s5518_s26  ;;  %p54_p0 = scmp.ne.s32.totalorder %s5502_s22, %s5498_s21 }
  0x11   : > { %p5624_p1 = scmp.eq.s32.totalorder %s4238_s29, 0  ;;  %p163_p2 = scmp.ne.s32.totalorder %s5494_s20, %s5490_s19 }
  0x12   : > { %p164_p3 = scmp.eq.s32.totalorder %s4238_s29, 3  ;;  %p169_p5 = scmp.ne.s32.totalorder %s5490_s19, %s5486_s18 }
  0x13   : > { %p5632_p4 = por %p5624_p1, %p54_p0  ;;  %p170_p7 = scmp.eq.s32.totalorder %s4239_s30, 3 }
  0x14   : > { %p5638_p6 = por %p164_p3, %p163_p2  ;;  %p4240_p8 = scmp.ge.s32.totalorder %s5526_s28, 1 }
  0x15   : > { %p177_p9 = scmp.lt.s32.totalorder %s5526_s28, 5  ;;  %p5644_p10 = por %p170_p7, %p169_p5 }
  0x16   : > { %s6938_s8 = scalar_select %p5638_p6, 1, 0 }
  0x17   : > { %s6940_s9 = scalar_select %p5644_p10, 1, 0 }
  0x18   : > { %6939 = sst [smem:[#allocation17_spill]] %s6938_s8  ;;  %p5648_p11 = pnand %p4240_p8, %p177_p9 }
  0x19   : > { %6941 = sst [smem:[#allocation18_spill]] %s6940_s9  ;;  %s5528_s14 = smov [#allocation7]  }
  0x1a   : > { %s6943_s1 = sld [smem:[#allocation30_spill]]  ;;  %p5156_p12 = pneg %p5648_p11 }
  0x1b   : > { %s190_s15 = sshll.u32 %s5528_s14, 4  ;;  %s6944_s3 = sld [smem:[#allocation31_spill]]  ;;  %s191_s15 = int_to_ptr.vmem [resolvable:$true] %s190_s15 }
  0x1c   : > { %p5157_p13 = pnand %p5156_p12, %p5624_p1  ;;  %s6910_s29 = smov 64  }
  0x1d   : > { %s6911_s30 = smov 4   ;;  %s5531_s11 = smov [#allocation9]  }
  0x1e   : > { %s207_s12 = sshll.u32 %s5531_s11, 4  ;;  %s31_s14 = sadd.s32 1, %s5518_s26  ;;  %s208_s12 = int_to_ptr.vmem [resolvable:$true] %s207_s12 }
  0x1f   : > { %p32_p0 = scmp.ge.s32.totalorder %s31_s14, 2  ;;  %s34_s16 = sadd.s32 1, %s5522_s27 }
  0x20   : > { %s188_s13 = sshll.u32 %s6943_s1, 4  ;;  %p48_p2 = scmp.ne.s32.totalorder %s5506_s23, %s5502_s22  ;;  %s189_s13 = int_to_ptr.hbm [resolvable:$true] %s188_s13 }
  0x21   : > { %s205_s21 = sshll.u32 %s6944_s3, 4  ;;  %s6994_s14 = smov (%p32_p0, %s31_s14), 0  ;;  %s206_s21 = int_to_ptr.hbm [resolvable:$true] %s205_s21 }
  0x22   : > { %5159 = dma.hbm_to_vmem [thread:$0]  (!%p5157_p13), %s189_s13, 9216, %s191_s15, [#allocation8], %s6910_s29, %s6910_s29, %s6911_s30  }
  0x23   : > { %5162 = dma.hbm_to_vmem [thread:$0]  (!%p5157_p13), %s206_s21, 9216, %s208_s12, [#allocation8], %s6910_s29, %s6910_s29, %s6911_s30  }
  0x24   : > { %6945 = sst [smem:[#allocation19_spill]] %s6994_s14  ;;  %s6996_s16 = smov (!%p32_p0, %s34_s16), %s5522_s27 }
  0x25   : > { %s41_s13 = sadd.s32 1, %s5506_s23  ;;  %p49_p3 = scmp.eq.s32.totalorder %s5526_s28, 0 }
  0x26   : > { %p36_p5 = scmp.ge.s32.totalorder %s6996_s16, 2  ;;  %s149_s15 = ssub.s32 %s5518_s26, %s6994_s14 }
  0x27   : > { %p5679_p7 = por %p49_p3, %p48_p2  ;;  %s153_s21 = sadd.s32 1, %s5494_s20 }
  0x28   : > { %s6998_s16 = smov (%p36_p5, %s6996_s16), 0  ;;  %p5173_p8 = scmp.lt.s32.totalorder %s5526_s28, 4 }
  0x29   : > { %6947 = sst [smem:[#allocation20_spill]] %s6998_s16  ;;  %s224_s11 = sand.u32 1, %s5506_s23  }
  0x2a   : > { %s38_s12 = ssub.s32 %s5522_s27, %s6998_s16  ;;  %s4853_s29 = sshll.u32 %s5522_s27, 7 }
  0x2b   : > { %p39_p9 = scmp.eq.s32.totalorder %s38_s12, 0  ;;  %s150_s30 = sor.u32 %s149_s15, %s38_s12 }
  0x2c   : > { %p151_p12 = scmp.eq.s32.totalorder %s150_s30, 0  ;;  %s4244_s1 = sshll.u32 %s224_s11, 7 }
  0x2d   : > { %s5692_s3 = scalar_select %p39_p9, %s5506_s23, %s41_s13  }
  0x2e   : > { %s5695_s14 = scalar_select %p151_p12, %s5494_s20, %s153_s21  }
  0x2f   : > { %s233_s18 = scalar_lea.hbm %s6904_s0, %s4853_s29  ;;  %s228_s5 = scalar_lea.vmem [#allocation4], %s4244_s1 }
  0x30   : > { %s234_s8 = sshll.u32 %s233_s18, 4  ;;  %s236_s25 = sshll.u32 %s228_s5, 4  ;;  %s235_s8 = int_to_ptr.hbm [resolvable:$true] %s234_s8  ;;  %s237_s25 = int_to_ptr.vmem [resolvable:$true] %s236_s25 }
  0x31   : > { %p5164_p13 = pnand %p5173_p8, %p5679_p7  ;;  %s225_s16 = scalar_lea.sflag [#allocation5], %s224_s11 }
  0x32   : > { %s6948_s15 = smov 4   ;;  %s6949_s30 = smov 64  }
  0x33   : > { %5166 = dma.hbm_to_vmem [thread:$0]  (!%p5164_p13), %s235_s8, 2048, %s237_s25, %s225_s16, %s6949_s30, %s6949_s30, %s6948_s15  }
  0x34   : > { %248 = sbr.rel (%p5648_p11) target bundleno = 1446 (0x5a6), region = 40 }
  0x39   : > { %s250_s26 = sand.u32 1, %s5502_s22  }
  0x3a   : > { %s5710_s9 = sshll.u32 %s250_s26, 7  ;;  %s251_s1 = scalar_lea.sflag [#allocation5], %s250_s26 }
  0x3b   : > { %s254_s5 = scalar_lea.vmem [#allocation4], %s5710_s9 }
  0x3c   : > { %5467 = dma.done.wait (%p5632_p4), %s251_s1, 2048  }
  0x3d   : > { %5469 = vsyncadd (%p5632_p4), %s251_s1, 4294965248 }
  0x3e   : > { %5471 = dma.done.wait (%p5624_p1), [#allocation8], 18432  }
  0x3f   : > { %5473 = vsyncadd (%p5624_p1), [#allocation8], 4294948864  ;;  %s289_s18 = sand.u32 1, %s5490_s19   ;;  %s4252_s8 = sshll.u32 %s5510_s24, 3  ;;  %vm295_vm0 = vcmask 1040384   ;;  %v6950_v0 = vmov 0 }
  0x40   : > { %s5724_s25 = sshll.u32 %s289_s18, 7  ;;  %vm296_vm1 = vsmask.f32 256  ;;  %vm334_vm3 = vsmask.f32 7938  ;;  %v6953_v14 = vmov 0 }
  0x41   : > { %vm5729_vm2 = vmand %vm295_vm0, %vm296_vm1  ;;  %v304_v1 = vld [vmem:[#allocation2 + $0x18] sm:$0x1]  ;;  %v307_v2 = vld [vmem:[#allocation2 + $0x24] sm:$0x1]  ;;  %s4855_s6 = sshll.u32 %s5510_s24, 6  ;;  %vm554_vm5 = vcmask 1043456  }
  0x42   : > { %v6951_v0 = vsel %vm5729_vm2, 4294967295, %v6950_v0  ;;  %v310_v3 = vld [vmem:[#allocation2 + $0x30] sm:$0x1]  ;;  %v305_v4 = vsel %vm5729_vm2, 0, %v304_v1  ;;  %v308_v5 = vsel %vm5729_vm2, 0, %v307_v2  ;;  %vm5747_vm4 = vmand %vm295_vm0, %vm334_vm3  ;;  %s5784_s7 = scalar_lea.vmem %s254_s5, %s4855_s6 [#allocation4]  ;;  %v6956_v55 = vmov 0 }
  0x43   : > { %6952 = vst [vmem:[#allocation21_spill] sm:$0xff] %v6951_v0  ;;  %v311_v6 = vsel %vm5729_vm2, 0, %v310_v3  ;;  %v313_v7 = vld [vmem:[#allocation2 + $0x3c] sm:$0x1]  ;;  %v316_v9 = vld [vmem:[#allocation2 + $0x48] sm:$0x1]  ;;  %vm5795_vm7 = vmand %vm554_vm5, %vm334_vm3 }
  0x44   : > { %306 = vst [vmem:[#allocation2 + $0x18] sm:$0x1] %v305_v4  ;;  %v314_v8 = vsel %vm5729_vm2, 0, %v313_v7  ;;  %v317_v10 = vsel %vm5729_vm2, 0, %v316_v9  ;;  %v319_v11 = vld [vmem:[#allocation2 + $0x54] sm:$0x1] }
  0x45   : > { %309 = vst [vmem:[#allocation2 + $0x24] sm:$0x1] %v308_v5  ;;  %v320_v12 = vsel %vm5729_vm2, 0, %v319_v11  ;;  %v322_v13 = vld [vmem:[#allocation2 + $0x60] sm:$0x1]  ;;  %v6954_v14 = vsel %vm5747_vm4, 4294967295, %v6953_v14 }
  0x46   : > { %312 = vst [vmem:[#allocation2 + $0x30] sm:$0x1] %v311_v6  ;;  %v323_v15 = vsel %vm5729_vm2, 0, %v322_v13  ;;  %v325_v16 = vld [vmem:[#allocation2 + $0x6c] sm:$0x1]  ;;  %v6957_v55 = vsel %vm5795_vm7, 4294967295, %v6956_v55 }
  0x47   : > { %6955 = vst [vmem:[#allocation22_spill] sm:$0xff] %v6954_v14  ;;  %v326_v17 = vsel %vm5729_vm2, 0, %v325_v16  ;;  %v342_v18 = vld [vmem:[#allocation2 + $0x20] sm:$0x1]  ;;  %v345_v20 = vld [vmem:[#allocation2 + $0x2c] sm:$0x1] }
  0x48   : > { %315 = vst [vmem:[#allocation2 + $0x3c] sm:$0x1] %v314_v8  ;;  %v343_v19 = vsel %vm5747_vm4, 0, %v342_v18  ;;  %v346_v21 = vsel %vm5747_vm4, 0, %v345_v20  ;;  %v348_v22 = vld [vmem:[#allocation2 + $0x38] sm:$0x1] }
  0x49   : > { %318 = vst [vmem:[#allocation2 + $0x48] sm:$0x1] %v317_v10  ;;  %v349_v23 = vsel %vm5747_vm4, 0, %v348_v22  ;;  %v351_v24 = vld [vmem:[#allocation2 + $0x44] sm:$0x1]  ;;  %v6959_v3 = vmov 0 }
  0x4a   : > { %321 = vst [vmem:[#allocation2 + $0x54] sm:$0x1] %v320_v12  ;;  %v352_v25 = vsel %vm5747_vm4, 0, %v351_v24  ;;  %v354_v26 = vld [vmem:[#allocation2 + $0x50] sm:$0x1]  ;;  %s5867_s10 = scalar_lea.vmem [#allocation10], %s5724_s25 }
  0x4b   : > { %324 = vst [vmem:[#allocation2 + $0x60] sm:$0x1] %v323_v15  ;;  %v355_v27 = vsel %vm5747_vm4, 0, %v354_v26  ;;  %v357_v28 = vld [vmem:[#allocation2 + $0x5c] sm:$0x1]  ;;  %p4255_p1 = scmp.ne.s32.totalorder %s5510_s24, 0 }
  0x4c   : > { %327 = vst [vmem:[#allocation2 + $0x6c] sm:$0x1] %v326_v17  ;;  %v358_v29 = vsel %vm5747_vm4, 0, %v357_v28  ;;  %v360_v30 = vld [vmem:[#allocation2 + $0x68] sm:$0x1] }
  0x4d   : > { %344 = vst [vmem:[#allocation2 + $0x20] sm:$0x1] %v343_v19  ;;  %v361_v31 = vsel %vm5747_vm4, 0, %v360_v30  ;;  %v363_v32 = vld [vmem:[#allocation2 + $0x74] sm:$0x1] }
  0x4e   : > { %347 = vst [vmem:[#allocation2 + $0x2c] sm:$0x1] %v346_v21  ;;  %v364_v33 = vsel %vm5747_vm4, 0, %v363_v32  ;;  %v298_v34 = vld [vmem:[#allocation2] sm:$0x1] }
  0x4f   : > { %350 = vst [vmem:[#allocation2 + $0x38] sm:$0x1] %v349_v23  ;;  %v299_v35 = vsel %vm5729_vm2, 0, %v298_v34  ;;  %v301_v36 = vld [vmem:[#allocation2 + $0xc] sm:$0x1] }
  0x50   : > { %353 = vst [vmem:[#allocation2 + $0x44] sm:$0x1] %v352_v25  ;;  %v302_v37 = vsel %vm5729_vm2, 0, %v301_v36  ;;  %v328_v38 = vld [vmem:[#allocation2 + $0x78] sm:$0x1] }
  0x51   : > { %356 = vst [vmem:[#allocation2 + $0x50] sm:$0x1] %v355_v27  ;;  %v329_v39 = vsel %vm5729_vm2, 0, %v328_v38  ;;  %v331_v40 = vld [vmem:[#allocation2 + $0x84] sm:$0x1] }
  0x52   : > { %359 = vst [vmem:[#allocation2 + $0x5c] sm:$0x1] %v358_v29  ;;  %v332_v41 = vsel %vm5729_vm2, 0, %v331_v40  ;;  %v336_v42 = vld [vmem:[#allocation2 + $0x8] sm:$0x1] }
  0x53   : > { %362 = vst [vmem:[#allocation2 + $0x68] sm:$0x1] %v361_v31  ;;  %v337_v43 = vsel %vm5747_vm4, 0, %v336_v42  ;;  %v339_v44 = vld [vmem:[#allocation2 + $0x14] sm:$0x1] }
  0x54   : > { %365 = vst [vmem:[#allocation2 + $0x74] sm:$0x1] %v364_v33  ;;  %v340_v45 = vsel %vm5747_vm4, 0, %v339_v44  ;;  %v366_v46 = vld [vmem:[#allocation2 + $0x80] sm:$0x1] }
  0x55   : > { %300 = vst [vmem:[#allocation2] sm:$0x1] %v299_v35  ;;  %v367_v47 = vsel %vm5747_vm4, 0, %v366_v46  ;;  %v369_v48 = vld [vmem:[#allocation2 + $0x8c] sm:$0x1] }
  0x56   : > { %303 = vst [vmem:[#allocation2 + $0xc] sm:$0x1] %v302_v37  ;;  %v370_v49 = vsel %vm5747_vm4, 0, %v369_v48  ;;  %v375_v50 = vld [vmem:[%s5784_s7] sm:$0xf] }
  0x57   : > { %330 = vst [vmem:[#allocation2 + $0x78] sm:$0x1] %v329_v39  ;;  %v394_v51 = vshrl.u32 %v375_v50, 16  ;;  %v397_v52 = vshll.u32 %v375_v50, 16  ;;  %v376_v53 = vld [vmem:[%s5784_s7 + $0x4] sm:$0xf] }
  0x58   : > { %333 = vst [vmem:[#allocation2 + $0x84] sm:$0x1] %v332_v41  ;;  %vm391_vm6 = vsmask.f32 4368  ;;  %v402_v56 = vshrl.u32 %v376_v53, 16  ;;  %v405_v57 = vshll.u32 %v376_v53, 16 }
  0x59   : > { %338 = vst [vmem:[#allocation2 + $0x8] sm:$0x1] %v337_v43  ;;  %v396_v54 = vrot.slane %v394_v51, 7  ;;  %v556_v58 = vld [vmem:[#allocation2 + $0x18] sm:$0xf]  ;;  %vm5802_vm8 = vmor %vm296_vm1, %vm391_vm6 }
  0x5a   : > { %341 = vst [vmem:[#allocation2 + $0x14] sm:$0x1] %v340_v45  ;;  %v377_v59 = vld [vmem:[%s5784_s7 + $0x8] sm:$0xf]  ;;  %v378_v60 = vld [vmem:[%s5784_s7 + $0xc] sm:$0xf] }
  0x5b   : > { %368 = vst [vmem:[#allocation2 + $0x80] sm:$0x1] %v367_v47  ;;  %v399_v61 = vor.u32 %v397_v52, %v396_v54  ;;  %v400_v62 = vrot.slane %v396_v54, 4  ;;  %v404_v63 = vrot.slane %v402_v56, 7  ;;  %v560_v1 = vld [vmem:[#allocation2 + $0x20] sm:$0x1] }
  0x5c   : > { %371 = vst [vmem:[#allocation2 + $0x8c] sm:$0x1] %v370_v49  ;;  %v411_v2 = vshrl.u32 %v377_v59, 16  ;;  %v6960_v3 = vsel %vm5802_vm8, 4294967295, %v6959_v3  ;;  %v414_v4 = vshll.u32 %v377_v59, 16  ;;  %v419_v6 = vshrl.u32 %v378_v60, 16 }
  0x5d   : > { %6958 = vst [vmem:[#allocation23_spill] sm:$0xff] %v6957_v55  ;;  %v563_v5 = vld [vmem:[#allocation2 + $0x24] sm:$0xf]  ;;  %v422_v7 = vshll.u32 %v378_v60, 16  ;;  %v379_v8 = vld [vmem:[%s5784_s7 + $0x10] sm:$0xf]  ;;  %v557_v9 = vsel %vm5795_vm7, %v399_v61, %v556_v58  ;;  %v407_v10 = vor.u32 %v405_v57, %v404_v63 }
  0x5e   : > { %6961 = vst [vmem:[#allocation24_spill] sm:$0xff] %v6960_v3  ;;  %v409_v11 = vrot.slane %v404_v63, 4  ;;  %v413_v12 = vrot.slane %v411_v2, 7  ;;  %v567_v13 = vld [vmem:[#allocation2 + $0x2c] sm:$0x1]  ;;  %v421_v16 = vrot.slane %v419_v6, 7 }
  0x5f   : > { %v380_v15 = vld [vmem:[%s5784_s7 + $0x14] sm:$0xf]  ;;  %558 = vst [vmem:[#allocation2 + $0x18] sm:$0xf] %v557_v9  ;;  %v428_v17 = vshrl.u32 %v379_v8, 16  ;;  %v431_v18 = vshll.u32 %v379_v8, 16  ;;  %v408_v20 = vsel %vm5802_vm8, %v400_v62, %v407_v10 }
  0x60   : > { %v436_v19 = vshrl.u32 %v380_v15, 16  ;;  %v561_v21 = vsel %vm5729_vm2, %v409_v11, %v560_v1  ;;  %v416_v22 = vor.u32 %v414_v4, %v413_v12  ;;  %v417_v23 = vrot.slane %v413_v12, 4  ;;  %v570_v24 = vld [vmem:[#allocation2 + $0x30] sm:$0xf]  ;;  %v381_v25 = vld [vmem:[%s5784_s7 + $0x18] sm:$0xf] }
  0x61   : > { %559 = vst [vmem:[#allocation2 + $0x1c] sm:$0xf] %v408_v20  ;;  %v424_v26 = vor.u32 %v422_v7, %v421_v16  ;;  %v426_v27 = vrot.slane %v421_v16, 4  ;;  %v430_v28 = vrot.slane %v428_v17, 7  ;;  %v439_v31 = vshll.u32 %v380_v15, 16 }
  0x62   : > { %v438_v29 = vrot.slane %v436_v19, 7  ;;  %562 = vst [vmem:[#allocation2 + $0x20] sm:$0x1] %v561_v21  ;;  %v564_v30 = vsel %vm5795_vm7, %v416_v22, %v563_v5  ;;  %v445_v32 = vshrl.u32 %v381_v25, 16  ;;  %v448_v33 = vshll.u32 %v381_v25, 16 }
  0x63   : > { %565 = vst [vmem:[#allocation2 + $0x24] sm:$0xf] %v564_v30  ;;  %v425_v34 = vsel %vm5802_vm8, %v417_v23, %v424_v26  ;;  %v568_v35 = vsel %vm5729_vm2, %v426_v27, %v567_v13  ;;  %v433_v36 = vor.u32 %v431_v18, %v430_v28  ;;  %v434_v37 = vrot.slane %v430_v28, 4  ;;  %v574_v38 = vld [vmem:[#allocation2 + $0x38] sm:$0x1] }
  0x64   : > { %566 = vst [vmem:[#allocation2 + $0x28] sm:$0xf] %v425_v34  ;;  %v441_v39 = vor.u32 %v439_v31, %v438_v29  ;;  %v443_v40 = vrot.slane %v438_v29, 4  ;;  %v447_v41 = vrot.slane %v445_v32, 7  ;;  %v382_v42 = vld [vmem:[%s5784_s7 + $0x1c] sm:$0xf] }
  0x65   : > { %569 = vst [vmem:[#allocation2 + $0x2c] sm:$0x1] %v568_v35  ;;  %v571_v43 = vsel %vm5795_vm7, %v433_v36, %v570_v24  ;;  %v577_v44 = vld [vmem:[#allocation2 + $0x3c] sm:$0xf]  ;;  %v453_v45 = vshrl.u32 %v382_v42, 16  ;;  %v456_v46 = vshll.u32 %v382_v42, 16 }
  0x66   : > { %572 = vst [vmem:[#allocation2 + $0x30] sm:$0xf] %v571_v43  ;;  %v442_v47 = vsel %vm5802_vm8, %v434_v37, %v441_v39  ;;  %v575_v48 = vsel %vm5729_vm2, %v443_v40, %v574_v38  ;;  %v450_v49 = vor.u32 %v448_v33, %v447_v41  ;;  %v383_v50 = vld [vmem:[%s5784_s7 + $0x20] sm:$0xf]  ;;  %v451_v51 = vrot.slane %v447_v41, 4 }
  0x67   : > { %573 = vst [vmem:[#allocation2 + $0x34] sm:$0xf] %v442_v47  ;;  %v455_v52 = vrot.slane %v453_v45, 7  ;;  %v462_v53 = vshrl.u32 %v383_v50, 16  ;;  %v465_v54 = vshll.u32 %v383_v50, 16 }
  0x68   : > { %576 = vst [vmem:[#allocation2 + $0x38] sm:$0x1] %v575_v48  ;;  %v578_v56 = vsel %vm5795_vm7, %v450_v49, %v577_v44  ;;  %v581_v57 = vld [vmem:[#allocation2 + $0x44] sm:$0x1]  ;;  %v584_v63 = vld [vmem:[#allocation2 + $0x48] sm:$0xf] }
  0x69   : > { %v384_v58 = vld [vmem:[%s5784_s7 + $0x24] sm:$0xf]  ;;  %579 = vst [vmem:[#allocation2 + $0x3c] sm:$0xf] %v578_v56  ;;  %v458_v59 = vor.u32 %v456_v46, %v455_v52  ;;  %v460_v60 = vrot.slane %v455_v52, 4  ;;  %v464_v61 = vrot.slane %v462_v53, 7 }
  0x6a   : > { %v470_v62 = vshrl.u32 %v384_v58, 16  ;;  %v473_v1 = vshll.u32 %v384_v58, 16  ;;  %v385_v2 = vld [vmem:[%s5784_s7 + $0x28] sm:$0xf]  ;;  %v386_v8 = vld [vmem:[%s5784_s7 + $0x2c] sm:$0xf] }
  0x6b   : > { %v459_v4 = vsel %vm5802_vm8, %v451_v51, %v458_v59  ;;  %v582_v5 = vsel %vm5729_vm2, %v460_v60, %v581_v57  ;;  %v467_v6 = vor.u32 %v465_v54, %v464_v61  ;;  %v468_v7 = vrot.slane %v464_v61, 4  ;;  %v588_v15 = vld [vmem:[#allocation2 + $0x50] sm:$0x1]  ;;  %v591_v21 = vld [vmem:[#allocation2 + $0x54] sm:$0xf] }
  0x6c   : > { %580 = vst [vmem:[#allocation2 + $0x40] sm:$0xf] %v459_v4  ;;  %v472_v9 = vrot.slane %v470_v62, 7  ;;  %v479_v10 = vshrl.u32 %v385_v2, 16  ;;  %v482_v11 = vshll.u32 %v385_v2, 16  ;;  %v487_v12 = vshrl.u32 %v386_v8, 16 }
  0x6d   : > { %583 = vst [vmem:[#allocation2 + $0x44] sm:$0x1] %v582_v5  ;;  %v585_v13 = vsel %vm5795_vm7, %v467_v6, %v584_v63  ;;  %v490_v16 = vshll.u32 %v386_v8, 16  ;;  %v387_v22 = vld [vmem:[%s5784_s7 + $0x30] sm:$0xf] }
  0x6e   : > { %586 = vst [vmem:[#allocation2 + $0x48] sm:$0xf] %v585_v13  ;;  %v475_v17 = vor.u32 %v473_v1, %v472_v9  ;;  %v477_v18 = vrot.slane %v472_v9, 4  ;;  %v481_v19 = vrot.slane %v479_v10, 7  ;;  %v489_v20 = vrot.slane %v487_v12, 7 }
  0x6f   : > { %v388_v23 = vld [vmem:[%s5784_s7 + $0x34] sm:$0xf]  ;;  %v595_v28 = vld [vmem:[#allocation2 + $0x5c] sm:$0x1]  ;;  %v389_v29 = vld [vmem:[%s5784_s7 + $0x38] sm:$0xf] }
  0x70   : > { %v476_v24 = vsel %vm5802_vm8, %v468_v7, %v475_v17  ;;  %v589_v25 = vsel %vm5729_vm2, %v477_v18, %v588_v15  ;;  %v484_v26 = vor.u32 %v482_v11, %v481_v19  ;;  %v485_v27 = vrot.slane %v481_v19, 4  ;;  %v598_v35 = vld [vmem:[#allocation2 + $0x60] sm:$0xf]  ;;  %v602_v42 = vld [vmem:[#allocation2 + $0x68] sm:$0x1] }
  0x71   : > { %587 = vst [vmem:[#allocation2 + $0x4c] sm:$0xf] %v476_v24  ;;  %v492_v30 = vor.u32 %v490_v16, %v489_v20  ;;  %v494_v31 = vrot.slane %v489_v20, 4  ;;  %v496_v32 = vshrl.u32 %v387_v22, 16  ;;  %v499_v33 = vshll.u32 %v387_v22, 16 }
  0x72   : > { %590 = vst [vmem:[#allocation2 + $0x50] sm:$0x1] %v589_v25  ;;  %v592_v34 = vsel %vm5795_vm7, %v484_v26, %v591_v21  ;;  %v504_v36 = vshrl.u32 %v388_v23, 16  ;;  %v507_v37 = vshll.u32 %v388_v23, 16  ;;  %v513_v38 = vshrl.u32 %v389_v29, 16 }
  0x73   : > { %593 = vst [vmem:[#allocation2 + $0x54] sm:$0xf] %v592_v34  ;;  %v493_v39 = vsel %vm5802_vm8, %v485_v27, %v492_v30  ;;  %v596_v40 = vsel %vm5729_vm2, %v494_v31, %v595_v28  ;;  %v498_v41 = vrot.slane %v496_v32, 7  ;;  %v516_v43 = vshll.u32 %v389_v29, 16  ;;  %v605_v44 = vld [vmem:[#allocation2 + $0x6c] sm:$0xf] }
  0x74   : > { %594 = vst [vmem:[#allocation2 + $0x58] sm:$0xf] %v493_v39  ;;  %v506_v45 = vrot.slane %v504_v36, 7  ;;  %v515_v46 = vrot.slane %v513_v38, 7  ;;  %v390_v47 = vld [vmem:[%s5784_s7 + $0x3c] sm:$0xf] }
  0x75   : > { %597 = vst [vmem:[#allocation2 + $0x5c] sm:$0x1] %v596_v40  ;;  %v501_v48 = vor.u32 %v499_v33, %v498_v41  ;;  %v502_v49 = vrot.slane %v498_v41, 4  ;;  %v521_v50 = vshrl.u32 %v390_v47, 16  ;;  %v524_v51 = vshll.u32 %v390_v47, 16 }
  0x76   : > { %v509_v52 = vor.u32 %v507_v37, %v506_v45  ;;  %v511_v53 = vrot.slane %v506_v45, 4  ;;  %v518_v54 = vor.u32 %v516_v43, %v515_v46  ;;  %v519_v57 = vrot.slane %v515_v46, 4  ;;  %v609_v62 = vld [vmem:[#allocation2 + $0x74] sm:$0x1] }
  0x77   : > { %v599_v56 = vsel %vm5795_vm7, %v501_v48, %v598_v35  ;;  %v523_v58 = vrot.slane %v521_v50, 7 }
  0x78   : > { %600 = vst [vmem:[#allocation2 + $0x60] sm:$0xf] %v599_v56  ;;  %v510_v59 = vsel %vm5802_vm8, %v502_v49, %v509_v52  ;;  %v603_v60 = vsel %vm5729_vm2, %v511_v53, %v602_v42  ;;  %v606_v61 = vsel %vm5795_vm7, %v518_v54, %v605_v44 }
  0x79   : > { %601 = vst [vmem:[#allocation2 + $0x64] sm:$0xf] %v510_v59  ;;  %v526_v63 = vor.u32 %v524_v51, %v523_v58  ;;  %v528_v1 = vrot.slane %v523_v58, 4  ;;  %615 = sbr.rel (%p4255_p1) target bundleno = 133 (0x85), region = 56 }
  0x7a   : > { %604 = vst [vmem:[#allocation2 + $0x68] sm:$0x1] %v603_v60 }
  0x7b   : > { %607 = vst [vmem:[#allocation2 + $0x6c] sm:$0xf] %v606_v61  ;;  %v527_v2 = vsel %vm5802_vm8, %v519_v57, %v526_v63  ;;  %v610_v4 = vsel %vm5729_vm2, %v528_v1, %v609_v62 }
  0x7c   : > { %608 = vst [vmem:[#allocation2 + $0x70] sm:$0xf] %v527_v2 }
  0x7d   : > { %611 = vst [vmem:[#allocation2 + $0x74] sm:$0x1] %v610_v4 }
  0x7e   : > { %v616_v5 = vld [vmem:[#allocation2] sm:$0xf]  ;;  %v620_v6 = vld [vmem:[#allocation2 + $0x8] sm:$0x1]  ;;  %v5532_v8 = vmov 0  }
  0x7f   : > { %v617_v7 = vsel %vm5795_vm7, 0, %v616_v5  ;;  %619 = vst [vmem:[#allocation2 + $0x4] sm:$0xf] %v5532_v8  ;;  %v621_v9 = vsel %vm5729_vm2, 0, %v620_v6  ;;  %v623_v10 = vld [vmem:[#allocation2 + $0xc] sm:$0xf] }
  0x80   : > { %618 = vst [vmem:[#allocation2] sm:$0xf] %v617_v7  ;;  %v624_v11 = vsel %vm5795_vm7, 0, %v623_v10  ;;  %v627_v12 = vld [vmem:[#allocation2 + $0x14] sm:$0x1] }
  0x81   : > { %626 = vst [vmem:[#allocation2 + $0x10] sm:$0xf] %v5532_v8  ;;  %v628_v13 = vsel %vm5729_vm2, 0, %v627_v12 }
  0x82   : > { %622 = vst [vmem:[#allocation2 + $0x8] sm:$0x1] %v621_v9 }
  0x83   : > { %625 = vst [vmem:[#allocation2 + $0xc] sm:$0xf] %v624_v11 }
  0x84   : > { %629 = vst [vmem:[#allocation2 + $0x14] sm:$0x1] %v628_v13 }
  0x85 PF: > { %p4256_p4 = scmp.le.s32.totalorder %s5510_s24, 0 }
  0x86   : > { %s4257_s29 = sadd.s32 (!%p4256_p4), 4294967294, %s4252_s8 }
  0x87   : > { %633 = sbr.rel (%p4256_p4) target bundleno = 154 (0x9a), region = 60  ;;  %s4856_s16 = sshll.u32 (!%p4256_p4), %s4257_s29, 3 }
  0x88   : > { %s637_s13 = scalar_lea.vmem (!%p4256_p4), %s254_s5, %s4856_s16 [#allocation4] }
  0x8c   : > { %v638_v15 = vld [vmem:[%s637_s13] sm:$0xf]  ;;  %v639_v16 = vld [vmem:[%s637_s13 + $0x4] sm:$0xf]  ;;  %v640_v17 = vld [vmem:[%s637_s13 + $0x8] sm:$0xf] }
  0x8d   : > { %v643_v18 = vshrl.u32 %v638_v15, 16  ;;  %v646_v19 = vshll.u32 %v638_v15, 16  ;;  %v651_v20 = vshrl.u32 %v639_v16, 16  ;;  %v654_v21 = vshll.u32 %v639_v16, 16  ;;  %v641_v22 = vld [vmem:[%s637_s13 + $0xc] sm:$0xf] }
  0x8e   : > { %v660_v23 = vshrl.u32 %v640_v17, 16  ;;  %v663_v24 = vshll.u32 %v640_v17, 16  ;;  %v668_v25 = vshrl.u32 %v641_v22, 16  ;;  %v671_v26 = vshll.u32 %v641_v22, 16  ;;  %v682_v29 = vld [vmem:[#allocation2] sm:$0xf] }
  0x8f   : > { %v645_v27 = vrot.slane %v643_v18, 7  ;;  %v653_v28 = vrot.slane %v651_v20, 7  ;;  %v686_v30 = vld [vmem:[#allocation2 + $0x8] sm:$0x1]  ;;  %v689_v37 = vld [vmem:[#allocation2 + $0xc] sm:$0xf] }
  0x90   : > { %v662_v31 = vrot.slane %v660_v23, 7  ;;  %v670_v32 = vrot.slane %v668_v25, 7  ;;  %v693_v45 = vld [vmem:[#allocation2 + $0x14] sm:$0x1] }
  0x91   : > { %v648_v33 = vor.u32 %v646_v19, %v645_v27  ;;  %v649_v34 = vrot.slane %v645_v27, 4  ;;  %v656_v35 = vor.u32 %v654_v21, %v653_v28  ;;  %v658_v36 = vrot.slane %v653_v28, 4 }
  0x92   : > { %v665_v38 = vor.u32 %v663_v24, %v662_v31  ;;  %v666_v39 = vrot.slane %v662_v31, 4  ;;  %v673_v40 = vor.u32 %v671_v26, %v670_v32  ;;  %v675_v41 = vrot.slane %v670_v32, 4 }
  0x93   : > { %v683_v42 = vsel %vm5795_vm7, %v648_v33, %v682_v29  ;;  %v657_v43 = vsel %vm5802_vm8, %v649_v34, %v656_v35  ;;  %v687_v44 = vsel %vm5729_vm2, %v658_v36, %v686_v30 }
  0x94   : > { %684 = vst [vmem:[#allocation2] sm:$0xf] %v683_v42  ;;  %v690_v46 = vsel %vm5795_vm7, %v665_v38, %v689_v37  ;;  %v674_v47 = vsel %vm5802_vm8, %v666_v39, %v673_v40  ;;  %v694_v48 = vsel %vm5729_vm2, %v675_v41, %v693_v45 }
  0x95   : > { %685 = vst [vmem:[#allocation2 + $0x4] sm:$0xf] %v657_v43 }
  0x96   : > { %688 = vst [vmem:[#allocation2 + $0x8] sm:$0x1] %v687_v44 }
  0x97   : > { %691 = vst [vmem:[#allocation2 + $0xc] sm:$0xf] %v690_v46 }
  0x98   : > { %692 = vst [vmem:[#allocation2 + $0x10] sm:$0xf] %v674_v47 }
  0x99   : > { %695 = vst [vmem:[#allocation2 + $0x14] sm:$0x1] %v694_v48 }
  0x9a PF: > { %p4260_p11 = scmp.ne.s32.totalorder %s5510_s24, 1 }
  0x9c   : > { %699 = sbr.rel (%p4260_p11) target bundleno = 168 (0xa8), region = 64 }
  0xa1   : > { %v701_v49 = vld [vmem:[#allocation2 + $0x78] sm:$0xf]  ;;  %v705_v50 = vld [vmem:[#allocation2 + $0x80] sm:$0x1]  ;;  %v5533_v52 = vmov 0  }
  0xa2   : > { %v702_v51 = vsel %vm5795_vm7, 0, %v701_v49  ;;  %704 = vst [vmem:[#allocation2 + $0x7c] sm:$0xf] %v5533_v52  ;;  %v706_v53 = vsel %vm5729_vm2, 0, %v705_v50  ;;  %v708_v54 = vld [vmem:[#allocation2 + $0x84] sm:$0xf] }
  0xa3   : > { %703 = vst [vmem:[#allocation2 + $0x78] sm:$0xf] %v702_v51  ;;  %v709_v56 = vsel %vm5795_vm7, 0, %v708_v54  ;;  %v712_v57 = vld [vmem:[#allocation2 + $0x8c] sm:$0x1] }
  0xa4   : > { %711 = vst [vmem:[#allocation2 + $0x88] sm:$0xf] %v5533_v52  ;;  %v713_v58 = vsel %vm5729_vm2, 0, %v712_v57 }
  0xa5   : > { %707 = vst [vmem:[#allocation2 + $0x80] sm:$0x1] %v706_v53 }
  0xa6   : > { %710 = vst [vmem:[#allocation2 + $0x84] sm:$0xf] %v709_v56 }
  0xa7   : > { %714 = vst [vmem:[#allocation2 + $0x8c] sm:$0x1] %v713_v58 }
  0xa8 PF: > { %p4261_p0 = scmp.ge.s32.totalorder %s5510_s24, 1 }
  0xaa   : > { %718 = sbr.rel (%p4261_p0) target bundleno = 189 (0xbd), region = 68 }
  0xaf   : > { %v4264_v59 = vld [vmem:[%s5784_s7 + $0x40] sm:$0xf]  ;;  %v4265_v60 = vld [vmem:[%s5784_s7 + $0x44] sm:$0xf]  ;;  %v4266_v2 = vld [vmem:[%s5784_s7 + $0x48] sm:$0xf] }
  0xb0   : > { %v728_v61 = vshrl.u32 %v4264_v59, 16  ;;  %v731_v62 = vshll.u32 %v4264_v59, 16  ;;  %v736_v63 = vshrl.u32 %v4265_v60, 16  ;;  %v739_v1 = vshll.u32 %v4265_v60, 16  ;;  %v4267_v4 = vld [vmem:[%s5784_s7 + $0x4c] sm:$0xf] }
  0xb1   : > { %v768_v6 = vld [vmem:[#allocation2 + $0x78] sm:$0xf]  ;;  %v745_v8 = vshrl.u32 %v4266_v2, 16  ;;  %v772_v9 = vld [vmem:[#allocation2 + $0x80] sm:$0x1]  ;;  %v748_v10 = vshll.u32 %v4266_v2, 16 }
  0xb2   : > { %v730_v5 = vrot.slane %v728_v61, 7  ;;  %v738_v7 = vrot.slane %v736_v63, 7  ;;  %v753_v11 = vshrl.u32 %v4267_v4, 16  ;;  %v756_v12 = vshll.u32 %v4267_v4, 16  ;;  %v775_v23 = vld [vmem:[#allocation2 + $0x84] sm:$0xf] }
  0xb3   : > { %v747_v18 = vrot.slane %v745_v8, 7  ;;  %v779_v24 = vld [vmem:[#allocation2 + $0x8c] sm:$0x1] }
  0xb4   : > { %v733_v13 = vor.u32 %v731_v62, %v730_v5  ;;  %v734_v15 = vrot.slane %v730_v5, 4  ;;  %v741_v16 = vor.u32 %v739_v1, %v738_v7  ;;  %v743_v17 = vrot.slane %v738_v7, 4 }
  0xb5   : > { %v755_v19 = vrot.slane %v753_v11, 7  ;;  %v750_v25 = vor.u32 %v748_v10, %v747_v18  ;;  %v751_v26 = vrot.slane %v747_v18, 4 }
  0xb6   : > { %v769_v20 = vsel %vm5795_vm7, %v733_v13, %v768_v6  ;;  %v742_v21 = vsel %vm5802_vm8, %v734_v15, %v741_v16  ;;  %v773_v22 = vsel %vm5729_vm2, %v743_v17, %v772_v9 }
  0xb7   : > { %770 = vst [vmem:[#allocation2 + $0x78] sm:$0xf] %v769_v20  ;;  %v758_v27 = vor.u32 %v756_v12, %v755_v19  ;;  %v760_v28 = vrot.slane %v755_v19, 4  ;;  %v776_v29 = vsel %vm5795_vm7, %v750_v25, %v775_v23 }
  0xb8   : > { %771 = vst [vmem:[#allocation2 + $0x7c] sm:$0xf] %v742_v21 }
  0xb9   : > { %774 = vst [vmem:[#allocation2 + $0x80] sm:$0x1] %v773_v22  ;;  %v759_v30 = vsel %vm5802_vm8, %v751_v26, %v758_v27  ;;  %v780_v31 = vsel %vm5729_vm2, %v760_v28, %v779_v24 }
  0xba   : > { %777 = vst [vmem:[#allocation2 + $0x84] sm:$0xf] %v776_v29 }
  0xbb   : > { %778 = vst [vmem:[#allocation2 + $0x88] sm:$0xf] %v759_v30 }
  0xbc   : > { %781 = vst [vmem:[#allocation2 + $0x8c] sm:$0x1] %v780_v31 }
  0xbd PF: > { %v4865_v32 = vld [vmem:[#allocation7 + $0x38] sm:$0xff]  ;;  %v4864_v34 = vld [vmem:[#allocation7 + $0x30] sm:$0xff]  ;;  %v4863_v36 = vld [vmem:[#allocation7 + $0x28] sm:$0xff]  ;;  %vm920_vm9 = vsmask.f32 7424  ;;  %vm1081_vm10 = vcmask 1046528  }
  0xbe   : > { %v4873_v33 = vld [vmem:[#allocation7 + $0x78] sm:$0xff]  ;;  %1760 = vmatpush.bf16.msra.mxu0 %v4865_v32  ;;  %v4872_v35 = vld [vmem:[#allocation7 + $0x70] sm:$0xff]  ;;  %v4871_v37 = vld [vmem:[#allocation7 + $0x68] sm:$0xff] }
  0xbf   : > { %5128 = vmatpush.bf16.msra.mxu3 %v4873_v33  ;;  %1819 = vmatpush.bf16.msra.mxu1 %v4873_v33  ;;  %v5925_v38 = vld [vmem:[#allocation7 + $0xb8] sm:$0xff]  ;;  %v5927_v39 = vld [vmem:[#allocation2 + $0x54] sm:$0xff]   ;;  %v4862_v41 = vld [vmem:[#allocation7 + $0x20] sm:$0xff] }
  0xc0   : > { %v5929_v40 = vld [vmem:[#allocation2 + $0x54] sm:$0xf0]  ;;  %5136 = vmatpush.bf16.msra.mxu2 %v5925_v38  ;;  %v4870_v42 = vld [vmem:[#allocation7 + $0x60] sm:$0xff]  ;;  %v813_v43 = vld [vmem:[#allocation2 + $0x5c] sm:$0x1]  ;;  %v1008_v53 = vshll.u32 %v5927_v39, 16 }
  0xc1   : > { %v806_v44 = vld [vmem:[#allocation2 + $0x8] sm:$0x1]  ;;  %v4861_v45 = vld [vmem:[#allocation7 + $0x18] sm:$0xff]  ;;  %v907_v47 = vunpack.c.l.b16 %v813_v43  ;;  %v4860_v50 = vld [vmem:[#allocation7 + $0x10] sm:$0xff]  ;;  %v1006_v61 = vshrl.u32 %v5927_v39, 16 }
  0xc2   : > { %1761 = vmatpush.bf16.msra.mxu0 %v4864_v34  ;;  %v4869_v46 = vld [vmem:[#allocation7 + $0x58] sm:$0xff]  ;;  %v900_v48 = vunpack.c.l.b16 %v806_v44  ;;  %v4868_v51 = vld [vmem:[#allocation7 + $0x50] sm:$0xff]  ;;  %v5937_v58 = vld [vmem:[#allocation7 + $0xa8] sm:$0xff]  ;;  %v1010_v62 = vrot.slane %v1008_v53, 1 }
  0xc3   : > { %5129 = vmatpush.bf16.msra.mxu3 %v4872_v35  ;;  %1820 = vmatpush.bf16.msra.mxu1 %v4872_v35  ;;  %v5004_v49 = vld [vmem:[#allocation2] sm:$0xff]   ;;  %v5932_v52 = vpack.c.b16 %v907_v47, %v907_v47  ;;  %v4880_v54 = vld [vmem:[#allocation7 + $0xb0] sm:$0xff]  ;;  %v4859_v59 = vld [vmem:[#allocation7 + $0x8] sm:$0xff] }
  0xc4   : > { %v924_v56 = vshll.u32 %v5004_v49, 16  ;;  %v5935_v57 = vpack.c.b16 %v900_v48, %v900_v48  ;;  %5137 = vmatpush.bf16.msra.mxu2 %v4880_v54  ;;  %v4867_v60 = vld [vmem:[#allocation7 + $0x48] sm:$0xff]  ;;  %v922_v1 = vshrl.u32 %v5004_v49, 16  ;;  %v5947_v7 = vld [vmem:[#allocation7 + $0xa0] sm:$0xff]  ;;  %v1011_v10 = vor.u32 %v1010_v62, %v1006_v61  ;;  %v4889_v16 = vld [vmem:[#allocation7 + $0xf8] sm:$0xff] }
  0xc5   : > { %v1013_v63 = vshll.u32 %v5932_v52, 16  ;;  %v5942_v5 = vld [vmem:[#allocation2 + $0xc] sm:$0xff]   ;;  %v814_v15 = vld [vmem:[#allocation2 + $0x68] sm:$0x1]  ;;  %v807_v17 = vld [vmem:[#allocation2 + $0x14] sm:$0x1] }
  0xc6   : > { %1762 = vmatpush.bf16.msra.mxu0 %v4863_v36  ;;  %v926_v2 = vrot.slane %v924_v56, 1  ;;  %v929_v4 = vshll.u32 %v5935_v57, 16  ;;  %v5944_v6 = vld [vmem:[#allocation2 + $0xc] sm:$0xf0]  ;;  %v4858_v8 = vld [vmem:[#allocation7] sm:$0xff]  ;;  %v5950_v18 = vld [vmem:[#allocation7 + $0x98] sm:$0xff]  ;;  %v908_v20 = vunpack.c.l.b16 %v814_v15  ;;  %v901_v23 = vunpack.c.l.b16 %v807_v17 }
  0xc7   : > { %5130 = vmatpush.bf16.msra.mxu3 %v4871_v37  ;;  %1821 = vmatpush.bf16.msra.mxu1 %v4871_v37  ;;  %v4866_v9 = vld [vmem:[#allocation7 + $0x40] sm:$0xff]  ;;  %v1015_v11 = vrot.slane %v1013_v63, 1  ;;  %v5957_v22 = vld [vmem:[#allocation2 + $0x60] sm:$0xff]   ;;  %v4888_v24 = vld [vmem:[#allocation7 + $0xf0] sm:$0xff]  ;;  %v936_v29 = vshll.u32 %v5942_v5, 16  ;;  %v934_v44 = vshrl.u32 %v5942_v5, 16 }
  0xc8   : > { %5138 = vmatpush.bf16.msra.mxu2 %v5937_v58  ;;  %v927_v12 = vor.u32 %v926_v2, %v922_v1  ;;  %v931_v13 = vrot.slane %v929_v4, 1  ;;  %v5961_v25 = vpack.c.b16 %v908_v20, %v908_v20  ;;  %v1020_v26 = vshll.u32 %v5957_v22, 16  ;;  %v4876_v27 = vld [vmem:[#allocation7 + $0x90] sm:$0xff]  ;;  %v4887_v30 = vld [vmem:[#allocation7 + $0xe8] sm:$0xff]  ;;  %v5969_v32 = vld [vmem:[#allocation2 + $0x24] sm:$0xff]  }
  0xc9   : > { %v5953_v19 = vsel %vm920_vm9, %v1011_v10, %v1015_v11  ;;  %v5964_v28 = vpack.c.b16 %v901_v23, %v901_v23  ;;  %v5967_v31 = vld [vmem:[#allocation7 + $0x88] sm:$0xff]  ;;  %v5478_v33 = vld [vmem:[#allocation2 + $0x24] sm:$0xf0]  ;;  %v809_v34 = vld [vmem:[#allocation2 + $0x2c] sm:$0x1] }
  0xca   : > { %1763 = vmatpush.bf16.msra.mxu0 %v4862_v41  ;;  %v932_v21 = vsel %vm920_vm9, %v927_v12, %v931_v13  ;;  %v5479_v35 = vld [vmem:[#allocation2 + $0x24] sm:$0xe]  ;;  %v5971_v36 = vld [vmem:[#allocation2 + $0x6c] sm:$0xff]   ;;  %v1018_v41 = vshrl.u32 %v5957_v22, 16  ;;  %v1025_v43 = vshll.u32 %v5961_v25, 16 }
  0xcb   : > { %5131 = vmatpush.bf16.msra.mxu3 %v4870_v42  ;;  %1822 = vmatpush.bf16.msra.mxu1 %v4870_v42  ;;  %v5973_v37 = vld [vmem:[#allocation2 + $0x6c] sm:$0xf0]  ;;  %v1022_v42 = vrot.slane %v1020_v26, 1  ;;  %v5480_v48 = vor.u32 %v5479_v35, %v5478_v33  ;;  %v815_v61 = vld [vmem:[#allocation2 + $0x74] sm:$0x1]  ;;  %v1032_v10 = vshll.u32 %v5971_v36, 16 }
  0xcc   : > { %5139 = vmatpush.bf16.msra.mxu2 %v5947_v7  ;;  %v1027_v56 = vrot.slane %v1025_v43, 1  ;;  %v808_v62 = vld [vmem:[#allocation2 + $0x20] sm:$0x1]  ;;  %v909_v2 = vunpack.c.l.b16 %v815_v61  ;;  %v5090_v12 = vld [vmem:[#allocation2 + $0x30] sm:$0xf0]  ;;  %v4882_v35 = vld [vmem:[#allocation7 + $0xc0] sm:$0xff] }
  0xcd   : > { %v810_v13 = vld [vmem:[#allocation2 + $0x38] sm:$0x1]  ;;  %v5091_v15 = vld [vmem:[#allocation2 + $0x30] sm:$0xe]  ;;  %v1034_v26 = vrot.slane %v1032_v10, 1 }
  0xce   : > { %1764 = vmatpush.bf16.msra.mxu0 %v4861_v45  ;;  %v938_v45 = vrot.slane %v936_v29, 1  ;;  %v6002_v11 = vpack.c.b16 %v909_v2, %v909_v2  ;;  %v4883_v20 = vld [vmem:[#allocation7 + $0xc8] sm:$0xff] }
  0xcf   : > { %5132 = vmatpush.bf16.msra.mxu3 %v4869_v46  ;;  %1823 = vmatpush.bf16.msra.mxu1 %v4869_v46  ;;  %v941_v46 = vshll.u32 %v5964_v28, 16 }
  0xd0   : > { %5140 = vmatpush.bf16.msra.mxu2 %v5950_v18  ;;  %v1037_v29 = vshll.u32 %v6002_v11, 16 }
  0xd2   : > { %1765 = vmatpush.bf16.msra.mxu0 %v4860_v50  ;;  %v4874_v50 = vld [vmem:[#allocation7 + $0x80] sm:$0xff] }
  0xd3   : > { %5133 = vmatpush.bf16.msra.mxu3 %v4868_v51  ;;  %1824 = vmatpush.bf16.msra.mxu1 %v4868_v51  ;;  %v1091_v51 = vrot.slane %v5480_v48, 1 }
  0xd4   : > { %5141 = vmatpush.bf16.msra.mxu2 %v4876_v27 }
  0xd6   : > { %1766 = vmatpush.bf16.msra.mxu0 %v4859_v59  ;;  %v939_v59 = vor.u32 %v938_v45, %v934_v44 }
  0xd7   : > { %5134 = vmatpush.bf16.msra.mxu3 %v4867_v60  ;;  %1825 = vmatpush.bf16.msra.mxu1 %v4867_v60  ;;  %v943_v60 = vrot.slane %v941_v46, 1 }
  0xd8   : > { %5142 = vmatpush.bf16.msra.mxu2 %v5967_v31 }
  0xd9   : > { %v5992_v4 = vsel %vm920_vm9, %v939_v59, %v943_v60  ;;  %v958_v60 = vshrl.u32 %v5969_v32, 16 }
  0xda   : > { %1767 = vmatpush.bf16.msra.mxu0 %v4858_v8  ;;  %v902_v8 = vunpack.c.l.b16 %v808_v62 }
  0xdb   : > { %5135 = vmatpush.bf16.msra.mxu3 %v4866_v9  ;;  %1826 = vmatpush.bf16.msra.mxu1 %v4866_v9  ;;  %v4884_v9 = vld [vmem:[#allocation7 + $0xd0] sm:$0xff] }
  0xdc   : > { %5143 = vmatpush.bf16.msra.mxu2 %v4874_v50 }
  0xdd   : > { %1768 = vmatmul.bf16.vlgmr.msra.gmra.mxu0 %v5004_v49  ;;  %v4886_v49 = vld [vmem:[#allocation7 + $0xe0] sm:$0xff] }
  0xde   : > { %1878 = vmatpush.bf16.msrb.mxu0 %v5925_v38  ;;  %1862 = vmatmul.bf16.vlgmr.msra.gmra.mxu3 %v5953_v19  ;;  %v903_v38 = vunpack.c.l.b16 %v809_v34 }
  0xdf   : > { %1937 = vmatpush.bf16.msrb.mxu3 %v4889_v16  ;;  %1827 = vmatmul.bf16.vlgmr.msra.gmra.mxu1 %v932_v21  ;;  %v6004_v16 = vpack.c.b16 %v902_v8, %v902_v8  ;;  %v5092_v21 = vor.u32 %v5091_v15, %v5090_v12  ;;  %v812_v15 = vld [vmem:[#allocation2 + $0x50] sm:$0x1] }
  0xe0   : > { %v5980_v47 = vpack.c.b16 %v903_v38, %v903_v38 }
  0xe1   : > { %v953_v34 = vshll.u32 %v6004_v16, 16  ;;  %v1094_v38 = vrot.slane %v5092_v21, 1 }
  0xe2   : > { %1879 = vmatpush.bf16.msrb.mxu0 %v4880_v54  ;;  %v1092_v53 = vrot.slane %v5980_v47, 1  ;;  %v1023_v54 = vor.u32 %v1022_v42, %v1018_v41  ;;  %v1039_v42 = vrot.slane %v1037_v29, 1 }
  0xe3   : > { %1938 = vmatpush.bf16.msrb.mxu3 %v4888_v24  ;;  %v1030_v24 = vshrl.u32 %v5971_v36, 16  ;;  %v955_v44 = vrot.slane %v953_v34, 1 }
  0xe4   : > { %v5986_v63 = vsel %vm1081_vm10, %v1091_v51, %v1092_v53  ;;  %v5989_v1 = vsel %vm920_vm9, %v1023_v54, %v1027_v56  ;;  %v5482_v51 = vld [vmem:[#allocation2 + $0x3c] sm:$0xe]  ;;  %v960_v53 = vshll.u32 %v5969_v32, 16 }
  0xe5   : > { %6962 = vst [vmem:[#allocation25_spill] sm:$0xff] %v5986_v63  ;;  %1901 = vmatmul.bf16.vlgmr.msra.gmra.mxu2 %v5986_v63  ;;  %v1035_v41 = vor.u32 %v1034_v26, %v1030_v24 }
  0xe6   : > { %1880 = vmatpush.bf16.msrb.mxu0 %v5937_v58  ;;  %v4885_v58 = vld [vmem:[#allocation7 + $0xd8] sm:$0xff]  ;;  %v962_v61 = vrot.slane %v960_v53, 1 }
  0xe7   : > { %1939 = vmatpush.bf16.msrb.mxu3 %v4887_v30  ;;  %v6016_v46 = vsel %vm920_vm9, %v1035_v41, %v1039_v42  ;;  %v5278_v41 = vld [vmem:[#allocation2 + $0x54] sm:$0xe] }
  0xe8   : > { %v963_v8 = vor.u32 %v962_v61, %v958_v60  ;;  %v5279_v42 = vor.u32 %v5278_v41, %v5929_v40  ;;  %v6065_v61 = vld [vmem:[#allocation2 + $0x48] sm:$0xff]  }
  0xe9   : > { %v996_v40 = vshll.u32 %v6065_v61, 16 }
  0xea   : > { %1881 = vmatpush.bf16.msrb.mxu0 %v5947_v7  ;;  %v5996_v7 = vld [vmem:[#allocation2 + $0x18] sm:$0xff]  }
  0xeb   : > { %1940 = vmatpush.bf16.msrb.mxu3 %v4886_v49  ;;  %v948_v17 = vshll.u32 %v5996_v7, 16  ;;  %v946_v30 = vshrl.u32 %v5996_v7, 16  ;;  %v5481_v49 = vld [vmem:[#allocation2 + $0x3c] sm:$0xf0] }
  0xec   : > { %v5483_v59 = vor.u32 %v5482_v51, %v5481_v49  ;;  %v1104_v51 = vrot.slane %v5932_v52, 1  ;;  %v994_v52 = vshrl.u32 %v6065_v61, 16 }
  0xed   : > { %1773 = vmatmul.bf16.gmra.mxu0 %v5942_v5  ;;  %v950_v33 = vrot.slane %v948_v17, 1  ;;  %v5094_v17 = vld [vmem:[#allocation2 + $0x48] sm:$0xe] }
  0xee   : > { %1882 = vmatpush.bf16.msrb.mxu0 %v5950_v18  ;;  %1867 = vmatmul.bf16.gmra.mxu3 %v5989_v1  ;;  %v904_v18 = vunpack.c.l.b16 %v810_v13  ;;  %v1097_v62 = vrot.slane %v5483_v59, 1  ;;  %v6037_v13 = vld [vmem:[#allocation2 + $0x30] sm:$0xff]  }
  0xef   : > { %1941 = vmatpush.bf16.msrb.mxu3 %v4885_v58  ;;  %1832 = vmatmul.bf16.gmra.mxu1 %v5992_v4  ;;  %v951_v43 = vor.u32 %v950_v33, %v946_v30  ;;  %v965_v58 = vshll.u32 %v5980_v47, 16  ;;  %v5093_v47 = vld [vmem:[#allocation2 + $0x48] sm:$0xf0]  ;;  %v970_v26 = vshrl.u32 %v6037_v13, 16 }
  0xf0   : > { %v914_v23 = vpack.c.b16 %v904_v18, %v904_v18  ;;  %v972_v18 = vshll.u32 %v6037_v13, 16  ;;  %v5095_v21 = vor.u32 %v5094_v17, %v5093_v47  ;;  %v1107_v17 = vrot.slane %v5961_v25, 1 }
  0xf1   : > { %v6019_v48 = vsel %vm920_vm9, %v951_v43, %v955_v44  ;;  %v1110_v25 = vrot.slane %v6002_v11, 1  ;;  %v4897_v11 = vld [vmem:[#allocation7 + $0x138] sm:$0xff] }
  0xf2   : > { %1883 = vmatpush.bf16.msrb.mxu0 %v4876_v27  ;;  %v1095_v27 = vrot.slane %v914_v23, 1  ;;  %v974_v29 = vrot.slane %v972_v18, 1  ;;  %v977_v30 = vshll.u32 %v914_v23, 16  ;;  %v1100_v33 = vrot.slane %v5095_v21, 1  ;;  %v5281_v21 = vld [vmem:[#allocation2 + $0x6c] sm:$0xe] }
  0xf3   : > { %1942 = vmatpush.bf16.msrb.mxu3 %v4884_v9  ;;  %v967_v9 = vrot.slane %v965_v58, 1 }
  0xf4   : > { %v6013_v45 = vsel %vm1081_vm10, %v1094_v38, %v1095_v27  ;;  %v979_v38 = vrot.slane %v977_v30, 1  ;;  %v6094_v30 = vld [vmem:[%s6906_s2] ss:$0 sm:$0xff] }
  0xf5   : > { %1906 = vmatmul.bf16.gmra.mxu2 %v6013_v45  ;;  %v6034_v12 = vsel %vm920_vm9, %v963_v8, %v967_v9 }
  0xf6   : > { %1884 = vmatpush.bf16.msrb.mxu0 %v5967_v31  ;;  %v6025_v31 = vld [vmem:[#allocation2 + $0x3c] sm:$0xff]  }
  0xf7   : > { %1943 = vmatpush.bf16.msrb.mxu3 %v4883_v20  ;;  %v906_v20 = vunpack.c.l.b16 %v812_v15  ;;  %v984_v23 = vshll.u32 %v6025_v31, 16  ;;  %v982_v43 = vshrl.u32 %v6025_v31, 16 }
  0xf9   : > { %v916_v24 = vpack.c.b16 %v906_v20, %v906_v20  ;;  %v986_v44 = vrot.slane %v984_v23, 1 }
  0xfa   : > { %1885 = vmatpush.bf16.msrb.mxu0 %v4874_v50  ;;  %v811_v50 = vld [vmem:[#allocation2 + $0x44] sm:$0x1] }
  0xfb   : > { %1944 = vmatpush.bf16.msrb.mxu3 %v4882_v35  ;;  %v905_v54 = vunpack.c.l.b16 %v811_v50  ;;  %v1101_v34 = vrot.slane %v916_v24, 1  ;;  %v975_v35 = vor.u32 %v974_v29, %v970_v26  ;;  %v1103_v50 = vrot.slane %v5279_v42, 1  ;;  %v4896_v42 = vld [vmem:[#allocation7 + $0x130] sm:$0xff] }
  0xfc   : > { %v987_v53 = vor.u32 %v986_v44, %v982_v43  ;;  %v1001_v58 = vshll.u32 %v916_v24, 16  ;;  %v5282_v24 = vor.u32 %v5281_v21, %v5973_v37  ;;  %v4895_v44 = vld [vmem:[#allocation7 + $0x128] sm:$0xff]  ;;  %v4904_v21 = vld [vmem:[#allocation7 + $0x170] sm:$0xff] }
  0xfd   : > { %1778 = vmatmul.bf16.gmra.mxu0 %v5996_v7  ;;  %v915_v56 = vpack.c.b16 %v905_v54, %v905_v54  ;;  %v6048_v27 = vsel %vm920_vm9, %v975_v35, %v979_v38  ;;  %v6059_v59 = vsel %vm1081_vm10, %v1103_v50, %v1104_v51  ;;  %v4913_v50 = vld [vmem:[#allocation7 + $0x1b8] sm:$0xff] }
  0xfe   : > { %1872 = vmatmul.bf16.gmra.mxu3 %v6016_v46  ;;  %v1003_v47 = vrot.slane %v1001_v58, 1  ;;  %v1109_v26 = vrot.slane %v5282_v24, 1  ;;  %1996 = vmatpush.bf16.msra.mxu0 %v4897_v11  ;;  %v5084_v58 = vld [vmem:[#allocation2] sm:$0xf0]  ;;  %v4911_v24 = vld [vmem:[#allocation7 + $0x1a8] sm:$0xff] }
  0xff   : > { %1837 = vmatmul.bf16.gmra.mxu1 %v6019_v48  ;;  %v1098_v2 = vrot.slane %v915_v56, 1  ;;  %v989_v49 = vshll.u32 %v915_v56, 16  ;;  %v998_v56 = vrot.slane %v996_v40, 1  ;;  %2114 = vmatpush.bf16.msrb.mxu2 %v4913_v50  ;;  %v4903_v11 = vld [vmem:[#allocation7 + $0x168] sm:$0xff] }
 0x100   : > { %v6086_v29 = vsel %vm1081_vm10, %v1109_v26, %v1110_v25  ;;  %v4919_v25 = vld [vmem:[#allocation7 + $0x1e8] sm:$0xff] }
 0x101   : > { %v6031_v10 = vsel %vm1081_vm10, %v1097_v62, %v1098_v2  ;;  %v991_v54 = vrot.slane %v989_v49, 1  ;;  %v5096_v62 = vld [vmem:[#allocation2 + $0x60] sm:$0xf0]  ;;  %v5097_v2 = vld [vmem:[#allocation2 + $0x60] sm:$0xe]  ;;  %v999_v9 = vor.u32 %v998_v56, %v994_v52  ;;  %v4912_v56 = vld [vmem:[#allocation7 + $0x1b0] sm:$0xff] }
 0x102   : > { %v5098_v8 = vor.u32 %v5097_v2, %v5096_v62  ;;  %1997 = vmatpush.bf16.msra.mxu0 %v4896_v42  ;;  %v4905_v52 = vld [vmem:[#allocation7 + $0x178] sm:$0xff]  ;;  %v4894_v2 = vld [vmem:[#allocation7 + $0x120] sm:$0xff] }
 0x103   : > { %v6062_v60 = vsel %vm920_vm9, %v987_v53, %v991_v54  ;;  %v6077_v20 = vsel %vm920_vm9, %v999_v9, %v1003_v47  ;;  %v4921_v54 = vld [vmem:[#allocation7 + $0x1f8] sm:$0xff]  ;;  %2055 = vmatpush.bf16.msrb.mxu1 %v4905_v52  ;;  %2115 = vmatpush.bf16.msrb.mxu2 %v4912_v56  ;;  %v4920_v9 = vld [vmem:[#allocation7 + $0x1f0] sm:$0xff]  ;;  %v4910_v42 = vld [vmem:[#allocation7 + $0x1a0] sm:$0xff] }
 0x104   : > { %v1106_v15 = vrot.slane %v5098_v8, 1  ;;  %2173 = vmatpush.bf16.msra.mxu3 %v4921_v54  ;;  %v5085_v62 = vld [vmem:[#allocation2] sm:$0xe] }
 0x105   : > { %1911 = vmatmul.bf16.gmra.mxu2 %v6031_v10  ;;  %v4909_v54 = vld [vmem:[#allocation7 + $0x198] sm:$0xff] }
 0x106   : > { %v6074_v18 = vsel %vm1081_vm10, %v1106_v15, %v1107_v17  ;;  %1998 = vmatpush.bf16.msra.mxu0 %v4895_v44  ;;  %v5086_v15 = vor.u32 %v5085_v62, %v5084_v58  ;;  %v5284_v58 = vld [vmem:[#allocation2 + $0xc] sm:$0xe] }
 0x107   : > { %2056 = vmatpush.bf16.msrb.mxu1 %v4904_v21  ;;  %2116 = vmatpush.bf16.msrb.mxu2 %v4911_v24  ;;  %v4908_v21 = vld [vmem:[#allocation7 + $0x190] sm:$0xff] }
 0x108   : > { %2174 = vmatpush.bf16.msra.mxu3 %v4920_v9 }
 0x10a   : > { %1999 = vmatpush.bf16.msra.mxu0 %v4894_v2  ;;  %v4917_v2 = vld [vmem:[#allocation7 + $0x1d8] sm:$0xff] }
 0x10b   : > { %2057 = vmatpush.bf16.msrb.mxu1 %v4903_v11  ;;  %2117 = vmatpush.bf16.msrb.mxu2 %v4910_v42  ;;  %v4900_v11 = vld [vmem:[#allocation7 + $0x150] sm:$0xff]  ;;  %v4907_v42 = vld [vmem:[#allocation7 + $0x188] sm:$0xff] }
 0x10c   : > { %2175 = vmatpush.bf16.msra.mxu3 %v4919_v25  ;;  %v4891_v25 = vld [vmem:[#allocation7 + $0x108] sm:$0xff] }
 0x10d   : > { %1783 = vmatmul.bf16.gmra.mxu0 %v5969_v32 }
 0x10e   : > { %1945 = vmatmul.bf16.vlgmr.msrb.gmra.mxu3 %v5942_v5  ;;  %v6045_v5 = vsel %vm1081_vm10, %v1100_v33, %v1101_v34 }
 0x10f   : > { %1842 = vmatmul.bf16.gmra.mxu1 %v6034_v12  ;;  %2118 = vmatpush.bf16.msrb.mxu2 %v4909_v54 }
 0x113   : > { %2119 = vmatpush.bf16.msrb.mxu2 %v4908_v21  ;;  %v4898_v21 = vld [vmem:[#allocation7 + $0x140] sm:$0xff] }
 0x115   : > { %1916 = vmatmul.bf16.gmra.mxu2 %v6045_v5 }
 0x117   : > { %2120 = vmatpush.bf16.msrb.mxu2 %v4907_v42  ;;  %v5087_v42 = vld [vmem:[#allocation2 + $0x18] sm:$0xf0] }
 0x11d   : > { %1788 = vmatmul.bf16.gmra.mxu0 %v6037_v13 }
 0x11e   : > { %1950 = vmatmul.bf16.gmra.mxu3 %v5996_v7 }
 0x11f   : > { %1847 = vmatmul.bf16.gmra.mxu1 %v6048_v27 }
 0x125   : > { %1921 = vmatmul.bf16.gmra.mxu2 %v6059_v59 }
 0x12d   : > { %1793 = vmatmul.bf16.gmra.mxu0 %v6025_v31 }
 0x12e   : > { %1955 = vmatmul.bf16.gmra.mxu3 %v5969_v32 }
 0x12f   : > { %1852 = vmatmul.bf16.gmra.mxu1 %v6062_v60 }
 0x135   : > { %1926 = vmatmul.bf16.gmra.mxu2 %v6074_v18 }
 0x13d   : > { %1798 = vmatmul.bf16.gmra.mxu0 %v6065_v61 }
 0x13e   : > { %1960 = vmatmul.bf16.gmra.mxu3 %v6037_v13 }
 0x13f   : > { %1857 = vmatmul.bf16.gmra.mxu1 %v6077_v20 }
 0x145   : > { %1931 = vmatmul.bf16.gmra.mxu2 %v6086_v29 }
 0x14d   : > { %1803 = vmatmul.bf16.gmra.mxu0 %v5927_v39 }
 0x14e   : > { %1965 = vmatmul.bf16.gmra.mxu3 %v6025_v31 }
 0x15a   : > { %v1769_v33 = vpop.f32.mrf.mxu0 }
 0x15b   : > { %v1770_v37 = vadd.f32 %v6094_v30, %v1769_v33  ;;  %v4893_v33 = vld [vmem:[#allocation7 + $0x118] sm:$0xff] }
 0x15c   : > { %v1828_v34 = vpop.f32.mrf.mxu1  ;;  %2000 = vmatpush.bf16.msra.mxu0 %v4893_v33  ;;  %v4916_v33 = vld [vmem:[#allocation7 + $0x1d0] sm:$0xff] }
 0x15d   : > { %v6097_v35 = vadd.f32 %v1828_v34, %v1770_v37  ;;  %1808 = vmatmul.bf16.gmra.mxu0 %v5957_v22  ;;  %v1082_v37 = vrot.slane %v5086_v15, 1  ;;  %v1083_v34 = vrot.slane %v5935_v57, 1  ;;  %v4892_v57 = vld [vmem:[#allocation7 + $0x110] sm:$0xff]  ;;  %v4901_v15 = vld [vmem:[#allocation7 + $0x158] sm:$0xff] }
 0x15e   : > { %1970 = vmatmul.bf16.gmra.mxu3 %v6065_v61 }
 0x160   : > { %2001 = vmatpush.bf16.msra.mxu0 %v4892_v57  ;;  %v4890_v57 = vld [vmem:[#allocation7 + $0x100] sm:$0xff] }
 0x161   : > { %v6101_v38 = vpop.f32.mrf.mxu3 }
 0x162   : > { %v6103_v41 = vpop.f32.mrf.mxu0 }
 0x164   : > { %v6105_v23 = vpop.f32.mrf.mxu1  ;;  %2002 = vmatpush.bf16.msra.mxu0 %v4891_v25 }
 0x168   : > { %v6118_v17 = vpop.f32.mrf.mxu2  ;;  %2003 = vmatpush.bf16.msra.mxu0 %v4890_v57 }
 0x169   : > { %v6107_v43 = vpop.f32.mrf.mxu3 }
 0x16a   : > { %v1774_v49 = vpop.f32.mrf.mxu0 }
 0x16b   : > { %v1775_v51 = vadd.f32 %v6094_v30, %v1774_v49  ;;  %v4918_v49 = vld [vmem:[#allocation7 + $0x1e0] sm:$0xff] }
 0x16c   : > { %v1833_v53 = vpop.f32.mrf.mxu1  ;;  %2176 = vmatpush.bf16.msra.mxu3 %v4918_v49 }
 0x16d   : > { %v6110_v40 = vadd.f32 %v1833_v53, %v1775_v51  ;;  %1813 = vmatmul.bf16.gmra.mxu0 %v5971_v36  ;;  %v1084_v51 = vsel %vm1081_vm10, %v1082_v37, %v1083_v34  ;;  %v4902_v53 = vld [vmem:[#allocation7 + $0x160] sm:$0xff]  ;;  %v5285_v34 = vor.u32 %v5284_v58, %v5944_v6 }
 0x16e   : > { %1975 = vmatmul.bf16.gmra.mxu3 %v5927_v39  ;;  %2058 = vmatpush.bf16.msrb.mxu1 %v4902_v53  ;;  %v1086_v53 = vrot.slane %v5964_v28, 1  ;;  %v4914_v6 = vld [vmem:[#allocation7 + $0x1c0] sm:$0xff] }
 0x170   : > { %v6127_v62 = vpop.f32.mrf.mxu2  ;;  %2177 = vmatpush.bf16.msra.mxu3 %v4917_v2 }
 0x171   : > { %v6114_v8 = vpop.f32.mrf.mxu3 }
 0x172   : > { %v6116_v47 = vpop.f32.mrf.mxu0  ;;  %2059 = vmatpush.bf16.msrb.mxu1 %v4901_v15 }
 0x174   : > { %v6120_v26 = vpop.f32.mrf.mxu1  ;;  %2178 = vmatpush.bf16.msra.mxu3 %v4916_v33 }
 0x176   : > { %2060 = vmatpush.bf16.msrb.mxu1 %v4900_v11 }
 0x178   : > { %v1907_v54 = vpop.f32.mrf.mxu2 }
 0x179   : > { %v6123_v44 = vpop.f32.mrf.mxu3 }
 0x17a   : > { %v1779_v50 = vpop.f32.mrf.mxu0 }
 0x17b   : > { %v1780_v52 = vadd.f32 %v6094_v30, %v1779_v50  ;;  %v4915_v50 = vld [vmem:[#allocation7 + $0x1c8] sm:$0xff] }
 0x17c   : > { %v1838_v56 = vpop.f32.mrf.mxu1  ;;  %2179 = vmatpush.bf16.msra.mxu3 %v4915_v50  ;;  %v5088_v50 = vld [vmem:[#allocation2 + $0x18] sm:$0xe] }
 0x17d   : > { %v6129_v9 = vadd.f32 %v1838_v56, %v1780_v52  ;;  %1886 = vmatmul.bf16.vlgmr.msrb.gmra.mxu0 %v1084_v51  ;;  %v1085_v51 = vrot.slane %v5285_v34, 1  ;;  %v4899_v52 = vld [vmem:[#allocation7 + $0x148] sm:$0xff]  ;;  %v4906_v56 = vld [vmem:[#allocation7 + $0x180] sm:$0xff]  ;;  %v4929_v34 = vld [vmem:[#allocation7 + $0x238] sm:$0xff] }
 0x17e   : > { %1980 = vmatmul.bf16.gmra.mxu3 %v5957_v22  ;;  %2061 = vmatpush.bf16.msrb.mxu1 %v4899_v52 }
 0x17f   : > { %2121 = vmatpush.bf16.msrb.mxu2 %v4906_v56  ;;  %v1087_v15 = vsel %vm1081_vm10, %v1085_v51, %v1086_v53  ;;  %2232 = vmatpush.bf16.msrb.mxu0 %v4929_v34  ;;  %v5089_v56 = vor.u32 %v5088_v50, %v5087_v42  ;;  %v4928_v50 = vld [vmem:[#allocation7 + $0x230] sm:$0xff] }
 0x180   : > { %2180 = vmatpush.bf16.msra.mxu3 %v4914_v6  ;;  %v6149_v53 = vpop.f32.mrf.mxu2  ;;  %v1089_v6 = vrot.slane %v6004_v16, 1 }
 0x181   : > { %v6132_v24 = vpop.f32.mrf.mxu3 }
 0x182   : > { %v6134_v37 = vpop.f32.mrf.mxu0  ;;  %2122 = vmatmul.bf16.vlgmr.msrb.gmra.mxu2 %v5996_v7  ;;  %2062 = vmatpush.bf16.msrb.mxu1 %v4898_v21  ;;  %v1088_v7 = vrot.slane %v5089_v56, 1 }
 0x183   : > { %2233 = vmatpush.bf16.msrb.mxu0 %v4928_v50 }
 0x184   : > { %v6137_v49 = vpop.f32.mrf.mxu1 }
 0x185   : > { %2063 = vmatmul.bf16.vlgmr.msrb.gmra.mxu1 %v1087_v15 }
 0x189   : > { %v6140_v2 = vpop.f32.mrf.mxu3 }
 0x18a   : > { %v1784_v58 = vpop.f32.mrf.mxu0 }
 0x18b   : > { %v1785_v25 = vadd.f32 %v6094_v30, %v1784_v58 }
 0x18c   : > { %v1843_v33 = vpop.f32.mrf.mxu1 }
 0x18d   : > { %v1844_v28 = vadd.f32 %v1843_v33, %v1785_v25  ;;  %1891 = vmatmul.bf16.gmra.mxu0 %v1087_v15  ;;  %v6155_v25 = vsel %vm1081_vm10, %v1088_v7, %v1089_v6  ;;  %v1912_v33 = vpop.f32.mrf.mxu2 }
 0x18e   : > { %1985 = vmatmul.bf16.gmra.mxu3 %v5971_v36  ;;  %6963 = vst [vmem:[#allocation26_spill] sm:$0xff] %v6155_v25 }
 0x18f   : > { %v1903_v11 = vadd.f32 %v6118_v17, %v1844_v28  ;;  %v6157_v17 = vld [vmem:[#allocation2 + $0x78] sm:$0xff]  }
 0x191   : > { %v6147_v51 = vpop.f32.mrf.mxu3 }
 0x192   : > { %v1786_v52 = vpop.f32.mrf.mxu0  ;;  %2127 = vmatmul.bf16.gmra.mxu2 %v5969_v32 }
 0x194   : > { %v1845_v57 = vpop.f32.mrf.mxu1 }
 0x195   : > { %2068 = vmatmul.bf16.gmra.mxu1 %v6155_v25  ;;  %v6166_v6 = vpop.f32.mrf.mxu2 }
 0x199   : > { %v6152_v58 = vpop.f32.mrf.mxu3 }
 0x19a   : > { %v1789_v21 = vpop.f32.mrf.mxu0 }
 0x19b   : > { %v1790_v15 = vadd.f32 %v6094_v30, %v1789_v21 }
 0x19c   : > { %v1848_v28 = vpop.f32.mrf.mxu1 }
 0x19d   : > { %v1849_v34 = vadd.f32 %v1848_v28, %v1790_v15  ;;  %1896 = vmatmul.bf16.gmra.mxu0 %v6155_v25  ;;  %v4927_v25 = vld [vmem:[#allocation7 + $0x228] sm:$0xff] }
 0x19e   : > { %1990 = vmatmul.bf16.gmra.mxu3 %v6157_v17  ;;  %2234 = vmatpush.bf16.msrb.mxu0 %v4927_v25 }
 0x19f   : > { %v1908_v16 = vadd.f32 %v1907_v54, %v1849_v34  ;;  %v1917_v54 = vpop.f32.mrf.mxu2 }
 0x1a1   : > { %v6164_v42 = vpop.f32.mrf.mxu3 }
 0x1a2   : > { %v1791_v56 = vpop.f32.mrf.mxu0  ;;  %2132 = vmatmul.bf16.gmra.mxu2 %v6037_v13 }
 0x1a4   : > { %v1850_v7 = vpop.f32.mrf.mxu1 }
 0x1a5   : > { %2073 = vmatmul.bf16.gmra.mxu1 %v5986_v63 }
 0x1a7   : > { %v6180_v13 = vpop.f32.mrf.mxu2 }
 0x1a9   : > { %v6168_v21 = vpop.f32.mrf.mxu3 }
 0x1aa   : > { %6964 = vst [vmem:[#allocation27_spill] sm:$0xff] %v6168_v21  ;;  %v1794_v3 = vpop.f32.mrf.mxu0 }
 0x1ab   : > { %v1795_v32 = vadd.f32 %v6094_v30, %v1794_v3 }
 0x1ac   : > { %v1853_v15 = vpop.f32.mrf.mxu1 }
 0x1ad   : > { %v1854_v28 = vadd.f32 %v1853_v15, %v1795_v32  ;;  %2004 = vmatmul.bf16.vlgmr.msra.gmra.mxu0 %v5992_v4 }
 0x1ae   : > { %2181 = vmatmul.bf16.vlgmr.msra.gmra.mxu3 %v6019_v48 }
 0x1af   : > { %v1913_v34 = vadd.f32 %v1912_v33, %v1854_v28  ;;  %v1922_v63 = vpop.f32.mrf.mxu2 }
 0x1b1   : > { %v6175_v50 = vpop.f32.mrf.mxu3 }
 0x1b2   : > { %6965 = vst [vmem:[#allocation28_spill] sm:$0xff] %v6175_v50  ;;  %v1796_v55 = vpop.f32.mrf.mxu0  ;;  %2137 = vmatmul.bf16.gmra.mxu2 %v6025_v31 }
 0x1b3   : > { %v1797_v14 = vadd.f32 %v6094_v30, %v1796_v55  ;;  %v1787_v55 = vadd.f32 %v6094_v30, %v1786_v52 }
 0x1b4   : > { %v1855_v0 = vpop.f32.mrf.mxu1 }
 0x1b5   : > { %v1856_v3 = vadd.f32 %v1855_v0, %v1797_v14  ;;  %2078 = vmatmul.bf16.gmra.mxu1 %v6013_v45 }
 0x1b7   : > { %v6195_v52 = vpop.f32.mrf.mxu2 }
 0x1b9   : > { %v6178_v21 = vpop.f32.mrf.mxu3 }
 0x1ba   : > { %6966 = vst [vmem:[#allocation29_spill] sm:$0xff] %v6178_v21  ;;  %v1799_v4 = vpop.f32.mrf.mxu0  ;;  %v1846_v21 = vadd.f32 %v1845_v57, %v1787_v55 }
 0x1bb   : > { %v1800_v32 = vadd.f32 %v6094_v30, %v1799_v4 }
 0x1bc   : > { %v1858_v15 = vpop.f32.mrf.mxu1  ;;  %v1905_v4 = vadd.f32 %v6127_v62, %v1846_v21  ;;  %v1792_v62 = vadd.f32 %v6094_v30, %v1791_v56 }
 0x1bd   : > { %v1859_v33 = vadd.f32 %v1858_v15, %v1800_v32  ;;  %2009 = vmatmul.bf16.gmra.mxu0 %v6019_v48  ;;  %v4926_v32 = vld [vmem:[#allocation7 + $0x220] sm:$0xff] }
 0x1be   : > { %2186 = vmatmul.bf16.gmra.mxu3 %v6034_v12  ;;  %2235 = vmatpush.bf16.msrb.mxu0 %v4926_v32 }
 0x1bf   : > { %v1918_v28 = vadd.f32 %v1917_v54, %v1859_v33  ;;  %v1851_v33 = vadd.f32 %v1850_v7, %v1792_v62 }
 0x1c1   : > { %v1961_v0 = vpop.f32.mrf.mxu3  ;;  %v1910_v55 = vadd.f32 %v6149_v53, %v1851_v33 }
 0x1c2   : > { %v6188_v14 = vadd.f32 %v1961_v0, %v1903_v11  ;;  %v1801_v25 = vpop.f32.mrf.mxu0  ;;  %2142 = vmatmul.bf16.gmra.mxu2 %v6065_v61  ;;  %v1927_v61 = vpop.f32.mrf.mxu2 }
 0x1c5   : > { %2083 = vmatmul.bf16.gmra.mxu1 %v6031_v10 }
 0x1c9   : > { %v1963_v50 = vpop.f32.mrf.mxu3 }
 0x1ca   : > { %v6191_v31 = vadd.f32 %v1963_v50, %v1905_v4  ;;  %v1804_v48 = vpop.f32.mrf.mxu0  ;;  %v1929_v7 = vpop.f32.mrf.mxu2 }
 0x1cb   : > { %v1805_v15 = vadd.f32 %v6094_v30, %v1804_v48 }
 0x1cd   : > { %2014 = vmatmul.bf16.gmra.mxu0 %v6034_v12  ;;  %v1864_v11 = vadd.f32 %v6101_v38, %v1805_v15 }
 0x1ce   : > { %2191 = vmatmul.bf16.gmra.mxu3 %v6048_v27 }
 0x1cf   : > { %v6201_v57 = vadd.f32 %v1922_v63, %v1864_v11 }
 0x1d1   : > { %v1966_v21 = vpop.f32.mrf.mxu3 }
 0x1d2   : > { %v6204_v54 = vadd.f32 %v1966_v21, %v1908_v16  ;;  %v1806_v50 = vpop.f32.mrf.mxu0  ;;  %2147 = vmatmul.bf16.gmra.mxu2 %v5927_v39  ;;  %v4925_v16 = vld [vmem:[#allocation7 + $0x218] sm:$0xff]  ;;  %v1932_v33 = vpop.f32.mrf.mxu2 }
 0x1d3   : > { %2236 = vmatpush.bf16.msrb.mxu0 %v4925_v16 }
 0x1d5   : > { %2088 = vmatmul.bf16.gmra.mxu1 %v6045_v5 }
 0x1d9   : > { %v1968_v0 = vpop.f32.mrf.mxu3 }
 0x1da   : > { %v6207_v12 = vadd.f32 %v1968_v0, %v1910_v55  ;;  %v1809_v4 = vpop.f32.mrf.mxu0 }
 0x1db   : > { %v1810_v38 = vadd.f32 %v6094_v30, %v1809_v4  ;;  %v4924_v4 = vld [vmem:[#allocation7 + $0x210] sm:$0xff] }
 0x1dc   : > { %2237 = vmatpush.bf16.msrb.mxu0 %v4924_v4 }
 0x1dd   : > { %2019 = vmatmul.bf16.gmra.mxu0 %v6048_v27  ;;  %v1869_v63 = vadd.f32 %v6114_v8, %v1810_v38  ;;  %v1915_v27 = vadd.f32 %v6166_v6, %v1856_v3  ;;  %v1860_v3 = vpop.f32.mrf.mxu1 }
 0x1de   : > { %2196 = vmatmul.bf16.gmra.mxu3 %v6062_v60 }
 0x1df   : > { %v6214_v56 = vadd.f32 %v1927_v61, %v1869_v63 }
 0x1e1   : > { %v1971_v53 = vpop.f32.mrf.mxu3 }
 0x1e2   : > { %v6217_v32 = vadd.f32 %v1971_v53, %v1913_v34  ;;  %v1811_v48 = vpop.f32.mrf.mxu0  ;;  %2152 = vmatmul.bf16.gmra.mxu2 %v5957_v22 }
 0x1e3   : > { %v1812_v15 = vadd.f32 %v6094_v30, %v1811_v48 }
 0x1e5   : > { %v1871_v39 = vadd.f32 %v6123_v44, %v1812_v15  ;;  %v1802_v44 = vadd.f32 %v6094_v30, %v1801_v25  ;;  %2093 = vmatmul.bf16.gmra.mxu1 %v6059_v59  ;;  %v1772_v15 = vadd.f32 %v6094_v30, %v6103_v41  ;;  %v4923_v41 = vld [vmem:[#allocation7 + $0x208] sm:$0xff] }
 0x1e6   : > { %2238 = vmatpush.bf16.msrb.mxu0 %v4923_v41 }
 0x1e7   : > { %v6222_v11 = vadd.f32 %v1929_v7, %v1871_v39  ;;  %v1861_v63 = vadd.f32 %v1860_v3, %v1802_v44  ;;  %v1831_v39 = vadd.f32 %v6105_v23, %v1772_v15  ;;  %v1777_v23 = vadd.f32 %v6094_v30, %v6116_v47  ;;  %v6277_v44 = vld [vmem:[#allocation2 + $0x84] sm:$0xf0] }
 0x1e9   : > { %v1973_v8 = vpop.f32.mrf.mxu3 }
 0x1ea   : > { %v6224_v62 = vadd.f32 %v1973_v8, %v1915_v27  ;;  %v1814_v21 = vpop.f32.mrf.mxu0 }
 0x1eb   : > { %v1815_v61 = vadd.f32 %v6094_v30, %v1814_v21 }
 0x1ed   : > { %2024 = vmatmul.bf16.gmra.mxu0 %v6062_v60  ;;  %v1874_v34 = vadd.f32 %v6132_v24, %v1815_v61  ;;  %v1934_v60 = vpop.f32.mrf.mxu2  ;;  %v1920_v24 = vadd.f32 %v6180_v13, %v1861_v63  ;;  %v5099_v63 = vld [vmem:[#allocation2 + $0x78] sm:$0xf0] }
 0x1ee   : > { %2201 = vmatmul.bf16.gmra.mxu3 %v6077_v20 }
 0x1ef   : > { %v6232_v6 = vadd.f32 %v1932_v33, %v1874_v34 }
 0x1f1   : > { %v1976_v55 = vpop.f32.mrf.mxu3 }
 0x1f2   : > { %v6235_v0 = vadd.f32 %v1976_v55, %v1918_v28  ;;  %v1816_v38 = vpop.f32.mrf.mxu0  ;;  %2157 = vmatmul.bf16.gmra.mxu2 %v5971_v36  ;;  %v816_v55 = vld [vmem:[#allocation2 + $0x80] sm:$0x1] }
 0x1f3   : > { %v1817_v22 = vadd.f32 %v6094_v30, %v1816_v38  ;;  %v1129_v4 = vunpack.c.l.b16 %v816_v55  ;;  %v4922_v38 = vld [vmem:[#allocation7 + $0x200] sm:$0xff] }
 0x1f4   : > { %2239 = vmatpush.bf16.msrb.mxu0 %v4922_v38 }
 0x1f5   : > { %v1876_v16 = vadd.f32 %v6140_v2, %v1817_v22  ;;  %v1807_v2 = vadd.f32 %v6094_v30, %v1806_v50  ;;  %2098 = vmatmul.bf16.gmra.mxu1 %v6074_v18  ;;  %v5100_v22 = vld [vmem:[#allocation2 + $0x78] sm:$0xe] }
 0x1f7   : > { %v6240_v25 = vadd.f32 %v1934_v60, %v1876_v16  ;;  %v1866_v36 = vadd.f32 %v6107_v43, %v1807_v2  ;;  %v1130_v16 = vpack.c.b16 %v1129_v4, %v1129_v4 }
 0x1f9   : > { %v1978_v53 = vpop.f32.mrf.mxu3 }
 0x1fa   : > { %v6242_v7 = vadd.f32 %v1978_v53, %v1920_v24  ;;  %v1887_v48 = vpop.f32.mrf.mxu0  ;;  %v1148_v53 = vrot.slane %v1130_v16, 1 }
 0x1fb   : > { %v6245_v28 = vadd.f32 %v1887_v48, %v6097_v35  ;;  %v1782_v48 = vadd.f32 %v6094_v30, %v6134_v37 }
 0x1fd   : > { %2029 = vmatmul.bf16.gmra.mxu0 %v6077_v20  ;;  %v1925_v20 = vadd.f32 %v6195_v52, %v1866_v36  ;;  %v1836_v52 = vadd.f32 %v6120_v26, %v1777_v23  ;;  %v5101_v26 = vor.u32 %v5100_v22, %v5099_v63  ;;  %v1947_v23 = vadd.f32 %v6147_v51, %v6245_v28 }
 0x1fe   : > { %2206 = vmatmul.bf16.gmra.mxu3 %v5953_v19 }
 0x1ff   : > { %v1147_v24 = vrot.slane %v5101_v26, 1 }
 0x201   : > { %v1981_v13 = vpop.f32.mrf.mxu3  ;;  %v6289_v15 = vsel %vm1081_vm10, %v1147_v24, %v1148_v53  ;;  %v6968_v24 = vld [vmem:[#allocation28_spill] sm:$0xff] }
 0x202   : > { %v6256_v27 = vadd.f32 %v1981_v13, %v6201_v57  ;;  %v1889_v35 = vpop.f32.mrf.mxu0  ;;  %2162 = vmatmul.bf16.gmra.mxu2 %v6157_v17 }
 0x203   : > { %v6259_v8 = vadd.f32 %v1889_v35, %v1831_v39  ;;  %v1132_v39 = vshrl.u32 %v6157_v17, 16 }
 0x205   : > { %2103 = vmatmul.bf16.gmra.mxu1 %v6086_v29  ;;  %v1949_v55 = vadd.f32 %v6152_v58, %v6259_v8  ;;  %v6967_v58 = vld [vmem:[#allocation27_spill] sm:$0xff] }
 0x209   : > { %v1983_v21 = vpop.f32.mrf.mxu3 }
 0x20a   : > { %v6262_v33 = vadd.f32 %v1983_v21, %v1925_v20  ;;  %v1892_v50 = vpop.f32.mrf.mxu0  ;;  %v817_v20 = vld [vmem:[#allocation2 + $0x8c] sm:$0x1] }
 0x20b   : > { %v6265_v61 = vadd.f32 %v1892_v50, %v6110_v40  ;;  %v804_v40 = vld [vmem:[#allocation2 + $0x84] sm:$0xff]  }
 0x20c   : > { %v1161_v4 = vshrl.u32 %v804_v40, 16 }
 0x20d   : > { %2034 = vmatmul.bf16.gmra.mxu0 %v5953_v19  ;;  %v1952_v22 = vadd.f32 %v6164_v42, %v6265_v61  ;;  %v6970_v42 = vld [vmem:[#allocation29_spill] sm:$0xff] }
 0x20e   : > { %2211 = vmatmul.bf16.gmra.mxu3 %v5989_v1 }
 0x211   : > { %v1986_v43 = vpop.f32.mrf.mxu3 }
 0x212   : > { %v6275_v57 = vadd.f32 %v1986_v43, %v6214_v56  ;;  %v1894_v34 = vpop.f32.mrf.mxu0  ;;  %2167 = vmatmul.bf16.gmra.mxu2 %v804_v40  ;;  %v1158_v43 = vunpack.c.l.b16 %v817_v20 }
 0x213   : > { %v1895_v3 = vadd.f32 %v1894_v34, %v1836_v52 }
 0x214   : > { %v6306_v34 = vpack.c.b16 %v1158_v43, %v1158_v43 }
 0x215   : > { %2108 = vmatmul.bf16.gmra.mxu1 %v6289_v15  ;;  %v1954_v8 = vadd.f32 %v6967_v58, %v1895_v3  ;;  %v6971_v3 = vld [vmem:[#allocation25_spill] sm:$0xff] }
 0x216   : > { %v1168_v51 = vshll.u32 %v6306_v34, 16 }
 0x218   : > { %v1170_v63 = vrot.slane %v1168_v51, 1  ;;  %v2311_v51 = vld [vmem:[#allocation3] sm:$0x1] }
 0x219   : > { %v1988_v47 = vpop.f32.mrf.mxu3 }
 0x21a   : > { %v6280_v19 = vadd.f32 %v1988_v47, %v6222_v11  ;;  %v1897_v60 = vpop.f32.mrf.mxu0  ;;  %v1134_v11 = vshll.u32 %v6157_v17, 16  ;;  %v1163_v17 = vshll.u32 %v804_v40, 16 }
 0x21b   : > { %v1898_v56 = vadd.f32 %v1897_v60, %v6129_v9  ;;  %v1841_v9 = vadd.f32 %v6137_v49, %v1782_v48 }
 0x21c   : > { %v1136_v30 = vrot.slane %v1134_v11, 1  ;;  %v1165_v47 = vrot.slane %v1163_v17, 1 }
 0x21d   : > { %2039 = vmatmul.bf16.gmra.mxu0 %v5989_v1  ;;  %v1139_v1 = vshll.u32 %v1130_v16, 16  ;;  %v1957_v53 = vadd.f32 %v6968_v24, %v1898_v56 }
 0x21e   : > { %2216 = vmatmul.bf16.gmra.mxu3 %v6016_v46  ;;  %v1137_v36 = vor.u32 %v1136_v30, %v1132_v39  ;;  %v1166_v38 = vor.u32 %v1165_v47, %v1161_v4 }
 0x21f   : > { %v1141_v41 = vrot.slane %v1139_v1, 1 }
 0x220   : > { %v1171_v60 = vsel %vm920_vm9, %v1166_v38, %v1170_v63  ;;  %v2312_v38 = vsel %vm5729_vm2, 0, %v2311_v51 }
 0x221   : > { %v1991_v2 = vpop.f32.mrf.mxu3  ;;  %2313 = vst [vmem:[#allocation3] sm:$0x1] %v2312_v38 }
 0x222   : > { %v6294_v13 = vadd.f32 %v1991_v2, %v6232_v6  ;;  %v1899_v37 = vpop.f32.mrf.mxu0  ;;  %v1142_v6 = vsel %vm920_vm9, %v1137_v36, %v1141_v41  ;;  %v6969_v2 = vld [vmem:[#allocation26_spill] sm:$0xff] }
 0x223   : > { %v1900_v35 = vadd.f32 %v1899_v37, %v1841_v9 }
 0x225   : > { %v1959_v61 = vadd.f32 %v6970_v42, %v1900_v35 }
 0x229   : > { %v1993_v21 = vpop.f32.mrf.mxu3 }
 0x22a   : > { %v6298_v50 = vadd.f32 %v1993_v21, %v6240_v25  ;;  %v2005_v49 = vpop.f32.mrf.mxu0 }
 0x22b   : > { %v6303_v52 = vadd.f32 %v2005_v49, %v1947_v23 }
 0x22d   : > { %2044 = vmatmul.bf16.gmra.mxu0 %v6016_v46 }
 0x22e   : > { %2221 = vmatmul.bf16.gmra.mxu3 %v1142_v6 }
 0x232   : > { %v2007_v25 = vpop.f32.mrf.mxu0 }
 0x233   : > { %v6311_v28 = vadd.f32 %v2007_v25, %v1949_v55 }
 0x23a   : > { %v2010_v46 = vpop.f32.mrf.mxu0 }
 0x23b   : > { %v6316_v16 = vadd.f32 %v2010_v46, %v1952_v22 }
 0x23d   : > { %2049 = vmatmul.bf16.gmra.mxu0 %v1142_v6  ;;  %v2064_v6 = vpop.f32.mrf.mxu1 }
 0x23e   : > { %2226 = vmatmul.bf16.gmra.mxu3 %v1171_v60  ;;  %v2341_v60 = vld [vmem:[#allocation3 + $0x8] sm:$0x1] }
 0x242   : > { %v2012_v40 = vpop.f32.mrf.mxu0 }
 0x243   : > { %v6319_v26 = vadd.f32 %v2012_v40, %v1954_v8  ;;  %v2342_v8 = vsel %vm5747_vm4, 0, %v2341_v60  ;;  %v2591_v60 = vld [vmem:[#allocation3] sm:$0xf] }
 0x244   : > { %2343 = vst [vmem:[#allocation3 + $0x8] sm:$0x1] %v2342_v8 }
 0x24a   : > { %v2015_v48 = vpop.f32.mrf.mxu0 }
 0x24b   : > { %v6322_v11 = vadd.f32 %v2015_v48, %v1957_v53  ;;  %v2314_v53 = vld [vmem:[#allocation3 + $0xc] sm:$0x1] }
 0x24c   : > { %v2315_v48 = vsel %vm5729_vm2, 0, %v2314_v53 }
 0x24d   : > { %2240 = vmatmul.bf16.vlgmr.msrb.gmra.mxu0 %v6969_v2  ;;  %2316 = vst [vmem:[#allocation3 + $0xc] sm:$0x1] %v2315_v48  ;;  %v2065_v2 = vadd.f32 %v2064_v6, %v6303_v52  ;;  %v2317_v6 = vld [vmem:[#allocation3 + $0x18] sm:$0x1] }
 0x252   : > { %v2017_v9 = vpop.f32.mrf.mxu0 }
 0x253   : > { %v6326_v39 = vadd.f32 %v2017_v9, %v1959_v61 }
 0x25a   : > { %v2020_v30 = vpop.f32.mrf.mxu0 }
 0x25b   : > { %v6329_v37 = vadd.f32 %v2020_v30, %v6188_v14  ;;  %v2344_v30 = vld [vmem:[#allocation3 + $0x14] sm:$0x1] }
 0x25d   : > { %2245 = vmatmul.bf16.gmra.mxu0 %v6971_v3 }
 0x262   : > { %v2022_v1 = vpop.f32.mrf.mxu0 }
 0x263   : > { %v6333_v36 = vadd.f32 %v2022_v1, %v6191_v31 }
 0x26a   : > { %v2025_v56 = vpop.f32.mrf.mxu0 }
 0x26b   : > { %v6336_v41 = vadd.f32 %v2025_v56, %v6204_v54 }
 0x26d   : > { %2250 = vmatmul.bf16.gmra.mxu0 %v6013_v45 }
 0x272   : > { %v2027_v35 = vpop.f32.mrf.mxu0 }
 0x273   : > { %v6340_v20 = vadd.f32 %v2027_v35, %v6207_v12 }
 0x27a   : > { %v2030_v21 = vpop.f32.mrf.mxu0 }
 0x27b   : > { %v6343_v14 = vadd.f32 %v2030_v21, %v6217_v32  ;;  %v2123_v32 = vpop.f32.mrf.mxu2 }
 0x27d   : > { %2255 = vmatmul.bf16.gmra.mxu0 %v6031_v10  ;;  %v2182_v10 = vpop.f32.mrf.mxu3 }
 0x282   : > { %v2032_v23 = vpop.f32.mrf.mxu0 }
 0x283   : > { %v6347_v31 = vadd.f32 %v2032_v23, %v6224_v62  ;;  %v2066_v62 = vpop.f32.mrf.mxu1  ;;  %v2125_v25 = vpop.f32.mrf.mxu2  ;;  %v5287_v23 = vld [vmem:[#allocation2 + $0x84] sm:$0xe] }
 0x284   : > { %v2067_v56 = vadd.f32 %v2066_v62, %v6311_v28 }
 0x28a   : > { %v2035_v49 = vpop.f32.mrf.mxu0 }
 0x28b   : > { %v6350_v54 = vadd.f32 %v2035_v49, %v6235_v0  ;;  %v2069_v47 = vpop.f32.mrf.mxu1  ;;  %v2126_v49 = vadd.f32 %v2125_v25, %v2067_v56  ;;  %v5288_v25 = vor.u32 %v5287_v23, %v6277_v44 }
 0x28c   : > { %v2070_v28 = vadd.f32 %v2069_v47, %v6316_v16 }
 0x28d   : > { %2260 = vmatmul.bf16.gmra.mxu0 %v6045_v5  ;;  %v2184_v5 = vpop.f32.mrf.mxu3  ;;  %v1176_v48 = vrot.slane %v5288_v25, 1 }
 0x292   : > { %v2037_v45 = vpop.f32.mrf.mxu0 }
 0x293   : > { %v6354_v12 = vadd.f32 %v2037_v45, %v6242_v7  ;;  %v2071_v46 = vpop.f32.mrf.mxu1 }
 0x29a   : > { %v2040_v43 = vpop.f32.mrf.mxu0 }
 0x29b   : > { %v6357_v17 = vadd.f32 %v2040_v43, %v6256_v27 }
 0x29d   : > { %2265 = vmatmul.bf16.gmra.mxu0 %v6059_v59  ;;  %v2128_v59 = vpop.f32.mrf.mxu2 }
 0x29e   : > { %v2129_v8 = vadd.f32 %v2128_v59, %v2070_v28 }
 0x2a2   : > { %v2042_v55 = vpop.f32.mrf.mxu0 }
 0x2a3   : > { %v6361_v0 = vadd.f32 %v2042_v55, %v6262_v33  ;;  %v2187_v33 = vpop.f32.mrf.mxu3 }
 0x2aa   : > { %v2045_v4 = vpop.f32.mrf.mxu0 }
 0x2ab   : > { %v6364_v7 = vadd.f32 %v2045_v4, %v6275_v57  ;;  %v6374_v57 = vpop.f32.mrf.mxu2  ;;  %v6380_v24 = vpop.f32.mrf.mxu3 }
 0x2ad   : > { %2270 = vmatmul.bf16.gmra.mxu0 %v6074_v18 }
 0x2b2   : > { %v2047_v63 = vpop.f32.mrf.mxu0 }
 0x2b3   : > { %v6370_v22 = vadd.f32 %v2047_v63, %v6280_v19  ;;  %v6382_v19 = vpop.f32.mrf.mxu1  ;;  %v6387_v61 = vpop.f32.mrf.mxu2 }
 0x2b4   : > { %v6394_v3 = vpop.f32.mrf.mxu3 }
 0x2ba   : > { %v2050_v18 = vpop.f32.mrf.mxu0 }
 0x2bb   : > { %v6377_v40 = vadd.f32 %v2050_v18, %v6294_v13  ;;  %v2124_v13 = vadd.f32 %v2123_v32, %v2065_v2  ;;  %v6397_v35 = vpop.f32.mrf.mxu1  ;;  %v6399_v45 = vpop.f32.mrf.mxu2  ;;  %v2318_v32 = vsel %vm5729_vm2, 0, %v2317_v6  ;;  %v2347_v2 = vld [vmem:[#allocation3 + $0x20] sm:$0x1] }
 0x2bc   : > { %2319 = vst [vmem:[#allocation3 + $0x18] sm:$0x1] %v2318_v32  ;;  %v6405_v55 = vpop.f32.mrf.mxu3  ;;  %v2348_v44 = vsel %vm5747_vm4, 0, %v2347_v2 }
 0x2bd   : > { %2275 = vmatmul.bf16.gmra.mxu0 %v6086_v29  ;;  %v2345_v29 = vsel %vm5747_vm4, 0, %v2344_v30  ;;  %v2183_v1 = vadd.f32 %v2182_v10, %v2124_v13  ;;  %v2185_v10 = vadd.f32 %v2184_v5, %v2126_v49  ;;  %v1177_v5 = vrot.slane %v6306_v34, 1  ;;  %2349 = vst [vmem:[#allocation3 + $0x20] sm:$0x1] %v2348_v44 }
 0x2be   : > { %2346 = vst [vmem:[#allocation3 + $0x14] sm:$0x1] %v2345_v29  ;;  %v2072_v30 = vadd.f32 %v2071_v46, %v6319_v26  ;;  %v2188_v29 = vadd.f32 %v2187_v33, %v2129_v8  ;;  %v2320_v33 = vld [vmem:[#allocation3 + $0x24] sm:$0x1] }
 0x2bf   : > { %v1178_v56 = vsel %vm1081_vm10, %v1176_v48, %v1177_v5  ;;  %v2598_v48 = vld [vmem:[#allocation3 + $0xc] sm:$0xf] }
 0x2c0   : > { %v2131_v23 = vadd.f32 %v6374_v57, %v2072_v30  ;;  %v2321_v57 = vsel %vm5729_vm2, 0, %v2320_v33  ;;  %v2323_v33 = vld [vmem:[#allocation3 + $0x30] sm:$0x1] }
 0x2c1   : > { %2322 = vst [vmem:[#allocation3 + $0x24] sm:$0x1] %v2321_v57 }
 0x2c2   : > { %v2052_v42 = vpop.f32.mrf.mxu0  ;;  %v2190_v25 = vadd.f32 %v6380_v24, %v2131_v23  ;;  %v2350_v24 = vld [vmem:[#allocation3 + $0x2c] sm:$0x1] }
 0x2c3   : > { %v6390_v9 = vadd.f32 %v2052_v42, %v6298_v50  ;;  %v6408_v51 = vpop.f32.mrf.mxu1  ;;  %v6411_v16 = vpop.f32.mrf.mxu2  ;;  %v2351_v30 = vsel %vm5747_vm4, 0, %v2350_v24 }
 0x2c4   : > { %v6420_v49 = vpop.f32.mrf.mxu3  ;;  %2352 = vst [vmem:[#allocation3 + $0x2c] sm:$0x1] %v2351_v30 }
 0x2ca   : > { %v2241_v52 = vpop.f32.mrf.mxu0 }
 0x2cb   : > { %v2242_v21 = vadd.f32 %v2241_v52, %v2183_v1  ;;  %v6422_v6 = vpop.f32.mrf.mxu1 }
 0x2cd   : > { %v2291_v50 = vmax.f32 %v2242_v21, 0.0  ;;  %2280 = vmatmul.bf16.gmra.mxu0 %v6289_v15 }
 0x2cf   : > { %v2371_v43 = vpack.c.bf16 %v2291_v50, %v2291_v50  ;;  %v2595_v50 = vld [vmem:[#allocation3 + $0x8] sm:$0x1] }
 0x2d1   : > { %v2392_v62 = vshrl.u32 %v2371_v43, 16  ;;  %v2395_v63 = vshll.u32 %v2371_v43, 16 }
 0x2d2   : > { %v2243_v4 = vpop.f32.mrf.mxu0 }
 0x2d3   : > { %v2394_v38 = vrot.slane %v2392_v62, 7  ;;  %v2244_v15 = vadd.f32 %v2243_v4, %v2185_v10  ;;  %v6438_v44 = vpop.f32.mrf.mxu1 }
 0x2d5   : > { %v2397_v18 = vor.u32 %v2395_v63, %v2394_v38  ;;  %v2292_v53 = vmax.f32 %v2244_v15, 0.0  ;;  %v2398_v43 = vrot.slane %v2394_v38, 4  ;;  %v2075_v38 = vadd.f32 %v6382_v19, %v6322_v11  ;;  %v6433_v63 = vpop.f32.mrf.mxu2 }
 0x2d7   : > { %v2592_v42 = vsel %vm5795_vm7, %v2397_v18, %v2591_v60  ;;  %v2372_v13 = vpack.c.bf16 %v2292_v53, %v2292_v53  ;;  %v2134_v5 = vadd.f32 %v6387_v61, %v2075_v38 }
 0x2d8   : > { %2593 = vst [vmem:[#allocation3] sm:$0xf] %v2592_v42 }
 0x2d9   : > { %v2400_v59 = vshrl.u32 %v2372_v13, 16  ;;  %v2403_v52 = vshll.u32 %v2372_v13, 16  ;;  %v6436_v13 = vpop.f32.mrf.mxu3  ;;  %v2193_v61 = vadd.f32 %v6394_v3, %v2134_v5 }
 0x2da   : > { %v2246_v1 = vpop.f32.mrf.mxu0 }
 0x2db   : > { %v2402_v34 = vrot.slane %v2400_v59, 7  ;;  %v2247_v21 = vadd.f32 %v2246_v1, %v2188_v29  ;;  %v2077_v29 = vadd.f32 %v6397_v35, %v6326_v39  ;;  %v2086_v57 = vpop.f32.mrf.mxu1 }
 0x2dd   : > { %v2405_v32 = vor.u32 %v2403_v52, %v2402_v34  ;;  %v2407_v26 = vrot.slane %v2402_v34, 4  ;;  %v2293_v46 = vmax.f32 %v2247_v21, 0.0  ;;  %2285 = vmatmul.bf16.gmra.mxu0 %v1178_v56  ;;  %v6447_v56 = vpop.f32.mrf.mxu2  ;;  %v2136_v23 = vadd.f32 %v6399_v45, %v2077_v29 }
 0x2df   : > { %v2406_v28 = vsel %vm5802_vm8, %v2398_v43, %v2405_v32  ;;  %v2596_v62 = vsel %vm5729_vm2, %v2407_v26, %v2595_v50  ;;  %v2373_v4 = vpack.c.bf16 %v2293_v46, %v2293_v46  ;;  %v2602_v50 = vld [vmem:[#allocation3 + $0x14] sm:$0x1]  ;;  %v2195_v45 = vadd.f32 %v6405_v55, %v2136_v23 }
 0x2e0   : > { %2594 = vst [vmem:[#allocation3 + $0x4] sm:$0xf] %v2406_v28  ;;  %v2324_v28 = vsel %vm5729_vm2, 0, %v2323_v33  ;;  %v2085_v33 = vadd.f32 %v6438_v44, %v6336_v41  ;;  %v2087_v44 = vadd.f32 %v2086_v57, %v6340_v20 }
 0x2e1   : > { %2597 = vst [vmem:[#allocation3 + $0x8] sm:$0x1] %v2596_v62  ;;  %v2409_v15 = vshrl.u32 %v2373_v4, 16  ;;  %v2412_v18 = vshll.u32 %v2373_v4, 16  ;;  %v6456_v62 = vpop.f32.mrf.mxu3  ;;  %v2080_v4 = vadd.f32 %v6408_v51, %v6329_v37  ;;  %v2082_v51 = vadd.f32 %v6422_v6, %v6333_v36 }
 0x2e2   : > { %v2248_v60 = vpop.f32.mrf.mxu0  ;;  %2325 = vst [vmem:[#allocation3 + $0x30] sm:$0x1] %v2324_v28 }
 0x2e3   : > { %v2411_v8 = vrot.slane %v2409_v15, 7  ;;  %v2249_v53 = vadd.f32 %v2248_v60, %v2190_v25  ;;  %v2089_v29 = vpop.f32.mrf.mxu1 }
 0x2e5   : > { %v2414_v2 = vor.u32 %v2412_v18, %v2411_v8  ;;  %v2294_v42 = vmax.f32 %v2249_v53, 0.0  ;;  %v2415_v43 = vrot.slane %v2411_v8, 4  ;;  %v2605_v18 = vld [vmem:[#allocation3 + $0x18] sm:$0xf]  ;;  %v2139_v53 = vadd.f32 %v6411_v16, %v2080_v4 }
 0x2e7   : > { %v2599_v11 = vsel %vm5795_vm7, %v2414_v2, %v2598_v48  ;;  %v2374_v19 = vpack.c.bf16 %v2294_v42, %v2294_v42  ;;  %v2145_v48 = vpop.f32.mrf.mxu2  ;;  %v2353_v42 = vld [vmem:[#allocation3 + $0x38] sm:$0x1] }
 0x2e8   : > { %2600 = vst [vmem:[#allocation3 + $0xc] sm:$0xf] %v2599_v11  ;;  %v2354_v37 = vsel %vm5747_vm4, 0, %v2353_v42  ;;  %v2198_v11 = vadd.f32 %v6420_v49, %v2139_v53 }
 0x2e9   : > { %v2417_v59 = vshrl.u32 %v2374_v19, 16  ;;  %v2420_v52 = vshll.u32 %v2374_v19, 16  ;;  %2355 = vst [vmem:[#allocation3 + $0x38] sm:$0x1] %v2354_v37  ;;  %v2204_v16 = vpop.f32.mrf.mxu3 }
 0x2ea   : > { %v2251_v1 = vpop.f32.mrf.mxu0 }
 0x2eb   : > { %v2419_v34 = vrot.slane %v2417_v59, 7  ;;  %v2252_v21 = vadd.f32 %v2251_v1, %v2193_v61 }
 0x2ed   : > { %v2422_v32 = vor.u32 %v2420_v52, %v2419_v34  ;;  %v2424_v26 = vrot.slane %v2419_v34, 4  ;;  %v2295_v46 = vmax.f32 %v2252_v21, 0.0  ;;  %v2141_v34 = vadd.f32 %v6433_v63, %v2082_v51  ;;  %v2609_v52 = vld [vmem:[#allocation3 + $0x20] sm:$0x1] }
 0x2ee   : > { %v2146_v51 = vadd.f32 %v2145_v48, %v2087_v44 }
 0x2ef   : > { %v2423_v39 = vsel %vm5802_vm8, %v2415_v43, %v2422_v32  ;;  %v2603_v3 = vsel %vm5729_vm2, %v2424_v26, %v2602_v50  ;;  %v2375_v35 = vpack.c.bf16 %v2295_v46, %v2295_v46  ;;  %v2326_v32 = vld [vmem:[#allocation3 + $0x3c] sm:$0x1]  ;;  %v2148_v36 = vpop.f32.mrf.mxu2  ;;  %v2200_v63 = vadd.f32 %v6436_v13, %v2141_v34  ;;  %v2329_v34 = vld [vmem:[#allocation3 + $0x48] sm:$0x1] }
 0x2f0   : > { %2601 = vst [vmem:[#allocation3 + $0x10] sm:$0xf] %v2423_v39  ;;  %v2327_v46 = vsel %vm5729_vm2, 0, %v2326_v32  ;;  %v2205_v48 = vadd.f32 %v2204_v16, %v2146_v51 }
 0x2f1   : > { %2604 = vst [vmem:[#allocation3 + $0x14] sm:$0x1] %v2603_v3  ;;  %v2426_v25 = vshrl.u32 %v2375_v35, 16  ;;  %v2429_v60 = vshll.u32 %v2375_v35, 16  ;;  %v2207_v4 = vpop.f32.mrf.mxu3 }
 0x2f2   : > { %v2253_v38 = vpop.f32.mrf.mxu0  ;;  %2328 = vst [vmem:[#allocation3 + $0x3c] sm:$0x1] %v2327_v46  ;;  %v2619_v46 = vld [vmem:[#allocation3 + $0x30] sm:$0xf] }
 0x2f3   : > { %v2428_v15 = vrot.slane %v2426_v25, 7  ;;  %v2254_v8 = vadd.f32 %v2253_v38, %v2195_v45  ;;  %v2612_v25 = vld [vmem:[#allocation3 + $0x24] sm:$0xf]  ;;  %v2144_v38 = vadd.f32 %v6447_v56, %v2085_v33 }
 0x2f5   : > { %v2431_v5 = vor.u32 %v2429_v60, %v2428_v15  ;;  %v2296_v2 = vmax.f32 %v2254_v8, 0.0  ;;  %v2432_v21 = vrot.slane %v2428_v15, 4  ;;  %v2091_v15 = vpop.f32.mrf.mxu1 }
 0x2f6   : > { %v2092_v16 = vadd.f32 %v2091_v15, %v6347_v31 }
 0x2f7   : > { %v2606_v55 = vsel %vm5795_vm7, %v2431_v5, %v2605_v18  ;;  %v2376_v24 = vpack.c.bf16 %v2296_v2, %v2296_v2  ;;  %v2356_v18 = vld [vmem:[#allocation3 + $0x44] sm:$0x1]  ;;  %v2203_v5 = vadd.f32 %v6456_v62, %v2144_v38  ;;  %v2150_v2 = vpop.f32.mrf.mxu2 }
 0x2f8   : > { %2607 = vst [vmem:[#allocation3 + $0x18] sm:$0xf] %v2606_v55  ;;  %v2357_v41 = vsel %vm5747_vm4, 0, %v2356_v18 }
 0x2f9   : > { %v2434_v19 = vshrl.u32 %v2376_v24, 16  ;;  %v2437_v59 = vshll.u32 %v2376_v24, 16  ;;  %2358 = vst [vmem:[#allocation3 + $0x44] sm:$0x1] %v2357_v41 }
 0x2fa   : > { %v2256_v30 = vpop.f32.mrf.mxu0 }
 0x2fb   : > { %v2436_v61 = vrot.slane %v2434_v19, 7  ;;  %v2257_v1 = vadd.f32 %v2256_v30, %v2198_v11  ;;  %v2616_v11 = vld [vmem:[#allocation3 + $0x2c] sm:$0x1] }
 0x2fd   : > { %v2439_v23 = vor.u32 %v2437_v59, %v2436_v61  ;;  %v2441_v50 = vrot.slane %v2436_v61, 4  ;;  %v2297_v43 = vmax.f32 %v2257_v1, 0.0  ;;  %v2209_v1 = vpop.f32.mrf.mxu3 }
 0x2ff   : > { %v2440_v49 = vsel %vm5802_vm8, %v2432_v21, %v2439_v23  ;;  %v2610_v6 = vsel %vm5729_vm2, %v2441_v50, %v2609_v52  ;;  %v2377_v26 = vpack.c.bf16 %v2297_v43, %v2297_v43  ;;  %v2094_v52 = vpop.f32.mrf.mxu1  ;;  %v2330_v21 = vsel %vm5729_vm2, 0, %v2329_v34  ;;  %v2153_v32 = vpop.f32.mrf.mxu2 }
 0x300   : > { %2608 = vst [vmem:[#allocation3 + $0x1c] sm:$0xf] %v2440_v49  ;;  %v2090_v23 = vadd.f32 %v2089_v29, %v6343_v14 }
 0x301   : > { %2611 = vst [vmem:[#allocation3 + $0x20] sm:$0x1] %v2610_v6  ;;  %v2443_v39 = vshrl.u32 %v2377_v26, 16  ;;  %v2446_v28 = vshll.u32 %v2377_v26, 16 }
 0x302   : > { %v2258_v3 = vpop.f32.mrf.mxu0  ;;  %2331 = vst [vmem:[#allocation3 + $0x48] sm:$0x1] %v2330_v21 }
 0x303   : > { %v2445_v35 = vrot.slane %v2443_v39, 7  ;;  %v2259_v45 = vadd.f32 %v2258_v3, %v2200_v63  ;;  %v2149_v63 = vadd.f32 %v2148_v36, %v2090_v23  ;;  %v2359_v3 = vld [vmem:[#allocation3 + $0x50] sm:$0x1] }
 0x304   : > { %v2360_v14 = vsel %vm5747_vm4, 0, %v2359_v3 }
 0x305   : > { %v2448_v60 = vor.u32 %v2446_v28, %v2445_v35  ;;  %v2298_v8 = vmax.f32 %v2259_v45, 0.0  ;;  %v2449_v19 = vrot.slane %v2445_v35, 4  ;;  %v2212_v29 = vpop.f32.mrf.mxu3  ;;  %v2208_v45 = vadd.f32 %v2207_v4, %v2149_v63  ;;  %2361 = vst [vmem:[#allocation3 + $0x50] sm:$0x1] %v2360_v14 }
 0x307   : > { %v2613_v13 = vsel %vm5795_vm7, %v2448_v60, %v2612_v25  ;;  %v2378_v53 = vpack.c.bf16 %v2298_v8, %v2298_v8  ;;  %v2096_v25 = vpop.f32.mrf.mxu1  ;;  %v2155_v41 = vpop.f32.mrf.mxu2 }
 0x308   : > { %2614 = vst [vmem:[#allocation3 + $0x24] sm:$0xf] %v2613_v13  ;;  %v2151_v13 = vadd.f32 %v2150_v2, %v2092_v16  ;;  %v2095_v2 = vadd.f32 %v2094_v52, %v6350_v54  ;;  %v2097_v52 = vadd.f32 %v2096_v25, %v6354_v12 }
 0x309   : > { %v2451_v42 = vshrl.u32 %v2378_v53, 16  ;;  %v2454_v24 = vshll.u32 %v2378_v53, 16  ;;  %v2623_v53 = vld [vmem:[#allocation3 + $0x38] sm:$0x1] }
 0x30a   : > { %v2261_v56 = vpop.f32.mrf.mxu0  ;;  %v2156_v63 = vadd.f32 %v2155_v41, %v2097_v52 }
 0x30b   : > { %v2453_v55 = vrot.slane %v2451_v42, 7  ;;  %v2262_v37 = vadd.f32 %v2261_v56, %v2203_v5 }
 0x30d   : > { %v2456_v30 = vor.u32 %v2454_v24, %v2453_v55  ;;  %v2458_v61 = vrot.slane %v2453_v55, 4  ;;  %v2299_v59 = vmax.f32 %v2262_v37, 0.0  ;;  %v2332_v55 = vld [vmem:[#allocation3 + $0x54] sm:$0x1]  ;;  %v2210_v37 = vadd.f32 %v2209_v1, %v2151_v13 }
 0x30e   : > { %v2333_v24 = vsel %vm5729_vm2, 0, %v2332_v55 }
 0x30f   : > { %v2457_v20 = vsel %vm5802_vm8, %v2449_v19, %v2456_v30  ;;  %v2617_v62 = vsel %vm5729_vm2, %v2458_v61, %v2616_v11  ;;  %v2379_v57 = vpack.c.bf16 %v2299_v59, %v2299_v59  ;;  %v2214_v11 = vpop.f32.mrf.mxu3  ;;  %2334 = vst [vmem:[#allocation3 + $0x54] sm:$0x1] %v2333_v24  ;;  %v2099_v30 = vpop.f32.mrf.mxu1 }
 0x310   : > { %2615 = vst [vmem:[#allocation3 + $0x28] sm:$0xf] %v2457_v20  ;;  %v2626_v20 = vld [vmem:[#allocation3 + $0x3c] sm:$0xf]  ;;  %v2158_v23 = vpop.f32.mrf.mxu2 }
 0x311   : > { %2618 = vst [vmem:[#allocation3 + $0x2c] sm:$0x1] %v2617_v62  ;;  %v2460_v50 = vshrl.u32 %v2379_v57, 16  ;;  %v2463_v6 = vshll.u32 %v2379_v57, 16  ;;  %v2154_v62 = vadd.f32 %v2153_v32, %v2095_v2 }
 0x312   : > { %v2263_v43 = vpop.f32.mrf.mxu0 }
 0x313   : > { %v2462_v49 = vrot.slane %v2460_v50, 7  ;;  %v2264_v26 = vadd.f32 %v2263_v43, %v2205_v48  ;;  %v2362_v48 = vld [vmem:[#allocation3 + $0x5c] sm:$0x1]  ;;  %v2213_v43 = vadd.f32 %v2212_v29, %v2154_v62  ;;  %v2637_v62 = vld [vmem:[#allocation3 + $0x50] sm:$0x1] }
 0x314   : > { %v2363_v54 = vsel %vm5747_vm4, 0, %v2362_v48 }
 0x315   : > { %v2465_v33 = vor.u32 %v2463_v6, %v2462_v49  ;;  %v2300_v39 = vmax.f32 %v2264_v26, 0.0  ;;  %v2466_v44 = vrot.slane %v2462_v49, 4  ;;  %2364 = vst [vmem:[#allocation3 + $0x5c] sm:$0x1] %v2363_v54 }
 0x317   : > { %v2620_v35 = vsel %vm5795_vm7, %v2465_v33, %v2619_v46  ;;  %v2380_v28 = vpack.c.bf16 %v2300_v39, %v2300_v39  ;;  %v2217_v33 = vpop.f32.mrf.mxu3  ;;  %v2630_v39 = vld [vmem:[#allocation3 + $0x44] sm:$0x1]  ;;  %v2101_v3 = vpop.f32.mrf.mxu1 }
 0x318   : > { %2621 = vst [vmem:[#allocation3 + $0x30] sm:$0xf] %v2620_v35  ;;  %v2102_v2 = vadd.f32 %v2101_v3, %v6361_v0  ;;  %v2640_v3 = vld [vmem:[#allocation3 + $0x54] sm:$0xf] }
 0x319   : > { %v2468_v38 = vshrl.u32 %v2380_v28, 16  ;;  %v2471_v8 = vshll.u32 %v2380_v28, 16 }
 0x31a   : > { %v2266_v60 = vpop.f32.mrf.mxu0 }
 0x31b   : > { %v2470_v36 = vrot.slane %v2468_v38, 7  ;;  %v2267_v18 = vadd.f32 %v2266_v60, %v2208_v45  ;;  %v2335_v45 = vld [vmem:[#allocation3 + $0x60] sm:$0x1]  ;;  %v2215_v60 = vadd.f32 %v2214_v11, %v2156_v63 }
 0x31c   : > { %v2336_v38 = vsel %vm5729_vm2, 0, %v2335_v45  ;;  %v2368_v45 = vld [vmem:[#allocation3 + $0x74] sm:$0x1] }
 0x31d   : > { %v2473_v5 = vor.u32 %v2471_v8, %v2470_v36  ;;  %v2475_v42 = vrot.slane %v2470_v36, 4  ;;  %v2301_v56 = vmax.f32 %v2267_v18, 0.0  ;;  %v2100_v36 = vadd.f32 %v2099_v30, %v6357_v17  ;;  %v2160_v8 = vpop.f32.mrf.mxu2  ;;  %2337 = vst [vmem:[#allocation3 + $0x60] sm:$0x1] %v2336_v38 }
 0x31f   : > { %v2474_v31 = vsel %vm5802_vm8, %v2466_v44, %v2473_v5  ;;  %v2624_v4 = vsel %vm5729_vm2, %v2475_v42, %v2623_v53  ;;  %v2381_v15 = vpack.c.bf16 %v2301_v56, %v2301_v56  ;;  %v2633_v5 = vld [vmem:[#allocation3 + $0x48] sm:$0xf]  ;;  %v2159_v42 = vadd.f32 %v2158_v23, %v2100_v36 }
 0x320   : > { %2622 = vst [vmem:[#allocation3 + $0x34] sm:$0xf] %v2474_v31  ;;  %v2219_v31 = vpop.f32.mrf.mxu3 }
 0x321   : > { %2625 = vst [vmem:[#allocation3 + $0x38] sm:$0x1] %v2624_v4  ;;  %v2477_v51 = vshrl.u32 %v2381_v15, 16  ;;  %v2480_v59 = vshll.u32 %v2381_v15, 16  ;;  %v2365_v4 = vld [vmem:[#allocation3 + $0x68] sm:$0x1]  ;;  %v2104_v15 = vpop.f32.mrf.mxu1 }
 0x322   : > { %v2268_v19 = vpop.f32.mrf.mxu0  ;;  %v2366_v17 = vsel %vm5747_vm4, 0, %v2365_v4 }
 0x323   : > { %v2479_v61 = vrot.slane %v2477_v51, 7  ;;  %v2269_v34 = vadd.f32 %v2268_v19, %v2210_v37  ;;  %v2218_v51 = vadd.f32 %v2217_v33, %v2159_v42  ;;  %2367 = vst [vmem:[#allocation3 + $0x68] sm:$0x1] %v2366_v17 }
 0x325   : > { %v2482_v57 = vor.u32 %v2480_v59, %v2479_v61  ;;  %v2302_v21 = vmax.f32 %v2269_v34, 0.0  ;;  %v2483_v35 = vrot.slane %v2479_v61, 4  ;;  %v2163_v30 = vpop.f32.mrf.mxu2 }
 0x327   : > { %v2627_v1 = vsel %vm5795_vm7, %v2482_v57, %v2626_v20  ;;  %v2382_v50 = vpack.c.bf16 %v2302_v21, %v2302_v21  ;;  %v2161_v20 = vadd.f32 %v2160_v8, %v2102_v2 }
 0x328   : > { %2628 = vst [vmem:[#allocation3 + $0x3c] sm:$0xf] %v2627_v1  ;;  %v2338_v1 = vld [vmem:[#allocation3 + $0x6c] sm:$0x1] }
 0x329   : > { %v2485_v49 = vshrl.u32 %v2382_v50, 16  ;;  %v2488_v32 = vshll.u32 %v2382_v50, 16  ;;  %v2339_v52 = vsel %vm5729_vm2, 0, %v2338_v1 }
 0x32a   : > { %v2271_v6 = vpop.f32.mrf.mxu0  ;;  %2340 = vst [vmem:[#allocation3 + $0x6c] sm:$0x1] %v2339_v52 }
 0x32b   : > { %v2487_v26 = vrot.slane %v2485_v49, 7  ;;  %v2272_v46 = vadd.f32 %v2271_v6, %v2213_v43  ;;  %v2222_v43 = vpop.f32.mrf.mxu3  ;;  %v2220_v49 = vadd.f32 %v2219_v31, %v2161_v20  ;;  %v2105_v6 = vadd.f32 %v2104_v15, %v6364_v7 }
 0x32c   : > { %v2369_v7 = vsel %vm5747_vm4, 0, %v2368_v45 }
 0x32d   : > { %v2490_v28 = vor.u32 %v2488_v32, %v2487_v26  ;;  %v2492_v14 = vrot.slane %v2487_v26, 4  ;;  %v2303_v16 = vmax.f32 %v2272_v46, 0.0  ;;  %v2106_v26 = vpop.f32.mrf.mxu1  ;;  %2370 = vst [vmem:[#allocation3 + $0x74] sm:$0x1] %v2369_v7 }
 0x32f   : > { %v2491_v12 = vsel %vm5802_vm8, %v2483_v35, %v2490_v28  ;;  %v2631_v29 = vsel %vm5729_vm2, %v2492_v14, %v2630_v39  ;;  %v2383_v25 = vpack.c.bf16 %v2303_v16, %v2303_v16  ;;  %v2164_v35 = vadd.f32 %v2163_v30, %v2105_v6  ;;  %v2165_v28 = vpop.f32.mrf.mxu2 }
 0x330   : > { %2629 = vst [vmem:[#allocation3 + $0x40] sm:$0xf] %v2491_v12 }
 0x331   : > { %2632 = vst [vmem:[#allocation3 + $0x44] sm:$0x1] %v2631_v29  ;;  %v2494_v18 = vshrl.u32 %v2383_v25, 16  ;;  %v2497_v41 = vshll.u32 %v2383_v25, 16  ;;  %v2107_v25 = vadd.f32 %v2106_v26, %v6370_v22  ;;  %v2223_v38 = vadd.f32 %v2222_v43, %v2164_v35 }
 0x332   : > { %v2273_v13 = vpop.f32.mrf.mxu0 }
 0x333   : > { %v2496_v53 = vrot.slane %v2494_v18, 7  ;;  %v2274_v44 = vadd.f32 %v2273_v13, %v2215_v60  ;;  %v2224_v36 = vpop.f32.mrf.mxu3 }
 0x335   : > { %v2499_v56 = vor.u32 %v2497_v41, %v2496_v53  ;;  %v2304_v55 = vmax.f32 %v2274_v44, 0.0  ;;  %v2500_v57 = vrot.slane %v2496_v53, 4  ;;  %v2109_v18 = vpop.f32.mrf.mxu1  ;;  %v2166_v44 = vadd.f32 %v2165_v28, %v2107_v25 }
 0x337   : > { %v2634_v24 = vsel %vm5795_vm7, %v2499_v56, %v2633_v5  ;;  %v2384_v37 = vpack.c.bf16 %v2304_v55, %v2304_v55  ;;  %v2644_v5 = vld [vmem:[#allocation3 + $0x5c] sm:$0x1]  ;;  %v2168_v58 = vpop.f32.mrf.mxu2 }
 0x338   : > { %2635 = vst [vmem:[#allocation3 + $0x48] sm:$0xf] %v2634_v24  ;;  %v2225_v24 = vadd.f32 %v2224_v36, %v2166_v44 }
 0x339   : > { %v2502_v11 = vshrl.u32 %v2384_v37, 16  ;;  %v2505_v59 = vshll.u32 %v2384_v37, 16  ;;  %v2110_v37 = vadd.f32 %v2109_v18, %v6377_v40  ;;  %v2658_v18 = vld [vmem:[#allocation3 + $0x74] sm:$0x1] }
 0x33a   : > { %v2276_v19 = vpop.f32.mrf.mxu0 }
 0x33b   : > { %v2504_v61 = vrot.slane %v2502_v11, 7  ;;  %v2277_v34 = vadd.f32 %v2276_v19, %v2218_v51  ;;  %v2227_v30 = vpop.f32.mrf.mxu3 }
 0x33d   : > { %v2507_v21 = vor.u32 %v2505_v59, %v2504_v61  ;;  %v2509_v48 = vrot.slane %v2504_v61, 4  ;;  %v2305_v23 = vmax.f32 %v2277_v34, 0.0  ;;  %v2647_v61 = vld [vmem:[#allocation3 + $0x60] sm:$0xf]  ;;  %v2169_v59 = vadd.f32 %v2168_v58, %v2110_v37  ;;  %v2111_v34 = vpop.f32.mrf.mxu1 }
 0x33f   : > { %v2508_v50 = vsel %vm5802_vm8, %v2500_v57, %v2507_v21  ;;  %v2638_v0 = vsel %vm5729_vm2, %v2509_v48, %v2637_v62  ;;  %v2385_v54 = vpack.c.bf16 %v2305_v23, %v2305_v23  ;;  %v2112_v48 = vadd.f32 %v2111_v34, %v6390_v9  ;;  %v2170_v23 = vpop.f32.mrf.mxu2 }
 0x340   : > { %2636 = vst [vmem:[#allocation3 + $0x4c] sm:$0xf] %v2508_v50  ;;  %v2228_v40 = vadd.f32 %v2227_v30, %v2169_v59 }
 0x341   : > { %2639 = vst [vmem:[#allocation3 + $0x50] sm:$0x1] %v2638_v0  ;;  %v2511_v32 = vshrl.u32 %v2385_v54, 16  ;;  %v2514_v33 = vshll.u32 %v2385_v54, 16  ;;  %v2171_v43 = vadd.f32 %v2170_v23, %v2112_v48 }
 0x342   : > { %v2278_v46 = vpop.f32.mrf.mxu0 }
 0x343   : > { %v2513_v63 = vrot.slane %v2511_v32, 7  ;;  %v2279_v39 = vadd.f32 %v2278_v46, %v2220_v49  ;;  %v2651_v49 = vld [vmem:[#allocation3 + $0x68] sm:$0x1] }
 0x345   : > { %v2516_v14 = vor.u32 %v2514_v33, %v2513_v63  ;;  %v2306_v16 = vmax.f32 %v2279_v39, 0.0  ;;  %v2517_v42 = vrot.slane %v2513_v63, 4  ;;  %v2229_v63 = vpop.f32.mrf.mxu3 }
 0x347   : > { %v2641_v12 = vsel %vm5795_vm7, %v2516_v14, %v2640_v3  ;;  %v2386_v29 = vpack.c.bf16 %v2306_v16, %v2306_v16  ;;  %v2230_v3 = vadd.f32 %v2229_v63, %v2171_v43 }
 0x348   : > { %2642 = vst [vmem:[#allocation3 + $0x54] sm:$0xf] %v2641_v12  ;;  %v2654_v12 = vld [vmem:[#allocation3 + $0x6c] sm:$0xf] }
 0x349   : > { %v2519_v60 = vshrl.u32 %v2386_v29, 16  ;;  %v2522_v53 = vshll.u32 %v2386_v29, 16 }
 0x34a   : > { %v2281_v8 = vpop.f32.mrf.mxu0 }
 0x34b   : > { %v2521_v13 = vrot.slane %v2519_v60, 7  ;;  %v2282_v41 = vadd.f32 %v2281_v8, %v2223_v38 }
 0x34d   : > { %v2524_v56 = vor.u32 %v2522_v53, %v2521_v13  ;;  %v2526_v55 = vrot.slane %v2521_v13, 4  ;;  %v2307_v31 = vmax.f32 %v2282_v41, 0.0 }
 0x34f   : > { %v2525_v22 = vsel %vm5802_vm8, %v2517_v42, %v2524_v56  ;;  %v2645_v4 = vsel %vm5729_vm2, %v2526_v55, %v2644_v5  ;;  %v2387_v15 = vpack.c.bf16 %v2307_v31, %v2307_v31 }
 0x350   : > { %2643 = vst [vmem:[#allocation3 + $0x58] sm:$0xf] %v2525_v22 }
 0x351   : > { %2646 = vst [vmem:[#allocation3 + $0x5c] sm:$0x1] %v2645_v4  ;;  %v2528_v17 = vshrl.u32 %v2387_v15, 16  ;;  %v2531_v11 = vshll.u32 %v2387_v15, 16 }
 0x352   : > { %v2283_v2 = vpop.f32.mrf.mxu0 }
 0x353   : > { %v2530_v51 = vrot.slane %v2528_v17, 7  ;;  %v2284_v19 = vadd.f32 %v2283_v2, %v2225_v24 }
 0x355   : > { %v2533_v20 = vor.u32 %v2531_v11, %v2530_v51  ;;  %v2308_v62 = vmax.f32 %v2284_v19, 0.0  ;;  %v2534_v6 = vrot.slane %v2530_v51, 4 }
 0x357   : > { %v2648_v57 = vsel %vm5795_vm7, %v2533_v20, %v2647_v61  ;;  %v2388_v21 = vpack.c.bf16 %v2308_v62, %v2308_v62 }
 0x358   : > { %2649 = vst [vmem:[#allocation3 + $0x60] sm:$0xf] %v2648_v57 }
 0x359   : > { %v2536_v1 = vshrl.u32 %v2388_v21, 16  ;;  %v2539_v54 = vshll.u32 %v2388_v21, 16 }
 0x35a   : > { %v2286_v50 = vpop.f32.mrf.mxu0 }
 0x35b   : > { %v2538_v0 = vrot.slane %v2536_v1, 7  ;;  %v2287_v52 = vadd.f32 %v2286_v50, %v2228_v40 }
 0x35d   : > { %v2541_v26 = vor.u32 %v2539_v54, %v2538_v0  ;;  %v2543_v32 = vrot.slane %v2538_v0, 4  ;;  %v2309_v46 = vmax.f32 %v2287_v52, 0.0 }
 0x35f   : > { %v2542_v33 = vsel %vm5802_vm8, %v2534_v6, %v2541_v26  ;;  %v2652_v9 = vsel %vm5729_vm2, %v2543_v32, %v2651_v49  ;;  %v2389_v39 = vpack.c.bf16 %v2309_v46, %v2309_v46 }
 0x360   : > { %2650 = vst [vmem:[#allocation3 + $0x64] sm:$0xf] %v2542_v33 }
 0x361   : > { %2653 = vst [vmem:[#allocation3 + $0x68] sm:$0x1] %v2652_v9  ;;  %v2545_v35 = vshrl.u32 %v2389_v39, 16  ;;  %v2548_v16 = vshll.u32 %v2389_v39, 16 }
 0x362   : > { %v2288_v28 = vpop.f32.mrf.mxu0 }
 0x363   : > { %v2547_v14 = vrot.slane %v2545_v35, 7  ;;  %v2289_v45 = vadd.f32 %v2288_v28, %v2230_v3 }
 0x365   : > { %v2550_v29 = vor.u32 %v2548_v16, %v2547_v14  ;;  %v2310_v7 = vmax.f32 %v2289_v45, 0.0  ;;  %v2551_v13 = vrot.slane %v2547_v14, 4 }
 0x367   : > { %v2655_v25 = vsel %vm5795_vm7, %v2550_v29, %v2654_v12  ;;  %v2390_v38 = vpack.c.bf16 %v2310_v7, %v2310_v7 }
 0x368   : > { %2656 = vst [vmem:[#allocation3 + $0x6c] sm:$0xf] %v2655_v25 }
 0x369   : > { %v2553_v60 = vshrl.u32 %v2390_v38, 16  ;;  %v2556_v8 = vshll.u32 %v2390_v38, 16 }
 0x36b   : > { %v2555_v36 = vrot.slane %v2553_v60, 7 }
 0x36d   : > { %v2558_v53 = vor.u32 %v2556_v8, %v2555_v36  ;;  %v2560_v41 = vrot.slane %v2555_v36, 4  ;;  %2663 = sbr.rel (%p4255_p1) target bundleno = 886 (0x376), region = 72 }
 0x36f   : > { %v2559_v44 = vsel %vm5802_vm8, %v2551_v13, %v2558_v53  ;;  %v2659_v5 = vsel %vm5729_vm2, %v2560_v41, %v2658_v18 }
 0x370   : > { %2657 = vst [vmem:[#allocation3 + $0x70] sm:$0xf] %v2559_v44 }
 0x371   : > { %2660 = vst [vmem:[#allocation3 + $0x74] sm:$0x1] %v2659_v5 }
 0x372   : > { %v5534_v47 = vmov 0  }
 0x373   : > { %2664 = vst [vmem:[#allocation3] sm:$0xf] %v5534_v47 }
 0x374   : > { %2665 = vst [vmem:[#allocation3 + $0x4] sm:$0xf] %v5534_v47 }
 0x375   : > { %2666 = vst [vmem:[#allocation3 + $0x8] sm:$0x1] %v5534_v47 }
 0x376 PF: > { %2669 = sbr.rel (%p4260_p11) target bundleno = 895 (0x37f), region = 76 }
 0x37b   : > { %v5535_v42 = vmov 0  }
 0x37c   : > { %2671 = vst [vmem:[#allocation3 + $0x6c] sm:$0xf] %v5535_v42 }
 0x37d   : > { %2672 = vst [vmem:[#allocation3 + $0x70] sm:$0xf] %v5535_v42 }
 0x37e   : > { %2673 = vst [vmem:[#allocation3 + $0x74] sm:$0x1] %v5535_v42 }
 0x37f PF: > { %v4937_v27 = vld [vmem:[#allocation9 + $0x38] sm:$0xff]  ;;  %v4936_v55 = vld [vmem:[#allocation9 + $0x30] sm:$0xff]  ;;  %v4935_v22 = vld [vmem:[#allocation9 + $0x28] sm:$0xff]  ;;  %s6976_s15 = sld [smem:[#allocation15_spill]]  ;;  %s5002_s30 = sshll.u32 %s5510_s24, 4 }
 0x380   : > { %v4945_v10 = vld [vmem:[#allocation9 + $0x78] sm:$0xff]  ;;  %3584 = vmatpush.bf16.msra.mxu1 %v4937_v27  ;;  %v4944_v31 = vld [vmem:[#allocation9 + $0x70] sm:$0xff]  ;;  %v4943_v4 = vld [vmem:[#allocation9 + $0x68] sm:$0xff]  ;;  %s6977_s25 = sld [smem:[#allocation32_spill]]  ;;  %s4121_s29 = sshll.u32 %s5867_s10, 4  ;;  %s4122_s29 = int_to_ptr.vmem [resolvable:$true] %s4121_s29 }
 0x381   : > { %v4953_v56 = vld [vmem:[#allocation9 + $0xb8] sm:$0xff]  ;;  %3633 = vmatpush.bf16.msra.mxu2 %v4945_v10  ;;  %v4952_v58 = vld [vmem:[#allocation9 + $0xb0] sm:$0xff]  ;;  %v4951_v15 = vld [vmem:[#allocation9 + $0xa8] sm:$0xff]  ;;  %s4106_s13 = scalar_lea.sflag [#allocation6], %s289_s18 }
 0x382   : > { %3682 = vmatpush.bf16.msrb.mxu3 %v4953_v56  ;;  %v4934_v24 = vld [vmem:[#allocation9 + $0x20] sm:$0xff]  ;;  %v2694_v2 = vld [vmem:[#allocation3 + $0x8] sm:$0x1]  ;;  %v4933_v51 = vld [vmem:[#allocation9 + $0x18] sm:$0xff] }
 0x383   : > { %v4942_v37 = vld [vmem:[#allocation9 + $0x60] sm:$0xff]  ;;  %v4941_v11 = vld [vmem:[#allocation9 + $0x58] sm:$0xff]  ;;  %v2770_v19 = vunpack.c.l.b16 %v2694_v2  ;;  %v5028_v61 = vld [vmem:[#allocation3] sm:$0xff]  }
 0x384   : > { %3585 = vmatpush.bf16.msra.mxu1 %v4936_v55  ;;  %v4950_v17 = vld [vmem:[#allocation9 + $0xa0] sm:$0xff]  ;;  %v4949_v30 = vld [vmem:[#allocation9 + $0x98] sm:$0xff]  ;;  %v4932_v59 = vld [vmem:[#allocation9 + $0x10] sm:$0xff]  ;;  %v2789_v20 = vshll.u32 %v5028_v61, 16  ;;  %v2787_v1 = vshrl.u32 %v5028_v61, 16 }
 0x385   : > { %3634 = vmatpush.bf16.msra.mxu2 %v4944_v31  ;;  %v4940_v34 = vld [vmem:[#allocation9 + $0x50] sm:$0xff]  ;;  %v2778_v62 = vpack.c.b16 %v2770_v19, %v2770_v19  ;;  %v5106_v21 = vld [vmem:[#allocation3] sm:$0xf0]  ;;  %v5107_v48 = vld [vmem:[#allocation3] sm:$0xe]  ;;  %s4849_s26 = sshll.u32 %s6976_s15, 5 }
 0x386   : > { %3683 = vmatpush.bf16.msrb.mxu3 %v4952_v58  ;;  %v4948_v57 = vld [vmem:[#allocation9 + $0x90] sm:$0xff]  ;;  %v4931_v40 = vld [vmem:[#allocation9 + $0x8] sm:$0xff]  ;;  %v2791_v50 = vrot.slane %v2789_v20, 1  ;;  %v5108_v52 = vor.u32 %v5107_v48, %v5106_v21  ;;  %v5289_v49 = vld [vmem:[#allocation3 + $0xc] sm:$0xf0]  ;;  %s4118_s9 = sadd.s32 %s5002_s30, %s4849_s26  ;;  %s6978_s8 = smov %s6977_s25 }
 0x387   : > { %v4939_v23 = vld [vmem:[#allocation9 + $0x48] sm:$0xff]  ;;  %v2794_v0 = vshll.u32 %v2778_v62, 16  ;;  %v6556_v43 = vld [vmem:[#allocation3 + $0xc] sm:$0xff]   ;;  %v4930_v6 = vld [vmem:[#allocation9] sm:$0xff]  ;;  %v2915_v39 = vrot.slane %v2778_v62, 1  ;;  %s4850_s1 = sshll.u32 %s4118_s9, 3 }
 0x388   : > { %3586 = vmatpush.bf16.msra.mxu1 %v4935_v22  ;;  %v4947_v54 = vld [vmem:[#allocation9 + $0x88] sm:$0xff]  ;;  %v4938_v26 = vld [vmem:[#allocation9 + $0x40] sm:$0xff]  ;;  %v2792_v32 = vor.u32 %v2791_v50, %v2787_v1  ;;  %v4969_v33 = vld [vmem:[#allocation9 + $0x138] sm:$0xff]  ;;  %v2914_v9 = vrot.slane %v5108_v52, 1  ;;  %v2801_v25 = vshll.u32 %v6556_v43, 16  ;;  %v2799_v36 = vshrl.u32 %v6556_v43, 16  ;;  %s4120_s6 = scalar_lea.hbm %s6977_s25, %s4850_s1 }
 0x389   : > { %3635 = vmatpush.bf16.msra.mxu2 %v4943_v4  ;;  %v2796_v46 = vrot.slane %v2794_v0, 1  ;;  %v4946_v63 = vld [vmem:[#allocation9 + $0x80] sm:$0xff]  ;;  %v2695_v3 = vld [vmem:[#allocation3 + $0x14] sm:$0x1]  ;;  %v4968_v45 = vld [vmem:[#allocation9 + $0x130] sm:$0xff]  ;;  %s4123_s16 = sshll.u32 %s4120_s6, 4  ;;  %s4124_s16 = int_to_ptr.hbm [resolvable:$true] %s4123_s16 }
 0x38a   : > { %3684 = vmatpush.bf16.msrb.mxu3 %v4951_v15  ;;  %v4961_v35 = vld [vmem:[#allocation9 + $0xf8] sm:$0xff]  ;;  %v2771_v14 = vunpack.c.l.b16 %v2695_v3  ;;  %v2916_v16 = vsel %vm1081_vm10, %v2914_v9, %v2915_v39  ;;  %v5290_v12 = vld [vmem:[#allocation3 + $0xc] sm:$0xe]  ;;  %v4967_v38 = vld [vmem:[#allocation9 + $0x128] sm:$0xff]  ;;  %v2803_v8 = vrot.slane %v2801_v25, 1  ;;  %s5408_s17 = sshra.s32 %s4124_s16, 4  ;;  %s5409_s17 = int_to_ptr.hbm [resolvable:$true] %s5408_s17 }
 0x38b   : > { %v2797_v28 = vsel %vm920_vm9, %v2792_v32, %v2796_v46  ;;  %v4960_v29 = vld [vmem:[#allocation9 + $0xf0] sm:$0xff]  ;;  %v4959_v60 = vld [vmem:[#allocation9 + $0xe8] sm:$0xff]  ;;  %v5291_v13 = vor.u32 %v5290_v12, %v5289_v49  ;;  %v6568_v56 = vld [vmem:[#allocation3 + $0x18] sm:$0xff]   ;;  %s5410_s21 = scalar_lea.hbm %s5409_s17, 128  ;;  %s5414_s15 = scalar_lea.hbm %s6978_s8, 512 }
 0x38c   : > { %3587 = vmatpush.bf16.msra.mxu1 %v4934_v24  ;;  %v2779_v7 = vpack.c.b16 %v2771_v14, %v2771_v14  ;;  %v2804_v53 = vor.u32 %v2803_v8, %v2799_v36  ;;  %v2696_v47 = vld [vmem:[#allocation3 + $0x20] sm:$0x1]  ;;  %v4966_v55 = vld [vmem:[#allocation9 + $0x120] sm:$0xff]  ;;  %v2813_v58 = vshll.u32 %v6568_v56, 16  ;;  %v2811_v24 = vshrl.u32 %v6568_v56, 16  ;;  %v4965_v48 = vld [vmem:[#allocation9 + $0x118] sm:$0xff]  ;;  %p5411_p2 = scmp.ne.s32.totalorder %s5409_s17, %s5410_s21  ;;  %p5415_p7 = scmp.lt.s32.totalorder %s5409_s17, %s6978_s8 }
 0x38d   : > { %3636 = vmatpush.bf16.msra.mxu2 %v4942_v37  ;;  %v2917_v44 = vrot.slane %v5291_v13, 1  ;;  %v2772_v27 = vunpack.c.l.b16 %v2696_v47  ;;  %v4958_v22 = vld [vmem:[#allocation9 + $0xe0] sm:$0xff]  ;;  %v5293_v21 = vld [vmem:[#allocation3 + $0x24] sm:$0xe]  ;;  %v4957_v1 = vld [vmem:[#allocation9 + $0xd8] sm:$0xff]  ;;  %p5416_p8 = scmp.lt.s32.totalorder %s5414_s15, %s5410_s21 }
 0x38e   : > { %3685 = vmatpush.bf16.msrb.mxu3 %v4950_v17  ;;  %v2806_v18 = vshll.u32 %v2779_v7, 16  ;;  %v2918_v5 = vrot.slane %v2779_v7, 1  ;;  %v5109_v4 = vld [vmem:[#allocation3 + $0x18] sm:$0xf0]  ;;  %v5110_v15 = vld [vmem:[#allocation3 + $0x18] sm:$0xe]  ;;  %p5412_p3 = pnand %p5411_p2, %p5638_p6 }
 0x38f   : > { %v2780_v31 = vpack.c.b16 %v2772_v27, %v2772_v27  ;;  %v2815_v37 = vrot.slane %v2813_v58, 1  ;;  %v5111_v2 = vor.u32 %v5110_v15, %v5109_v4  ;;  %v2698_v46 = vld [vmem:[#allocation3 + $0x38] sm:$0x1]  ;;  %v6594_v39 = vld [vmem:[#allocation3 + $0x30] sm:$0xff]   ;;  %v4964_v3 = vld [vmem:[#allocation9 + $0x110] sm:$0xff]  ;;  %p5417_p9 = por %p5416_p8, %p5415_p7 }
 0x390   : > { %3588 = vmatpush.bf16.msra.mxu1 %v4933_v51  ;;  %v2808_v41 = vrot.slane %v2806_v18, 1  ;;  %v6566_v10 = vsel %vm1081_vm10, %v2917_v44, %v2918_v5  ;;  %v6575_v51 = vld [vmem:[#allocation3 + $0x24] sm:$0xff]   ;;  %v2835_v12 = vshrl.u32 %v6594_v39, 16  ;;  %v5296_v47 = vld [vmem:[#allocation3 + $0x3c] sm:$0xe]  ;;  %v4977_v58 = vld [vmem:[#allocation9 + $0x178] sm:$0xff]  ;;  %p5413_p5 = pneg %p5412_p3 }
 0x391   : > { %3637 = vmatpush.bf16.msra.mxu2 %v4941_v11  ;;  %v2818_v17 = vshll.u32 %v2780_v31, 16  ;;  %v5292_v11 = vld [vmem:[#allocation3 + $0x24] sm:$0xf0]  ;;  %v2816_v19 = vor.u32 %v2815_v37, %v2811_v24  ;;  %v2823_v50 = vshrl.u32 %v6575_v51, 16  ;;  %v4963_v27 = vld [vmem:[#allocation9 + $0x108] sm:$0xff]  ;;  %v4985_v4 = vld [vmem:[#allocation9 + $0x1b8] sm:$0xff] }
 0x392   : > { %3686 = vmatpush.bf16.msrb.mxu3 %v4949_v30  ;;  %v6563_v42 = vsel %vm920_vm9, %v2804_v53, %v2808_v41  ;;  %v5294_v52 = vor.u32 %v5293_v21, %v5292_v11  ;;  %v4956_v14 = vld [vmem:[#allocation9 + $0xd0] sm:$0xff]  ;;  %v2699_v53 = vld [vmem:[#allocation3 + $0x44] sm:$0x1]  ;;  %3878 = vmatpush.bf16.msra.mxu0 %v4985_v4  ;;  %v4974_v21 = vld [vmem:[#allocation9 + $0x160] sm:$0xff]  ;;  %p5418_p12 = pnand %p5417_p9, %p5413_p5 }
 0x393   : > { %v2820_v30 = vrot.slane %v2818_v17, 1  ;;  %v2775_v44 = vunpack.c.l.b16 %v2699_v53  ;;  %v4976_v15 = vld [vmem:[#allocation9 + $0x170] sm:$0xff]  ;;  %v4970_v53 = vld [vmem:[#allocation9 + $0x140] sm:$0xff]  ;;  %v4993_v4 = vld [vmem:[#allocation9 + $0x1f8] sm:$0xff] }
 0x394   : > { %3589 = vmatpush.bf16.msra.mxu1 %v4932_v59  ;;  %v2921_v59 = vrot.slane %v2780_v31, 1  ;;  %v4984_v24 = vld [vmem:[#allocation9 + $0x1b0] sm:$0xff] }
 0x395   : > { %3638 = vmatpush.bf16.msra.mxu2 %v4940_v34  ;;  %v2697_v34 = vld [vmem:[#allocation3 + $0x2c] sm:$0x1]  ;;  %v6578_v20 = vsel %vm920_vm9, %v2816_v19, %v2820_v30  ;;  %v4975_v19 = vld [vmem:[#allocation9 + $0x168] sm:$0xff] }
 0x396   : > { %3687 = vmatpush.bf16.msrb.mxu3 %v4948_v57  ;;  %v2773_v62 = vunpack.c.l.b16 %v2697_v34  ;;  %3879 = vmatpush.bf16.msra.mxu0 %v4984_v24 }
 0x398   : > { %3590 = vmatpush.bf16.msra.mxu1 %v4931_v40  ;;  %v2781_v40 = vpack.c.b16 %v2773_v62, %v2773_v62  ;;  %v2700_v62 = vld [vmem:[#allocation3 + $0x50] sm:$0x1] }
 0x399   : > { %3639 = vmatpush.bf16.msra.mxu2 %v4939_v23  ;;  %v2825_v23 = vshll.u32 %v6575_v51, 16 }
 0x39a   : > { %3688 = vmatpush.bf16.msrb.mxu3 %v4947_v54  ;;  %v2830_v54 = vshll.u32 %v2781_v40, 16  ;;  %v2924_v32 = vrot.slane %v2781_v40, 1  ;;  %v2776_v40 = vunpack.c.l.b16 %v2700_v62  ;;  %v5000_v62 = vld [vmem:[#allocation9 + $0x230] sm:$0xff] }
 0x39b   : > { %v2827_v0 = vrot.slane %v2825_v23, 1 }
 0x39c   : > { %3591 = vmatpush.bf16.msra.mxu1 %v4930_v6  ;;  %v2832_v6 = vrot.slane %v2830_v54, 1 }
 0x39d   : > { %3640 = vmatpush.bf16.msra.mxu2 %v4938_v26  ;;  %v2828_v49 = vor.u32 %v2827_v0, %v2823_v50  ;;  %v2923_v26 = vrot.slane %v5294_v52, 1  ;;  %v4962_v50 = vld [vmem:[#allocation9 + $0x100] sm:$0xff]  ;;  %v2784_v0 = vpack.c.b16 %v2776_v40, %v2776_v40  ;;  %v4973_v52 = vld [vmem:[#allocation9 + $0x158] sm:$0xff] }
 0x39e   : > { %3689 = vmatpush.bf16.msrb.mxu3 %v4946_v63  ;;  %v6654_v40 = vld [vmem:[%s6908_s4] ss:$0 sm:$0xff] }
 0x39f   : > { %3592 = vmatmul.bf16.vlgmr.msra.gmra.mxu1 %v5028_v61  ;;  %v2920_v61 = vrot.slane %v5111_v2, 1  ;;  %v6589_v63 = vsel %vm920_vm9, %v2828_v49, %v2832_v6  ;;  %v6592_v9 = vsel %vm1081_vm10, %v2923_v26, %v2924_v32  ;;  %v4983_v49 = vld [vmem:[#allocation9 + $0x1a8] sm:$0xff]  ;;  %v4954_v6 = vld [vmem:[#allocation9 + $0xc0] sm:$0xff]  ;;  %v5115_v26 = vld [vmem:[#allocation3 + $0x48] sm:$0xf0] }
 0x3a0   : > { %3731 = vmatpush.bf16.msrb.mxu1 %v4961_v35  ;;  %3641 = vmatmul.bf16.vlgmr.msra.gmra.mxu2 %v2797_v28  ;;  %v2837_v28 = vshll.u32 %v6594_v39, 16  ;;  %v5116_v32 = vld [vmem:[#allocation3 + $0x48] sm:$0xe] }
 0x3a1   : > { %3780 = vmatpush.bf16.msrb.mxu2 %v4969_v33  ;;  %3690 = vmatmul.bf16.vlgmr.msrb.gmra.mxu3 %v2916_v16  ;;  %v6581_v57 = vsel %vm1081_vm10, %v2920_v61, %v2921_v59  ;;  %v2774_v33 = vunpack.c.l.b16 %v2698_v46  ;;  %v5112_v16 = vld [vmem:[#allocation3 + $0x30] sm:$0xf0]  ;;  %v4972_v46 = vld [vmem:[#allocation9 + $0x150] sm:$0xff] }
 0x3a2   : > { %3829 = vmatpush.bf16.msra.mxu3 %v4977_v58  ;;  %3880 = vmatpush.bf16.msra.mxu0 %v4983_v49 }
 0x3a3   : > { %v2782_v35 = vpack.c.b16 %v2774_v33, %v2774_v33  ;;  %v4982_v33 = vld [vmem:[#allocation9 + $0x1a0] sm:$0xff] }
 0x3a4   : > { %3732 = vmatpush.bf16.msrb.mxu1 %v4960_v29  ;;  %v2839_v29 = vrot.slane %v2837_v28, 1  ;;  %v2866_v28 = vshll.u32 %v2784_v0, 16 }
 0x3a5   : > { %3781 = vmatpush.bf16.msrb.mxu2 %v4968_v45  ;;  %v5113_v45 = vld [vmem:[#allocation3 + $0x30] sm:$0xe]  ;;  %v2842_v7 = vshll.u32 %v2782_v35, 16  ;;  %v2927_v13 = vrot.slane %v2782_v35, 1 }
 0x3a6   : > { %v5114_v25 = vor.u32 %v5113_v45, %v5112_v16  ;;  %v2840_v36 = vor.u32 %v2839_v29, %v2835_v12  ;;  %3830 = vmatpush.bf16.msra.mxu3 %v4976_v15  ;;  %v6627_v16 = vld [vmem:[#allocation3 + $0x54] sm:$0xff]   ;;  %3881 = vmatpush.bf16.msra.mxu0 %v4982_v33  ;;  %v4971_v12 = vld [vmem:[#allocation9 + $0x148] sm:$0xff] }
 0x3a7   : > { %v2844_v8 = vrot.slane %v2842_v7, 1  ;;  %v5298_v45 = vld [vmem:[#allocation3 + $0x54] sm:$0xf0]  ;;  %v4981_v29 = vld [vmem:[#allocation9 + $0x198] sm:$0xff]  ;;  %v2873_v58 = vshll.u32 %v6627_v16, 16  ;;  %v2871_v15 = vshrl.u32 %v6627_v16, 16 }
 0x3a8   : > { %3733 = vmatpush.bf16.msrb.mxu1 %v4959_v60  ;;  %v5295_v60 = vld [vmem:[#allocation3 + $0x3c] sm:$0xf0]  ;;  %v2926_v18 = vrot.slane %v5114_v25, 1  ;;  %v2868_v25 = vrot.slane %v2866_v28, 1 }
 0x3a9   : > { %3782 = vmatpush.bf16.msrb.mxu2 %v4967_v38  ;;  %v6601_v38 = vld [vmem:[#allocation3 + $0x3c] sm:$0xff]   ;;  %v6604_v41 = vsel %vm920_vm9, %v2840_v36, %v2844_v8  ;;  %v5297_v11 = vor.u32 %v5296_v47, %v5295_v60  ;;  %v2933_v36 = vrot.slane %v2784_v0, 1  ;;  %v2875_v24 = vrot.slane %v2873_v58, 1 }
 0x3aa   : > { %v6607_v5 = vsel %vm1081_vm10, %v2926_v18, %v2927_v13  ;;  %v2849_v31 = vshll.u32 %v6601_v38, 16  ;;  %v2847_v37 = vshrl.u32 %v6601_v38, 16  ;;  %3831 = vmatpush.bf16.msra.mxu3 %v4975_v19  ;;  %v2701_v8 = vld [vmem:[#allocation3 + $0x5c] sm:$0x1]  ;;  %3882 = vmatpush.bf16.msra.mxu0 %v4981_v29 }
 0x3ab   : > { %v2929_v59 = vrot.slane %v5297_v11, 1  ;;  %v2777_v13 = vunpack.c.l.b16 %v2701_v8  ;;  %v2876_v11 = vor.u32 %v2875_v24, %v2871_v15 }
 0x3ac   : > { %3734 = vmatpush.bf16.msrb.mxu1 %v4958_v22  ;;  %v4955_v22 = vld [vmem:[#allocation9 + $0xc8] sm:$0xff]  ;;  %v2851_v17 = vrot.slane %v2849_v31, 1 }
 0x3ad   : > { %3783 = vmatpush.bf16.msrb.mxu2 %v4966_v55  ;;  %v2783_v55 = vpack.c.b16 %v2775_v44, %v2775_v44  ;;  %v4980_v44 = vld [vmem:[#allocation9 + $0x190] sm:$0xff]  ;;  %v2785_v31 = vpack.c.b16 %v2777_v13, %v2777_v13 }
 0x3ae   : > { %v2852_v30 = vor.u32 %v2851_v17, %v2847_v37  ;;  %3832 = vmatpush.bf16.msra.mxu3 %v4974_v21  ;;  %3883 = vmatpush.bf16.msra.mxu0 %v4980_v44  ;;  %v4978_v17 = vld [vmem:[#allocation9 + $0x180] sm:$0xff]  ;;  %v4992_v21 = vld [vmem:[#allocation9 + $0x1f0] sm:$0xff] }
 0x3af   : > { %3597 = vmatmul.bf16.gmra.mxu1 %v6556_v43  ;;  %v2854_v2 = vshll.u32 %v2783_v55, 16  ;;  %v2930_v34 = vrot.slane %v2783_v55, 1  ;;  %v5001_v55 = vld [vmem:[#allocation9 + $0x238] sm:$0xff]  ;;  %v2878_v37 = vshll.u32 %v2785_v31, 16 }
 0x3b0   : > { %3646 = vmatmul.bf16.gmra.mxu2 %v6563_v42  ;;  %3735 = vmatpush.bf16.msrb.mxu1 %v4957_v1  ;;  %v6620_v1 = vld [vmem:[#allocation3 + $0x48] sm:$0xff]  }
 0x3b1   : > { %3695 = vmatmul.bf16.gmra.mxu3 %v6566_v10  ;;  %3784 = vmatpush.bf16.msrb.mxu2 %v4965_v48  ;;  %v2856_v61 = vrot.slane %v2854_v2, 1  ;;  %v6618_v23 = vsel %vm1081_vm10, %v2929_v59, %v2930_v34  ;;  %v2861_v54 = vshll.u32 %v6620_v1, 16  ;;  %v2880_v19 = vrot.slane %v2878_v37, 1 }
 0x3b2   : > { %3833 = vmatpush.bf16.msra.mxu3 %v4973_v52 }
 0x3b3   : > { %v6615_v48 = vsel %vm920_vm9, %v2852_v30, %v2856_v61  ;;  %v2863_v35 = vrot.slane %v2861_v54, 1  ;;  %v2936_v61 = vrot.slane %v2785_v31, 1  ;;  %v6642_v59 = vsel %vm920_vm9, %v2876_v11, %v2880_v19  ;;  %v4999_v54 = vld [vmem:[#allocation9 + $0x228] sm:$0xff] }
 0x3b4   : > { %3736 = vmatpush.bf16.msrb.mxu1 %v4956_v14  ;;  %v5117_v14 = vor.u32 %v5116_v32, %v5115_v26  ;;  %v4991_v26 = vld [vmem:[#allocation9 + $0x1e8] sm:$0xff] }
 0x3b5   : > { %3785 = vmatpush.bf16.msrb.mxu2 %v4964_v3  ;;  %v2859_v3 = vshrl.u32 %v6620_v1, 16 }
 0x3b6   : > { %3834 = vmatpush.bf16.msra.mxu3 %v4972_v46  ;;  %v2932_v60 = vrot.slane %v5117_v14, 1  ;;  %v4998_v14 = vld [vmem:[#allocation9 + $0x220] sm:$0xff] }
 0x3b7   : > { %v2864_v7 = vor.u32 %v2863_v35, %v2859_v3 }
 0x3b8   : > { %3737 = vmatpush.bf16.msrb.mxu1 %v4955_v22  ;;  %v6633_v47 = vsel %vm1081_vm10, %v2932_v60, %v2933_v36  ;;  %v4979_v22 = vld [vmem:[#allocation9 + $0x188] sm:$0xff] }
 0x3b9   : > { %3786 = vmatpush.bf16.msrb.mxu2 %v4963_v27  ;;  %v6630_v18 = vsel %vm920_vm9, %v2864_v7, %v2868_v25  ;;  %v5299_v27 = vld [vmem:[#allocation3 + $0x54] sm:$0xe]  ;;  %3884 = vmatpush.bf16.msra.mxu0 %v4979_v22  ;;  %v4990_v7 = vld [vmem:[#allocation9 + $0x1e0] sm:$0xff] }
 0x3ba   : > { %3835 = vmatpush.bf16.msra.mxu3 %v4971_v12  ;;  %v5300_v2 = vor.u32 %v5299_v27, %v5298_v45 }
 0x3bc   : > { %3738 = vmatpush.bf16.msrb.mxu1 %v4954_v6  ;;  %v2935_v30 = vrot.slane %v5300_v2, 1 }
 0x3bd   : > { %3787 = vmatpush.bf16.msrb.mxu2 %v4962_v50  ;;  %3885 = vmatpush.bf16.msra.mxu0 %v4978_v17 }
 0x3be   : > { %3836 = vmatpush.bf16.msra.mxu3 %v4970_v53  ;;  %v6645_v34 = vsel %vm1081_vm10, %v2935_v30, %v2936_v61  ;;  %v4996_v61 = vld [vmem:[#allocation9 + $0x210] sm:$0xff] }
 0x3bf   : > { %3602 = vmatmul.bf16.gmra.mxu1 %v6568_v56 }
 0x3c0   : > { %3651 = vmatmul.bf16.gmra.mxu2 %v6578_v20  ;;  %3927 = vmatpush.bf16.msra.mxu1 %v4993_v4  ;;  %v4989_v4 = vld [vmem:[#allocation9 + $0x1d8] sm:$0xff] }
 0x3c1   : > { %3700 = vmatmul.bf16.gmra.mxu3 %v6581_v57  ;;  %3976 = vmatpush.bf16.msra.mxu2 %v5001_v55  ;;  %v4997_v55 = vld [vmem:[#allocation9 + $0x218] sm:$0xff] }
 0x3c2   : > { %3886 = vmatmul.bf16.vlgmr.msra.gmra.mxu0 %v6568_v56 }
 0x3c4   : > { %3928 = vmatpush.bf16.msra.mxu1 %v4992_v21 }
 0x3c5   : > { %3977 = vmatpush.bf16.msra.mxu2 %v5000_v62 }
 0x3c8   : > { %3929 = vmatpush.bf16.msra.mxu1 %v4991_v26 }
 0x3c9   : > { %3978 = vmatpush.bf16.msra.mxu2 %v4999_v54 }
 0x3cc   : > { %3930 = vmatpush.bf16.msra.mxu1 %v4990_v7 }
 0x3cd   : > { %3979 = vmatpush.bf16.msra.mxu2 %v4998_v14  ;;  %v4987_v14 = vld [vmem:[#allocation9 + $0x1c8] sm:$0xff] }
 0x3cf   : > { %3607 = vmatmul.bf16.gmra.mxu1 %v6575_v51 }
 0x3d0   : > { %3656 = vmatmul.bf16.gmra.mxu2 %v6589_v63  ;;  %3931 = vmatpush.bf16.msra.mxu1 %v4989_v4  ;;  %v6709_v4 = vld [vmem:[#allocation3 + $0x6c] sm:$0xff]  }
 0x3d1   : > { %3705 = vmatmul.bf16.gmra.mxu3 %v6592_v9  ;;  %3980 = vmatpush.bf16.msra.mxu2 %v4997_v55 }
 0x3d2   : > { %3891 = vmatmul.bf16.gmra.mxu0 %v6575_v51 }
 0x3d5   : > { %3981 = vmatpush.bf16.msra.mxu2 %v4996_v61 }
 0x3df   : > { %3612 = vmatmul.bf16.gmra.mxu1 %v6594_v39 }
 0x3e0   : > { %3661 = vmatmul.bf16.gmra.mxu2 %v6604_v41 }
 0x3e1   : > { %3710 = vmatmul.bf16.gmra.mxu3 %v6607_v5 }
 0x3e2   : > { %3896 = vmatmul.bf16.gmra.mxu0 %v6594_v39 }
 0x3ef   : > { %3617 = vmatmul.bf16.gmra.mxu1 %v6601_v38 }
 0x3f0   : > { %3666 = vmatmul.bf16.gmra.mxu2 %v6615_v48 }
 0x3f1   : > { %3715 = vmatmul.bf16.gmra.mxu3 %v6618_v23 }
 0x3f2   : > { %3901 = vmatmul.bf16.gmra.mxu0 %v6601_v38 }
 0x3ff   : > { %3622 = vmatmul.bf16.gmra.mxu1 %v6620_v1 }
 0x400   : > { %3671 = vmatmul.bf16.gmra.mxu2 %v6630_v18 }
 0x401   : > { %3720 = vmatmul.bf16.gmra.mxu3 %v6633_v47 }
 0x402   : > { %3906 = vmatmul.bf16.gmra.mxu0 %v6620_v1 }
 0x40f   : > { %3627 = vmatmul.bf16.gmra.mxu1 %v6627_v16 }
 0x410   : > { %3676 = vmatmul.bf16.gmra.mxu2 %v6642_v59 }
 0x411   : > { %3725 = vmatmul.bf16.gmra.mxu3 %v6645_v34 }
 0x412   : > { %3911 = vmatmul.bf16.gmra.mxu0 %v6627_v16 }
 0x41c   : > { %v3593_v50 = vpop.f32.mrf.mxu1 }
 0x41d   : > { %v3594_v0 = vadd.f32 %v6654_v40, %v3593_v50 }
 0x41f   : > { %3739 = vmatmul.bf16.vlgmr.msrb.gmra.mxu1 %v6556_v43 }
 0x420   : > { %3788 = vmatmul.bf16.vlgmr.msrb.gmra.mxu2 %v6563_v42 }
 0x421   : > { %3837 = vmatmul.bf16.vlgmr.msra.gmra.mxu3 %v6566_v10 }
 0x423   : > { %v3642_v52 = vpop.f32.mrf.mxu2 }
 0x424   : > { %v3643_v49 = vadd.f32 %v3642_v52, %v3594_v0  ;;  %v3691_v6 = vpop.f32.mrf.mxu3  ;;  %v3595_v32 = vpop.f32.mrf.mxu1  ;;  %v4988_v0 = vld [vmem:[#allocation9 + $0x1d0] sm:$0xff] }
 0x425   : > { %v3596_v33 = vadd.f32 %v6654_v40, %v3595_v32  ;;  %3932 = vmatpush.bf16.msra.mxu1 %v4988_v0 }
 0x426   : > { %v6660_v46 = vadd.f32 %v3691_v6, %v3643_v49 }
 0x429   : > { %3933 = vmatpush.bf16.msra.mxu1 %v4987_v14 }
 0x42b   : > { %v3644_v3 = vpop.f32.mrf.mxu2 }
 0x42c   : > { %v3645_v43 = vadd.f32 %v3644_v3, %v3596_v33  ;;  %v3693_v35 = vpop.f32.mrf.mxu3  ;;  %v3598_v42 = vpop.f32.mrf.mxu1 }
 0x42d   : > { %v3599_v10 = vadd.f32 %v6654_v40, %v3598_v42 }
 0x42e   : > { %v6664_v28 = vadd.f32 %v3693_v35, %v3645_v43  ;;  %v4995_v43 = vld [vmem:[#allocation9 + $0x208] sm:$0xff] }
 0x42f   : > { %3744 = vmatmul.bf16.gmra.mxu1 %v6568_v56  ;;  %3982 = vmatpush.bf16.msra.mxu2 %v4995_v43 }
 0x430   : > { %3793 = vmatmul.bf16.gmra.mxu2 %v6578_v20 }
 0x431   : > { %3842 = vmatmul.bf16.gmra.mxu3 %v6581_v57 }
 0x433   : > { %v3647_v45 = vpop.f32.mrf.mxu2 }
 0x434   : > { %v3648_v12 = vadd.f32 %v3647_v45, %v3599_v10  ;;  %v3696_v29 = vpop.f32.mrf.mxu3  ;;  %v3600_v25 = vpop.f32.mrf.mxu1 }
 0x435   : > { %v3601_v36 = vadd.f32 %v6654_v40, %v3600_v25 }
 0x436   : > { %v6670_v60 = vadd.f32 %v3696_v29, %v3648_v12  ;;  %v5105_v29 = vld [vmem:[#allocation3 + $0x60] sm:$0xff]  }
 0x437   : > { %3916 = vmatmul.bf16.gmra.mxu0 %v5105_v29  ;;  %v2958_v0 = vshll.u32 %v5105_v29, 16 }
 0x439   : > { %v2960_v43 = vrot.slane %v2958_v0, 1 }
 0x43b   : > { %v3649_v8 = vpop.f32.mrf.mxu2 }
 0x43c   : > { %v3650_v56 = vadd.f32 %v3649_v8, %v3601_v36  ;;  %v3698_v13 = vpop.f32.mrf.mxu3  ;;  %v3603_v53 = vpop.f32.mrf.mxu1 }
 0x43d   : > { %v3604_v27 = vadd.f32 %v6654_v40, %v3603_v53  ;;  %v4994_v53 = vld [vmem:[#allocation9 + $0x200] sm:$0xff] }
 0x43e   : > { %v6674_v44 = vadd.f32 %v3698_v13, %v3650_v56  ;;  %3983 = vmatpush.bf16.msra.mxu2 %v4994_v53 }
 0x43f   : > { %3749 = vmatmul.bf16.gmra.mxu1 %v6575_v51 }
 0x440   : > { %3798 = vmatmul.bf16.gmra.mxu2 %v6589_v63 }
 0x441   : > { %3847 = vmatmul.bf16.gmra.mxu3 %v6592_v9 }
 0x443   : > { %v3652_v31 = vpop.f32.mrf.mxu2 }
 0x444   : > { %v3653_v58 = vadd.f32 %v3652_v31, %v3604_v27  ;;  %v3701_v22 = vpop.f32.mrf.mxu3  ;;  %v3605_v15 = vpop.f32.mrf.mxu1 }
 0x445   : > { %v3606_v37 = vadd.f32 %v6654_v40, %v3605_v15  ;;  %v6711_v15 = vld [vmem:[#allocation3 + $0x6c] sm:$0xf0] }
 0x446   : > { %v6680_v24 = vadd.f32 %v3701_v22, %v3653_v58  ;;  %v4986_v58 = vld [vmem:[#allocation9 + $0x1c0] sm:$0xff] }
 0x447   : > { %3934 = vmatpush.bf16.msra.mxu1 %v4986_v58  ;;  %3921 = vmatmul.bf16.gmra.mxu0 %v6709_v4 }
 0x44b   : > { %v3654_v17 = vpop.f32.mrf.mxu2 }
 0x44c   : > { %v3655_v51 = vadd.f32 %v3654_v17, %v3606_v37  ;;  %v3703_v2 = vpop.f32.mrf.mxu3  ;;  %v3608_v11 = vpop.f32.mrf.mxu1  ;;  %v2702_v17 = vld [vmem:[#allocation3 + $0x68] sm:$0x1] }
 0x44d   : > { %v3609_v30 = vadd.f32 %v6654_v40, %v3608_v11  ;;  %v2953_v61 = vunpack.c.l.b16 %v2702_v17 }
 0x44e   : > { %v6684_v19 = vadd.f32 %v3703_v2, %v3655_v51 }
 0x44f   : > { %3754 = vmatmul.bf16.gmra.mxu1 %v6594_v39 }
 0x450   : > { %3803 = vmatmul.bf16.gmra.mxu2 %v6604_v41 }
 0x451   : > { %3852 = vmatmul.bf16.gmra.mxu3 %v6607_v5 }
 0x453   : > { %v3657_v62 = vpop.f32.mrf.mxu2 }
 0x454   : > { %v3658_v21 = vadd.f32 %v3657_v62, %v3609_v30  ;;  %v3706_v50 = vpop.f32.mrf.mxu3  ;;  %v3610_v54 = vpop.f32.mrf.mxu1 }
 0x455   : > { %v3611_v49 = vadd.f32 %v6654_v40, %v3610_v54 }
 0x456   : > { %v6690_v52 = vadd.f32 %v3706_v50, %v3658_v21  ;;  %v2954_v50 = vpack.c.b16 %v2953_v61, %v2953_v61 }
 0x45b   : > { %v3659_v6 = vpop.f32.mrf.mxu2 }
 0x45c   : > { %v3660_v39 = vadd.f32 %v3659_v6, %v3611_v49  ;;  %v3708_v26 = vpop.f32.mrf.mxu3  ;;  %v3613_v32 = vpop.f32.mrf.mxu1  ;;  %v5118_v49 = vld [vmem:[#allocation3 + $0x60] sm:$0xf0]  ;;  %v5119_v6 = vld [vmem:[#allocation3 + $0x60] sm:$0xe] }
 0x45d   : > { %v3614_v3 = vadd.f32 %v6654_v40, %v3613_v32 }
 0x45e   : > { %v6694_v33 = vadd.f32 %v3708_v26, %v3660_v39 }
 0x45f   : > { %3759 = vmatmul.bf16.gmra.mxu1 %v6601_v38 }
 0x460   : > { %3808 = vmatmul.bf16.gmra.mxu2 %v6615_v48 }
 0x461   : > { %3857 = vmatmul.bf16.gmra.mxu3 %v6618_v23 }
 0x463   : > { %v3662_v35 = vpop.f32.mrf.mxu2 }
 0x464   : > { %v3663_v42 = vadd.f32 %v3662_v35, %v3614_v3  ;;  %v3711_v10 = vpop.f32.mrf.mxu3  ;;  %v3615_v45 = vpop.f32.mrf.mxu1  ;;  %v2956_v3 = vshrl.u32 %v5105_v29, 16  ;;  %v2963_v35 = vshll.u32 %v2954_v50, 16 }
 0x465   : > { %v3616_v7 = vadd.f32 %v6654_v40, %v3615_v45 }
 0x466   : > { %v6700_v12 = vadd.f32 %v3711_v10, %v3663_v42  ;;  %v5120_v10 = vor.u32 %v5119_v6, %v5118_v49  ;;  %v2961_v14 = vor.u32 %v2960_v43, %v2956_v3 }
 0x46b   : > { %v3664_v25 = vpop.f32.mrf.mxu2 }
 0x46c   : > { %v3665_v38 = vadd.f32 %v3664_v25, %v3616_v7  ;;  %v3713_v36 = vpop.f32.mrf.mxu3  ;;  %v3618_v8 = vpop.f32.mrf.mxu1  ;;  %v2971_v7 = vrot.slane %v5120_v10, 1  ;;  %v2972_v25 = vrot.slane %v2954_v50, 1 }
 0x46d   : > { %v3619_v13 = vadd.f32 %v6654_v40, %v3618_v8 }
 0x46e   : > { %v6703_v56 = vadd.f32 %v3713_v36, %v3665_v38 }
 0x46f   : > { %3764 = vmatmul.bf16.gmra.mxu1 %v6620_v1 }
 0x470   : > { %3813 = vmatmul.bf16.gmra.mxu2 %v6630_v18 }
 0x471   : > { %3862 = vmatmul.bf16.gmra.mxu3 %v6633_v47 }
 0x473   : > { %v3667_v27 = vpop.f32.mrf.mxu2 }
 0x474   : > { %v3668_v55 = vadd.f32 %v3667_v27, %v3619_v13  ;;  %v3716_v31 = vpop.f32.mrf.mxu3  ;;  %v3620_v22 = vpop.f32.mrf.mxu1 }
 0x475   : > { %v3621_v1 = vadd.f32 %v6654_v40, %v3620_v22 }
 0x476   : > { %v6713_v37 = vadd.f32 %v3716_v31, %v3668_v55  ;;  %v6732_v55 = vsel %vm1081_vm10, %v2971_v7, %v2972_v25 }
 0x47b   : > { %v3669_v51 = vpop.f32.mrf.mxu2 }
 0x47c   : > { %v3670_v2 = vadd.f32 %v3669_v51, %v3621_v1  ;;  %v3718_v11 = vpop.f32.mrf.mxu3  ;;  %v3623_v30 = vpop.f32.mrf.mxu1 }
 0x47d   : > { %v3624_v21 = vadd.f32 %v6654_v40, %v3623_v30 }
 0x47e   : > { %v6717_v62 = vadd.f32 %v3718_v11, %v3670_v2 }
 0x47f   : > { %3769 = vmatmul.bf16.gmra.mxu1 %v6627_v16  ;;  %v2965_v16 = vrot.slane %v2963_v35, 1 }
 0x480   : > { %3818 = vmatmul.bf16.gmra.mxu2 %v6642_v59 }
 0x481   : > { %3867 = vmatmul.bf16.gmra.mxu3 %v6645_v34  ;;  %v6727_v53 = vsel %vm920_vm9, %v2961_v14, %v2965_v16 }
 0x483   : > { %v3672_v54 = vpop.f32.mrf.mxu2 }
 0x484   : > { %v3673_v39 = vadd.f32 %v3672_v54, %v3624_v21  ;;  %v3721_v26 = vpop.f32.mrf.mxu3  ;;  %v3625_v32 = vpop.f32.mrf.mxu1 }
 0x485   : > { %v3626_v45 = vadd.f32 %v6654_v40, %v3625_v32 }
 0x486   : > { %v6723_v42 = vadd.f32 %v3721_v26, %v3673_v39 }
 0x48b   : > { %v3674_v38 = vpop.f32.mrf.mxu2 }
 0x48c   : > { %v3675_v36 = vadd.f32 %v3674_v38, %v3626_v45  ;;  %v3723_v8 = vpop.f32.mrf.mxu3  ;;  %v3628_v13 = vpop.f32.mrf.mxu1 }
 0x48d   : > { %v3629_v31 = vadd.f32 %v6654_v40, %v3628_v13 }
 0x48e   : > { %v6729_v27 = vadd.f32 %v3723_v8, %v3675_v36 }
 0x48f   : > { %3774 = vmatmul.bf16.gmra.mxu1 %v5105_v29 }
 0x490   : > { %3823 = vmatmul.bf16.gmra.mxu2 %v6727_v53 }
 0x491   : > { %3872 = vmatmul.bf16.gmra.mxu3 %v6732_v55 }
 0x493   : > { %v3677_v58 = vpop.f32.mrf.mxu2 }
 0x494   : > { %v3678_v22 = vadd.f32 %v3677_v58, %v3629_v31  ;;  %v3726_v1 = vpop.f32.mrf.mxu3  ;;  %v3630_v17 = vpop.f32.mrf.mxu1 }
 0x495   : > { %v3631_v2 = vadd.f32 %v6654_v40, %v3630_v17  ;;  %v2703_v17 = vld [vmem:[#allocation3 + $0x74] sm:$0x1] }
 0x496   : > { %v6737_v51 = vadd.f32 %v3726_v1, %v3678_v22 }
 0x49b   : > { %v3679_v11 = vpop.f32.mrf.mxu2 }
 0x49c   : > { %v3680_v30 = vadd.f32 %v3679_v11, %v3631_v2  ;;  %v3728_v61 = vpop.f32.mrf.mxu3  ;;  %v3740_v21 = vpop.f32.mrf.mxu1 }
 0x49d   : > { %v3741_v29 = vadd.f32 %v3740_v21, %v6660_v46 }
 0x49e   : > { %v6740_v50 = vadd.f32 %v3728_v61, %v3680_v30  ;;  %v2982_v61 = vunpack.c.l.b16 %v2703_v17 }
 0x49f   : > { %3935 = vmatmul.bf16.vlgmr.msra.gmra.mxu1 %v6578_v20 }
 0x4a0   : > { %3984 = vmatmul.bf16.vlgmr.msra.gmra.mxu2 %v6581_v57 }
 0x4a3   : > { %v3789_v0 = vpop.f32.mrf.mxu2 }
 0x4a4   : > { %v6745_v54 = vadd.f32 %v3789_v0, %v3741_v29  ;;  %v3742_v49 = vpop.f32.mrf.mxu1  ;;  %v3838_v2 = vpop.f32.mrf.mxu3 }
 0x4a5   : > { %v3743_v6 = vadd.f32 %v3742_v49, %v6664_v28  ;;  %v3887_v29 = vpop.f32.mrf.mxu0 }
 0x4ab   : > { %v3791_v39 = vpop.f32.mrf.mxu2 }
 0x4ac   : > { %v6748_v40 = vadd.f32 %v3791_v39, %v3743_v6  ;;  %v3745_v26 = vpop.f32.mrf.mxu1  ;;  %v3840_v49 = vpop.f32.mrf.mxu3  ;;  %v2985_v39 = vshrl.u32 %v6709_v4, 16 }
 0x4ad   : > { %v3746_v32 = vadd.f32 %v3745_v26, %v6670_v60 }
 0x4af   : > { %3940 = vmatmul.bf16.gmra.mxu1 %v6589_v63 }
 0x4b0   : > { %3989 = vmatmul.bf16.gmra.mxu2 %v6592_v9 }
 0x4b3   : > { %v3794_v46 = vpop.f32.mrf.mxu2 }
 0x4b4   : > { %v6753_v20 = vadd.f32 %v3794_v46, %v3746_v32  ;;  %v3747_v57 = vpop.f32.mrf.mxu1 }
 0x4b5   : > { %v3748_v3 = vadd.f32 %v3747_v57, %v6674_v44  ;;  %v3889_v57 = vpop.f32.mrf.mxu0 }
 0x4bb   : > { %v3796_v43 = vpop.f32.mrf.mxu2 }
 0x4bc   : > { %v6756_v35 = vadd.f32 %v3796_v43, %v3748_v3  ;;  %v3750_v28 = vpop.f32.mrf.mxu1 }
 0x4bd   : > { %v3751_v10 = vadd.f32 %v3750_v28, %v6680_v24 }
 0x4bf   : > { %3945 = vmatmul.bf16.gmra.mxu1 %v6604_v41 }
 0x4c0   : > { %3994 = vmatmul.bf16.gmra.mxu2 %v6607_v5 }
 0x4c3   : > { %v3799_v60 = vpop.f32.mrf.mxu2 }
 0x4c4   : > { %v6761_v63 = vadd.f32 %v3799_v60, %v3751_v10  ;;  %v3752_v9 = vpop.f32.mrf.mxu1 }
 0x4c5   : > { %v3753_v14 = vadd.f32 %v3752_v9, %v6684_v19 }
 0x4cb   : > { %v3801_v16 = vpop.f32.mrf.mxu2 }
 0x4cc   : > { %v6764_v45 = vadd.f32 %v3801_v16, %v3753_v14  ;;  %v3755_v44 = vpop.f32.mrf.mxu1  ;;  %v3843_v16 = vpop.f32.mrf.mxu3 }
 0x4cd   : > { %v3756_v7 = vadd.f32 %v3755_v44, %v6690_v52 }
 0x4cf   : > { %3950 = vmatmul.bf16.gmra.mxu1 %v6615_v48 }
 0x4d0   : > { %3999 = vmatmul.bf16.gmra.mxu2 %v6618_v23 }
 0x4d3   : > { %v3804_v24 = vpop.f32.mrf.mxu2 }
 0x4d4   : > { %v6769_v41 = vadd.f32 %v3804_v24, %v3756_v7  ;;  %v3757_v5 = vpop.f32.mrf.mxu1 }
 0x4d5   : > { %v3758_v25 = vadd.f32 %v3757_v5, %v6694_v33  ;;  %v3845_v5 = vpop.f32.mrf.mxu3 }
 0x4db   : > { %v3806_v38 = vpop.f32.mrf.mxu2 }
 0x4dc   : > { %v6772_v36 = vadd.f32 %v3806_v38, %v3758_v25  ;;  %v3760_v19 = vpop.f32.mrf.mxu1  ;;  %v3839_v38 = vadd.f32 %v3838_v2, %v6745_v54 }
 0x4dd   : > { %v3761_v8 = vadd.f32 %v3760_v19, %v6700_v12 }
 0x4df   : > { %3955 = vmatmul.bf16.gmra.mxu1 %v6630_v18 }
 0x4e0   : > { %4004 = vmatmul.bf16.gmra.mxu2 %v6633_v47 }
 0x4e3   : > { %v3809_v52 = vpop.f32.mrf.mxu2 }
 0x4e4   : > { %v6777_v48 = vadd.f32 %v3809_v52, %v3761_v8  ;;  %v3762_v23 = vpop.f32.mrf.mxu1 }
 0x4e5   : > { %v3763_v13 = vadd.f32 %v3762_v23, %v6703_v56  ;;  %v3888_v23 = vadd.f32 %v3887_v29, %v3839_v38 }
 0x4eb   : > { %v3811_v31 = vpop.f32.mrf.mxu2 }
 0x4ec   : > { %v6780_v58 = vadd.f32 %v3811_v31, %v3763_v13  ;;  %v3765_v33 = vpop.f32.mrf.mxu1 }
 0x4ed   : > { %v3766_v22 = vadd.f32 %v3765_v33, %v6713_v37  ;;  %v5302_v37 = vld [vmem:[#allocation3 + $0x6c] sm:$0xe]  ;;  %v3848_v33 = vpop.f32.mrf.mxu3 }
 0x4ef   : > { %3960 = vmatmul.bf16.gmra.mxu1 %v6642_v59  ;;  %v2983_v59 = vpack.c.b16 %v2982_v61, %v2982_v61 }
 0x4f0   : > { %4009 = vmatmul.bf16.gmra.mxu2 %v6645_v34  ;;  %v2987_v34 = vshll.u32 %v6709_v4, 16 }
 0x4f1   : > { %v2992_v32 = vshll.u32 %v2983_v59, 16  ;;  %v3001_v43 = vrot.slane %v2983_v59, 1 }
 0x4f2   : > { %v2989_v26 = vrot.slane %v2987_v34, 1 }
 0x4f3   : > { %v3814_v12 = vpop.f32.mrf.mxu2  ;;  %v2994_v3 = vrot.slane %v2992_v32, 1 }
 0x4f4   : > { %v6785_v18 = vadd.f32 %v3814_v12, %v3766_v22  ;;  %v3767_v47 = vpop.f32.mrf.mxu1  ;;  %v3841_v12 = vadd.f32 %v3840_v49, %v6748_v40  ;;  %v5121_v40 = vld [vmem:[%s5784_s7 + $0x8] sm:$0xff]  }
 0x4f5   : > { %v3768_v1 = vadd.f32 %v3767_v47, %v6717_v62  ;;  %v3850_v29 = vpop.f32.mrf.mxu3 }
 0x4f6   : > { %v3890_v54 = vadd.f32 %v3889_v57, %v3841_v12 }
 0x4fb   : > { %v3816_v11 = vpop.f32.mrf.mxu2 }
 0x4fc   : > { %v6788_v56 = vadd.f32 %v3816_v11, %v3768_v1  ;;  %v3770_v30 = vpop.f32.mrf.mxu1 }
 0x4fd   : > { %v3771_v21 = vadd.f32 %v3770_v30, %v6723_v42  ;;  %v5303_v42 = vor.u32 %v5302_v37, %v6711_v15  ;;  %v3892_v15 = vpop.f32.mrf.mxu0 }
 0x4ff   : > { %3965 = vmatmul.bf16.gmra.mxu1 %v6727_v53  ;;  %v2990_v53 = vor.u32 %v2989_v26, %v2985_v39  ;;  %v5053_v26 = vunpack.c.l.bf16 %v5121_v40 }
 0x500   : > { %4014 = vmatmul.bf16.gmra.mxu2 %v6732_v55  ;;  %v3000_v55 = vrot.slane %v5303_v42, 1  ;;  %v3846_v42 = vadd.f32 %v3845_v5, %v6756_v35  ;;  %v5122_v35 = vld [vmem:[%s5784_s7 + $0x10] sm:$0xff]  }
 0x501   : > { %v2995_v9 = vsel %vm920_vm9, %v2990_v53, %v2994_v3 }
 0x502   : > { %v3002_v14 = vsel %vm1081_vm10, %v3000_v55, %v3001_v43 }
 0x503   : > { %v3819_v0 = vpop.f32.mrf.mxu2 }
 0x504   : > { %v6794_v62 = vadd.f32 %v3819_v0, %v3771_v21  ;;  %v3772_v6 = vpop.f32.mrf.mxu1  ;;  %v3844_v21 = vadd.f32 %v3843_v16, %v6753_v20  ;;  %v3853_v20 = vpop.f32.mrf.mxu3 }
 0x505   : > { %v3773_v46 = vadd.f32 %v3772_v6, %v6729_v27  ;;  %v3894_v8 = vpop.f32.mrf.mxu0 }
 0x506   : > { %v3893_v0 = vadd.f32 %v3892_v15, %v3844_v21  ;;  %v3895_v3 = vadd.f32 %v3894_v8, %v3846_v42  ;;  %v3851_v8 = vadd.f32 %v3850_v29, %v6764_v45  ;;  %v5123_v45 = vld [vmem:[%s5784_s7 + $0x18] sm:$0xff]  }
 0x507   : > { %v5061_v21 = vunpack.c.l.bf16 %v5123_v45 }
 0x50b   : > { %v3821_v28 = vpop.f32.mrf.mxu2 }
 0x50c   : > { %v6799_v10 = vadd.f32 %v3821_v28, %v3773_v46  ;;  %v3775_v60 = vpop.f32.mrf.mxu1  ;;  %v5054_v28 = vunpack.c.h.bf16 %v5121_v40 }
 0x50d   : > { %v3776_v4 = vadd.f32 %v3775_v60, %v6737_v51  ;;  %v5048_v51 = vld [vmem:[%s5784_s7] sm:$0xff]   ;;  %v3897_v17 = vpop.f32.mrf.mxu0 }
 0x50e   : > { %v5049_v31 = vunpack.c.l.bf16 %v5048_v51  ;;  %v5050_v30 = vunpack.c.h.bf16 %v5048_v51 }
 0x50f   : > { %3970 = vmatmul.bf16.gmra.mxu1 %v2995_v9 }
 0x510   : > { %4019 = vmatmul.bf16.gmra.mxu2 %v3002_v14  ;;  %v3849_v14 = vadd.f32 %v3848_v33, %v6761_v63 }
 0x513   : > { %v3824_v27 = vpop.f32.mrf.mxu2 }
 0x514   : > { %v6804_v44 = vadd.f32 %v3824_v27, %v3776_v4  ;;  %v3777_v7 = vpop.f32.mrf.mxu1  ;;  %v3898_v27 = vadd.f32 %v3897_v17, %v3849_v14 }
 0x515   : > { %v3778_v24 = vadd.f32 %v3777_v7, %v6740_v50  ;;  %v3899_v6 = vpop.f32.mrf.mxu0 }
 0x516   : > { %v3900_v63 = vadd.f32 %v3899_v6, %v3851_v8 }
 0x51b   : > { %v3826_v25 = vpop.f32.mrf.mxu2 }
 0x51c   : > { %v6808_v19 = vadd.f32 %v3826_v25, %v3778_v24  ;;  %v3936_v52 = vpop.f32.mrf.mxu1  ;;  %v3855_v24 = vpop.f32.mrf.mxu3  ;;  %v5057_v25 = vunpack.c.l.bf16 %v5122_v35 }
 0x51d   : > { %v3937_v13 = vadd.f32 %v3936_v52, %v3888_v23  ;;  %v3902_v60 = vpop.f32.mrf.mxu0  ;;  %v3856_v29 = vadd.f32 %v3855_v24, %v6772_v36  ;;  %v5124_v36 = vld [vmem:[%s5784_s7 + $0x20] sm:$0xff]  }
 0x51e   : > { %v5066_v24 = vunpack.c.h.bf16 %v5124_v36 }
 0x523   : > { %v3985_v22 = vpop.f32.mrf.mxu2 }
 0x524   : > { %v3986_v47 = vadd.f32 %v3985_v22, %v3937_v13  ;;  %v3938_v50 = vpop.f32.mrf.mxu1  ;;  %v5058_v22 = vunpack.c.h.bf16 %v5122_v35  ;;  %v3858_v12 = vpop.f32.mrf.mxu3 }
 0x525   : > { %v3939_v11 = vadd.f32 %v3938_v50, %v3890_v54  ;;  %v3904_v51 = vpop.f32.mrf.mxu0  ;;  %v3854_v50 = vadd.f32 %v3853_v20, %v6769_v41  ;;  %v3859_v42 = vadd.f32 %v3858_v12, %v6777_v48 }
 0x526   : > { %v4057_v1 = vadd.f32 %v5049_v31, %v3986_v47  ;;  %v3905_v41 = vadd.f32 %v3904_v51, %v3856_v29 }
 0x528   : > { %v4073_v2 = vmax.f32 %v4057_v1, 0.0 }
 0x52a   : > { %4089 = vst [vmem:[%s5867_s10] sm:$0xff] %v4073_v2 }
 0x52b   : > { %v3987_v61 = vpop.f32.mrf.mxu2 }
 0x52c   : > { %v3988_v37 = vadd.f32 %v3987_v61, %v3939_v11  ;;  %v3941_v59 = vpop.f32.mrf.mxu1  ;;  %v3903_v11 = vadd.f32 %v3902_v60, %v3854_v50 }
 0x52d   : > { %v3942_v39 = vadd.f32 %v3941_v59, %v3893_v0  ;;  %v3907_v2 = vpop.f32.mrf.mxu0 }
 0x52e   : > { %v4058_v34 = vadd.f32 %v5050_v30, %v3988_v37 }
 0x530   : > { %v4074_v49 = vmax.f32 %v4058_v34, 0.0  ;;  %v3860_v34 = vpop.f32.mrf.mxu3 }
 0x531   : > { %v3861_v14 = vadd.f32 %v3860_v34, %v6780_v58  ;;  %v5125_v58 = vld [vmem:[%s5784_s7 + $0x28] sm:$0xff]  }
 0x532   : > { %4090 = vst [vmem:[%s5867_s10 + $0x8] sm:$0xff] %v4074_v49 }
 0x533   : > { %v3990_v32 = vpop.f32.mrf.mxu2 }
 0x534   : > { %v3991_v46 = vadd.f32 %v3990_v32, %v3942_v39  ;;  %v3943_v57 = vpop.f32.mrf.mxu1 }
 0x535   : > { %v3944_v43 = vadd.f32 %v3943_v57, %v3895_v3  ;;  %v3909_v6 = vpop.f32.mrf.mxu0  ;;  %v3908_v3 = vadd.f32 %v3907_v2, %v3859_v42 }
 0x536   : > { %v4059_v53 = vadd.f32 %v5053_v26, %v3991_v46  ;;  %v5062_v26 = vunpack.c.h.bf16 %v5123_v45  ;;  %v3910_v48 = vadd.f32 %v3909_v6, %v3861_v14  ;;  %v5070_v45 = vunpack.c.h.bf16 %v5125_v58 }
 0x538   : > { %v4075_v55 = vmax.f32 %v4059_v53, 0.0  ;;  %v3863_v20 = vpop.f32.mrf.mxu3 }
 0x53a   : > { %4091 = vst [vmem:[%s5867_s10 + $0x10] sm:$0xff] %v4075_v55 }
 0x53b   : > { %v3992_v9 = vpop.f32.mrf.mxu2 }
 0x53c   : > { %v3993_v4 = vadd.f32 %v3992_v9, %v3944_v43  ;;  %v3946_v16 = vpop.f32.mrf.mxu1 }
 0x53d   : > { %v3947_v5 = vadd.f32 %v3946_v16, %v3898_v27  ;;  %v3912_v60 = vpop.f32.mrf.mxu0 }
 0x53e   : > { %v4060_v15 = vadd.f32 %v5054_v28, %v3993_v4  ;;  %v5065_v28 = vunpack.c.l.bf16 %v5124_v36 }
 0x540   : > { %v4076_v7 = vmax.f32 %v4060_v15, 0.0  ;;  %v3865_v27 = vpop.f32.mrf.mxu3 }
 0x541   : > { %v3866_v12 = vadd.f32 %v3865_v27, %v6788_v56  ;;  %v5126_v56 = vld [vmem:[%s5784_s7 + $0x30] sm:$0xff]  }
 0x542   : > { %4092 = vst [vmem:[%s5867_s10 + $0x18] sm:$0xff] %v4076_v7 }
 0x543   : > { %v3995_v38 = vpop.f32.mrf.mxu2 }
 0x544   : > { %v3996_v52 = vadd.f32 %v3995_v38, %v3947_v5  ;;  %v3948_v23 = vpop.f32.mrf.mxu1 }
 0x545   : > { %v3949_v33 = vadd.f32 %v3948_v23, %v3900_v63  ;;  %v3914_v8 = vpop.f32.mrf.mxu0 }
 0x546   : > { %v4061_v13 = vadd.f32 %v5057_v25, %v3996_v52  ;;  %v3864_v25 = vadd.f32 %v3863_v20, %v6785_v18 }
 0x548   : > { %v4077_v31 = vmax.f32 %v4061_v13, 0.0  ;;  %v3913_v23 = vadd.f32 %v3912_v60, %v3864_v25 }
 0x54a   : > { %4093 = vst [vmem:[%s5867_s10 + $0x20] sm:$0xff] %v4077_v31  ;;  %v5069_v31 = vunpack.c.l.bf16 %v5125_v58 }
 0x54b   : > { %v3997_v47 = vpop.f32.mrf.mxu2 }
 0x54c   : > { %v3998_v1 = vadd.f32 %v3997_v47, %v3949_v33  ;;  %v3951_v17 = vpop.f32.mrf.mxu1  ;;  %v3868_v33 = vpop.f32.mrf.mxu3 }
 0x54d   : > { %v3952_v61 = vadd.f32 %v3951_v17, %v3903_v11  ;;  %v3917_v18 = vpop.f32.mrf.mxu0  ;;  %v3915_v17 = vadd.f32 %v3914_v8, %v3866_v12 }
 0x54e   : > { %v4062_v54 = vadd.f32 %v5058_v22, %v3998_v1 }
 0x550   : > { %v4078_v30 = vmax.f32 %v4062_v54, 0.0 }
 0x552   : > { %4094 = vst [vmem:[%s5867_s10 + $0x28] sm:$0xff] %v4078_v30  ;;  %v3869_v30 = vadd.f32 %v3868_v33, %v6794_v62 }
 0x553   : > { %v4000_v37 = vpop.f32.mrf.mxu2 }
 0x554   : > { %v4001_v59 = vadd.f32 %v4000_v37, %v3952_v61  ;;  %v3953_v40 = vpop.f32.mrf.mxu1 }
 0x555   : > { %v3954_v39 = vadd.f32 %v3953_v40, %v3905_v41  ;;  %v3919_v40 = vpop.f32.mrf.mxu0  ;;  %v5073_v41 = vunpack.c.l.bf16 %v5126_v56 }
 0x556   : > { %v4063_v0 = vadd.f32 %v5061_v21, %v4001_v59  ;;  %v3870_v21 = vpop.f32.mrf.mxu3  ;;  %v3918_v59 = vadd.f32 %v3917_v18, %v3869_v30 }
 0x557   : > { %v3871_v6 = vadd.f32 %v3870_v21, %v6799_v10 }
 0x558   : > { %v4079_v49 = vmax.f32 %v4063_v0, 0.0 }
 0x559   : > { %v3920_v42 = vadd.f32 %v3919_v40, %v3871_v6 }
 0x55a   : > { %4095 = vst [vmem:[%s5867_s10 + $0x30] sm:$0xff] %v4079_v49 }
 0x55b   : > { %v4002_v32 = vpop.f32.mrf.mxu2 }
 0x55c   : > { %v4003_v46 = vadd.f32 %v4002_v32, %v3954_v39  ;;  %v3956_v57 = vpop.f32.mrf.mxu1 }
 0x55d   : > { %v3957_v43 = vadd.f32 %v3956_v57, %v3908_v3  ;;  %v3922_v20 = vpop.f32.mrf.mxu0 }
 0x55e   : > { %v4064_v53 = vadd.f32 %v5062_v26, %v4003_v46  ;;  %v3873_v62 = vpop.f32.mrf.mxu3 }
 0x55f   : > { %v3874_v3 = vadd.f32 %v3873_v62, %v6804_v44 }
 0x560   : > { %v4080_v55 = vmax.f32 %v4064_v53, 0.0  ;;  %v5074_v53 = vunpack.c.h.bf16 %v5126_v56 }
 0x561   : > { %v3923_v60 = vadd.f32 %v3922_v20, %v3874_v3 }
 0x562   : > { %4096 = vst [vmem:[%s5867_s10 + $0x38] sm:$0xff] %v4080_v55 }
 0x563   : > { %v4005_v9 = vpop.f32.mrf.mxu2 }
 0x564   : > { %v4006_v4 = vadd.f32 %v4005_v9, %v3957_v43  ;;  %v3958_v16 = vpop.f32.mrf.mxu1 }
 0x565   : > { %v3959_v7 = vadd.f32 %v3958_v16, %v3910_v48  ;;  %v3924_v44 = vpop.f32.mrf.mxu0 }
 0x566   : > { %v4065_v15 = vadd.f32 %v5065_v28, %v4006_v4  ;;  %v5127_v28 = vld [vmem:[%s5784_s7 + $0x38] sm:$0xff]   ;;  %v3875_v14 = vpop.f32.mrf.mxu3 }
 0x567   : > { %v5077_v16 = vunpack.c.l.bf16 %v5127_v28  ;;  %v3876_v48 = vadd.f32 %v3875_v14, %v6808_v19 }
 0x568   : > { %v4081_v35 = vmax.f32 %v4065_v15, 0.0 }
 0x56a   : > { %4097 = vst [vmem:[%s5867_s10 + $0x40] sm:$0xff] %v4081_v35 }
 0x56b   : > { %v4007_v5 = vpop.f32.mrf.mxu2 }
 0x56c   : > { %v4008_v38 = vadd.f32 %v4007_v5, %v3959_v7  ;;  %v3961_v52 = vpop.f32.mrf.mxu1 }
 0x56d   : > { %v3962_v63 = vadd.f32 %v3961_v52, %v3913_v23 }
 0x56e   : > { %v4066_v51 = vadd.f32 %v5066_v24, %v4008_v38  ;;  %v3925_v24 = vadd.f32 %v3924_v44, %v3876_v48  ;;  %v5078_v38 = vunpack.c.h.bf16 %v5127_v28 }
 0x570   : > { %v4082_v13 = vmax.f32 %v4066_v51, 0.0 }
 0x572   : > { %4098 = vst [vmem:[%s5867_s10 + $0x48] sm:$0xff] %v4082_v13 }
 0x573   : > { %v4010_v22 = vpop.f32.mrf.mxu2 }
 0x574   : > { %v4011_v47 = vadd.f32 %v4010_v22, %v3962_v63  ;;  %v3963_v50 = vpop.f32.mrf.mxu1 }
 0x575   : > { %v3964_v2 = vadd.f32 %v3963_v50, %v3915_v17 }
 0x576   : > { %v4067_v1 = vadd.f32 %v5069_v31, %v4011_v47 }
 0x578   : > { %v4083_v54 = vmax.f32 %v4067_v1, 0.0 }
 0x57a   : > { %4099 = vst [vmem:[%s5867_s10 + $0x50] sm:$0xff] %v4083_v54 }
 0x57b   : > { %v4012_v11 = vpop.f32.mrf.mxu2 }
 0x57c   : > { %v4013_v61 = vadd.f32 %v4012_v11, %v3964_v2  ;;  %v3966_v37 = vpop.f32.mrf.mxu1 }
 0x57d   : > { %v3967_v0 = vadd.f32 %v3966_v37, %v3918_v59 }
 0x57e   : > { %v4068_v29 = vadd.f32 %v5070_v45, %v4013_v61 }
 0x580   : > { %v4084_v34 = vmax.f32 %v4068_v29, 0.0 }
 0x582   : > { %4100 = vst [vmem:[%s5867_s10 + $0x58] sm:$0xff] %v4084_v34 }
 0x583   : > { %v4015_v49 = vpop.f32.mrf.mxu2 }
 0x584   : > { %v4016_v39 = vadd.f32 %v4015_v49, %v3967_v0  ;;  %v3968_v26 = vpop.f32.mrf.mxu1 }
 0x585   : > { %v3969_v57 = vadd.f32 %v3968_v26, %v3920_v42 }
 0x586   : > { %v4069_v32 = vadd.f32 %v5073_v41, %v4016_v39 }
 0x588   : > { %v4085_v46 = vmax.f32 %v4069_v32, 0.0 }
 0x58a   : > { %4101 = vst [vmem:[%s5867_s10 + $0x60] sm:$0xff] %v4085_v46 }
 0x58b   : > { %v4017_v36 = vpop.f32.mrf.mxu2 }
 0x58c   : > { %v4018_v55 = vadd.f32 %v4017_v36, %v3969_v57  ;;  %v3971_v43 = vpop.f32.mrf.mxu1 }
 0x58d   : > { %v3972_v4 = vadd.f32 %v3971_v43, %v3923_v60 }
 0x58e   : > { %v4070_v10 = vadd.f32 %v5074_v53, %v4018_v55 }
 0x590   : > { %v4086_v9 = vmax.f32 %v4070_v10, 0.0 }
 0x592   : > { %4102 = vst [vmem:[%s5867_s10 + $0x68] sm:$0xff] %v4086_v9 }
 0x593   : > { %v4020_v15 = vpop.f32.mrf.mxu2 }
 0x594   : > { %v4021_v35 = vadd.f32 %v4020_v15, %v3972_v4  ;;  %v3973_v7 = vpop.f32.mrf.mxu1 }
 0x595   : > { %v3974_v25 = vadd.f32 %v3973_v7, %v3925_v24 }
 0x596   : > { %v4071_v27 = vadd.f32 %v5077_v16, %v4021_v35 }
 0x598   : > { %v4087_v5 = vmax.f32 %v4071_v27, 0.0 }
 0x59a   : > { %4103 = vst [vmem:[%s5867_s10 + $0x70] sm:$0xff] %v4087_v5 }
 0x59b   : > { %v4022_v8 = vpop.f32.mrf.mxu2 }
 0x59c   : > { %v4023_v52 = vadd.f32 %v4022_v8, %v3974_v25 }
 0x59e   : > { %v4072_v19 = vadd.f32 %v5078_v38, %v4023_v52 }
 0x5a0   : > { %v4088_v51 = vmax.f32 %v4072_v19, 0.0 }
 0x5a2   : > { %4104 = vst [vmem:[%s5867_s10 + $0x78] sm:$0xff] %v4088_v51 }
 0x5a3   : > { %5421 = shalt.err (!%p5418_p12)
}
 0x5a4   : > { %s5536_s18 = smov 128   ;;  %s5537_s10 = smov 8  }
 0x5a5   : > { %5154 = dma.vmem_to_hbm [thread:$0]  (%p5638_p6), %s4122_s29, 2048, %s4124_s16, %s4106_s13, %s5536_s18, %s5536_s18, %s5537_s10  }
 0x5a6 PF: > { %s6980_s9 = sld [smem:[#allocation14_spill]]  ;;  %p5176_p13 = scmp.ge.s32.totalorder %s5526_s28, 2 }
 0x5a8   : > { %p5168_p1 = pnand %p5176_p13, %p5644_p10 }
 0x5aa   : > { %p5169_p4 = pneg %p5168_p1 }
 0x5ac   : > { %s4138_s24 = sand.u32 1, %s6980_s9  }
 0x5ad   : > { %s4139_s5 = scalar_lea.sflag [#allocation6], %s4138_s24 }
 0x5ae   : > { %5475 = dma.done.wait (%p5169_p4), %s4139_s5, 2048  }
 0x5af   : > { %5477 = vsyncadd (%p5169_p4), %s4139_s5, 4294965248  ;;  %s22_s28 = sadd.s32 1, %s5526_s28   ;;  %s6982_s24 = sld [smem:[#allocation16_spill]] }
 0x5b0   : > { %p19_p11 = scmp.ge.s32.totalorder %s22_s28, 6   ;;  %s6983_s26 = sld [smem:[#allocation19_spill]] }
 0x5b1   : > { %s6984_s6 = sld [smem:[#allocation20_spill]]  ;;  %s6985_s18 = smov %s5490_s19 }
 0x5b2   : > { %s6986_s19 = smov %s5494_s20  ;;  %s6987_s20 = smov %s5695_s14 }
 0x5b3   : > { %s6988_s21 = smov %s5502_s22  ;;  %s6989_s22 = smov %s5506_s23 }
 0x5b4   : > { %s6990_s23 = smov %s5692_s3  ;;  %s6991_s25 = smov %s5522_s27 }
 0x5b5   :  { %21 = sbr.rel (!%p19_p11) target bundleno = 14 (0xe), region = 124 }
 0x5b7   : > { %s6992_s27 = smov %s6984_s6 }
 0x5ba   :  { %4145 = vsyncpa [#allocation5], 1 }
 0x5bb   :  { %4147 = vsyncpa [#allocation5 + $0x1], 1 }
 0x5bc   :  { %4148 = vsyncpa [#allocation8], 1 }
 0x5bd   :  { %4149 = vsyncpa [#allocation6], 1 }
 0x5be   :  { %4151 = vsyncpa [#allocation6 + $0x1], 1 }

</bundles_post_ra>
